<compile_context>
chip_gen: v6e
topology: v6e:2x2x1
jax: 0.10.0
libtpu: 0.0.40
codegen_flags: <defaults>
</compile_context>

<pallas_src>
import math

import jax
import jax.numpy as jnp
from jax.experimental import pallas as pl
from jax.experimental.pallas import tpu as pltpu

# ----------------------------- hyperparameters ------------------------------
N_NUM_FEATURES = 16                      # d_in
D_MAIN = 32
D_MULTIPLIER = 2.0
D_BLOCK = int(D_MAIN * D_MULTIPLIER)     # 64
CONTEXT_SIZE = 8
BATCH = 8
N_CANDIDATES = 32
EPS = 1e-5                               # nn.LayerNorm default eps
NEG = -1e30                              # finite "-inf" for masking
HEAD_PAD = 128                           # lane-dense head output width

# ------------------- packed parameter slab row offsets ----------------------
# WB64 slab (width d_block = 64): fan-out-64 matrices + their bias rows.
_W64_B0W1 = 0
_W64_B1W1 = _W64_B0W1 + D_MAIN
_W64_WT1 = _W64_B1W1 + D_MAIN
_W64_P1W1 = _W64_WT1 + D_MAIN
_W64_BIAS = _W64_P1W1 + D_MAIN           # 128: b0b1, b1b1, bt1, p1b1 (+ pad)
_W64_ROWS = _W64_BIAS + 8                # 136

# WB32 slab (width d_main = 32): fan-out-32 matrices + bias / LayerNorm rows.
_W32_WLIN = 0
_W32_B0W2 = _W32_WLIN + N_NUM_FEATURES
_W32_B1W2 = _W32_B0W2 + D_BLOCK
_W32_WK = _W32_B1W2 + D_BLOCK
_W32_WT2 = _W32_WK + D_MAIN
_W32_P1W2 = _W32_WT2 + D_BLOCK
_W32_BIAS = _W32_P1W2 + D_BLOCK          # 304
_W32_ROWS = _W32_BIAS + 16               # 320
# bias32 row order (within the 16-row tail tile):
#   blin, b0b2, b1g, b1b, b1b2, mng, mnb, bk, wle, ble, p1g, p1b, p1b2, hg, hb

# HEAD slab: wh in rows 0:D_MAIN (cols 0:2), bh in row D_MAIN (cols 0:2)
_HEAD_ROWS = 40


# ------------------------------- shared math --------------------------------
def _layernorm(x, g, b):
    mu = jnp.mean(x, axis=-1, keepdims=True)
    var = jnp.mean((x - mu) ** 2, axis=-1, keepdims=True)
    return (x - mu) * jax.lax.rsqrt(var + EPS) * g + b


# ------------------------------ fused kernel --------------------------------
def _tabr_fused_kernel(xin_ref, cy_ref, wb64_ref, wb32_ref, head_ref, out_ref):
    f32 = jnp.float32

    def dot(a, b):
        return jnp.dot(a, b, preferred_element_type=f32)

    def dot_bt(a, b):  # a @ b.T on the MXU, no explicit transpose op
        return jax.lax.dot_general(a, b, (((1,), (1,)), ((), ())),
                                   preferred_element_type=f32)

    # ---- unpack weights (static, sublane-aligned row slices of the slabs) ---
    b0w1 = wb64_ref[_W64_B0W1:_W64_B0W1 + D_MAIN, :]
    b1w1 = wb64_ref[_W64_B1W1:_W64_B1W1 + D_MAIN, :]
    wt1 = wb64_ref[_W64_WT1:_W64_WT1 + D_MAIN, :]
    p1w1 = wb64_ref[_W64_P1W1:_W64_P1W1 + D_MAIN, :]
    bias64 = wb64_ref[_W64_BIAS:_W64_BIAS + 8, :]
    r64 = lambda i: bias64[i:i + 1, :]
    b0b1, b1b1, bt1, p1b1 = r64(0), r64(1), r64(2), r64(3)

    wlin = wb32_ref[_W32_WLIN:_W32_WLIN + N_NUM_FEATURES, :]
    b0w2 = wb32_ref[_W32_B0W2:_W32_B0W2 + D_BLOCK, :]
    b1w2 = wb32_ref[_W32_B1W2:_W32_B1W2 + D_BLOCK, :]
    wk = wb32_ref[_W32_WK:_W32_WK + D_MAIN, :]
    wt2 = wb32_ref[_W32_WT2:_W32_WT2 + D_BLOCK, :]
    p1w2 = wb32_ref[_W32_P1W2:_W32_P1W2 + D_BLOCK, :]
    bias32 = wb32_ref[_W32_BIAS:_W32_BIAS + 16, :]
    r32 = lambda i: bias32[i:i + 1, :]
    (blin, b0b2, b1g, b1b, b1b2, mng, mnb, bk,
     wle, ble, p1g, p1b, p1b2, hg, hb) = [r32(i) for i in range(15)]

    wh = head_ref[0:D_MAIN, :]               # (D_MAIN, 128), zero beyond col 2
    bh = head_ref[D_MAIN:D_MAIN + 1, :]      # (1, 128)

    # -------------- fused encoder over [queries ; candidates] ----------------
    x = dot(xin_ref[...], wlin) + blin
    # block0 (no prenorm): x + Linear(ReLU(Linear(x)))
    h = jnp.maximum(dot(x, b0w1) + b0b1, 0.0)
    x = x + dot(h, b0w2) + b0b2
    # block1 (prenorm)
    z = _layernorm(x, b1g, b1b)
    h = jnp.maximum(dot(z, b1w1) + b1b1, 0.0)
    x = x + dot(h, b1w2) + b1b2
    # mixer normalization + K, for all rows at once
    k_all = dot(_layernorm(x, mng, mnb), wk) + bk          # (B+C, D)

    xq = x[0:BATCH, :]                                     # (B, D)
    k = k_all[0:BATCH, :]                                  # (B, D)
    cand_k = k_all[BATCH:BATCH + N_CANDIDATES, :]          # (C, D)
    cy = cy_ref[...]                                       # (1, C)

    # ------------------- similarities on the MXU -----------------------------
    # sim = 2*k.ck - ||ck||^2   (per-row -||k||^2 dropped: it changes neither
    # the per-row top-k ordering nor the shift-invariant softmax)
    kct = dot_bt(k, cand_k)                                              # (B, C)
    cnorm2 = dot_bt(jnp.ones((BATCH, D_MAIN), f32), cand_k * cand_k)     # (B, C)
    sim = 2.0 * kct - cnorm2

    # -------------- exact top-CONTEXT_SIZE mask, rank-based ------------------
    # rank[b,c] = #{c' : sim[b,c'] > sim[b,c]  or  (== and c' < c)}
    colf = jax.lax.broadcasted_iota(jnp.int32, (BATCH, N_CANDIDATES), 1).astype(f32)
    s_me, s_ot = sim[:, :, None], sim[:, None, :]
    c_me, c_ot = colf[:, :, None], colf[:, None, :]
    beats = jnp.logical_or(s_ot > s_me,
                           jnp.logical_and(s_ot == s_me, c_ot < c_me))   # (B,C,C)
    rank = jnp.sum(beats.astype(f32), axis=-1)                           # (B, C)
    keep = rank < f32(CONTEXT_SIZE)

    # masked softmax over the selected context, normalization deferred
    mmax = jnp.max(jnp.where(keep, sim, f32(NEG)), axis=-1, keepdims=True)
    e = jnp.where(keep, jnp.exp(sim - mmax), 0.0)                        # (B, C)
    inv = pl.reciprocal(jnp.sum(e, axis=-1, keepdims=True), approx=True)  # (B, 1)

    # -------------------------------- mixer ----------------------------------
    # label encoder: sum_c p_bc * (y_c*wle + ble) = (sum p*y)*wle + ble
    y_mix = jnp.sum(e * cy, axis=-1, keepdims=True)                      # (B, 1)

    # T(k - ck) via linearity of its first Linear; one projection matmul for
    # queries and candidates together.
    proj_all = dot(k_all, wt1)                                           # (B+C, d_block)
    kproj = proj_all[0:BATCH, :]
    cproj = proj_all[BATCH:BATCH + N_CANDIDATES, :]
    h3 = jnp.maximum(kproj[:, None, :] - cproj[None, :, :] + bt1, 0.0)   # (B,C,d_block)
    # NOTE: kept as the proven sublane reduction; einsum('bc,bcd->bd') is the
    # MXU alternative to gate on a bundle dump.
    ph = jnp.sum(e[:, :, None] * h3, axis=1)                             # (B, d_block)

    x = xq + (y_mix * wle + dot(ph, wt2)) * inv + ble

    # ---------------------------- predictor block ----------------------------
    z = _layernorm(x, p1g, p1b)
    h = jnp.maximum(dot(z, p1w1) + p1b1, 0.0)
    x = x + dot(h, p1w2) + p1b2

    # -------------------- head: LN -> ReLU -> Linear(d, 2) -------------------
    z = jnp.maximum(_layernorm(x, hg, hb), 0.0)
    out_ref[...] = dot(z, wh) + bh          # lane-dense (B, 128); cols 2: are 0


# --------------------------------- forward -----------------------------------
def tabr_forward(slabs, x_num, cand_num, cand_y):
    wb64, wb32, head = slabs
    xin = jnp.concatenate([x_num, cand_num], axis=0)      # (B+C, d_in)
    cy_row = cand_y.reshape(1, -1)
    b = x_num.shape[0]
    vmem = pltpu.MemorySpace.VMEM
    out_full = pl.pallas_call(
        _tabr_fused_kernel,
        out_shape=jax.ShapeDtypeStruct((b, HEAD_PAD), jnp.float32),
        in_specs=[pl.BlockSpec(memory_space=vmem) for _ in range(5)],
        out_specs=pl.BlockSpec(memory_space=vmem),
    )(xin, cy_row, wb64, wb32, head)
    return out_full[:, :2]


tabr_forward = jax.jit(tabr_forward)


# ---------------------------- parameter creation -----------------------------
def init_params(key):
    ks = jax.random.split(key, 16)

    def lin(kk, din, dout, bias=True):
        kw, kb = jax.random.split(kk)
        bound = 1.0 / math.sqrt(din)
        w = jax.random.uniform(kw, (din, dout), jnp.float32, -bound, bound)
        if not bias:
            return (w,)
        b = jax.random.uniform(kb, (1, dout), jnp.float32, -bound, bound)
        return w, b

    ones = lambda: jnp.ones((1, D_MAIN), jnp.float32)
    zeros = lambda: jnp.zeros((1, D_MAIN), jnp.float32)

    wlin, blin = lin(ks[0], N_NUM_FEATURES, D_MAIN)
    b0w1, b0b1 = lin(ks[1], D_MAIN, D_BLOCK)
    b0w2, b0b2 = lin(ks[2], D_BLOCK, D_MAIN)
    b1g, b1b = ones(), zeros()
    b1w1, b1b1 = lin(ks[3], D_MAIN, D_BLOCK)
    b1w2, b1b2 = lin(ks[4], D_BLOCK, D_MAIN)
    mng, mnb = ones(), zeros()
    wk, bk = lin(ks[5], D_MAIN, D_MAIN)
    enc_p = [wlin, blin, b0w1, b0b1, b0w2, b0b2, b1g, b1b,
             b1w1, b1b1, b1w2, b1b2, mng, mnb, wk, bk]

    # label_encoder = Linear(1, d_main) with uniform(-1/sqrt(2), 1/sqrt(2)) init
    le_bound = 1.0 / math.sqrt(2.0)
    wle = jax.random.uniform(ks[6], (1, D_MAIN), jnp.float32, -le_bound, le_bound)
    ble = jax.random.uniform(ks[7], (1, D_MAIN), jnp.float32, -le_bound, le_bound)
    wt1, bt1 = lin(ks[8], D_MAIN, D_BLOCK)
    (wt2,) = lin(ks[9], D_BLOCK, D_MAIN, bias=False)
    p1g, p1b = ones(), zeros()
    p1w1, p1b1 = lin(ks[10], D_MAIN, D_BLOCK)
    p1w2, p1b2 = lin(ks[11], D_BLOCK, D_MAIN)
    hg, hb = ones(), zeros()
    wh, bh = lin(ks[12], D_MAIN, 2)
    mix_p = [wle, ble, wt1, bt1, wt2, p1g, p1b, p1w1, p1b1, p1w2, p1b2, hg, hb, wh, bh]
    return enc_p, mix_p


def pack_params(enc_p, mix_p):
    """Pack the 31 small params into 3 VMEM-friendly slabs (order = offsets)."""
    (wlin, blin, b0w1, b0b1, b0w2, b0b2, b1g, b1b,
     b1w1, b1b1, b1w2, b1b2, mng, mnb, wk, bk) = enc_p
    (wle, ble, wt1, bt1, wt2, p1g, p1b, p1w1, p1b1, p1w2, p1b2, hg, hb, wh, bh) = mix_p

    wb64 = jnp.concatenate(
        [b0w1, b1w1, wt1, p1w1,                                  # 128 rows
         b0b1, b1b1, bt1, p1b1,                                  # 4 bias rows
         jnp.zeros((_W64_ROWS - _W64_BIAS - 4, D_BLOCK), jnp.float32)], axis=0)
    wb32 = jnp.concatenate(
        [wlin, b0w2, b1w2, wk, wt2, p1w2,                        # 304 rows
         blin, b0b2, b1g, b1b, b1b2, mng, mnb, bk,
         wle, ble, p1g, p1b, p1b2, hg, hb,                       # 15 bias/LN rows
         jnp.zeros((_W32_ROWS - _W32_BIAS - 15, D_MAIN), jnp.float32)], axis=0)
    head = jnp.zeros((_HEAD_ROWS, HEAD_PAD), jnp.float32)
    head = head.at[0:D_MAIN, 0:2].set(wh)
    head = head.at[D_MAIN:D_MAIN + 1, 0:2].set(bh)
    return wb64, wb32, head


# ------------------------- pure-JAX reference (check) ------------------------
# TODO(synk): faiss.IndexFlatL2 has no Pallas equivalent; brute-force L2 + top_k
# (reference) / in-kernel rank-based mask (kernel) reproduce the eval-path
# search; tie-breaking on exactly-equal distances may differ from faiss.
def l2_search(k, cand_k, context_size):
    d2 = jnp.sum((k[:, None, :] - cand_k[None, :, :]) ** 2, axis=-1)
    _, idx = jax.lax.top_k(-d2, context_size)          # ascending L2 distance
    return idx


def reference_forward(params, x_num, cand_num, cand_y):
    enc_p, mix_p = params
    (wlin, blin, b0w1, b0b1, b0w2, b0b2, b1g, b1b,
     b1w1, b1b1, b1w2, b1b2, mng, mnb, wk, bk) = enc_p
    (wle, ble, wt1, bt1, wt2, p1g, p1b, p1w1, p1b1, p1w2, p1b2, hg, hb, wh, bh) = mix_p
    hi = jax.lax.Precision.HIGHEST

    def ref_encode(xin):
        x = jnp.dot(xin, wlin, precision=hi) + blin
        h = jnp.maximum(jnp.dot(x, b0w1, precision=hi) + b0b1, 0.0)
        x = x + jnp.dot(h, b0w2, precision=hi) + b0b2
        z = _layernorm(x, b1g, b1b)
        h = jnp.maximum(jnp.dot(z, b1w1, precision=hi) + b1b1, 0.0)
        x = x + jnp.dot(h, b1w2, precision=hi) + b1b2
        k = jnp.dot(_layernorm(x, mng, mnb), wk, precision=hi) + bk
        return x, k

    _, cand_k = ref_encode(cand_num)
    x, k = ref_encode(x_num)
    idx = l2_search(k, cand_k, CONTEXT_SIZE)
    ck = cand_k[idx]
    cy = cand_y[idx]

    sim = -jnp.sum((k[:, None, :] - ck) ** 2, axis=-1)
    probs = jax.nn.softmax(sim, axis=-1)
    y_emb = cy[:, :, None] * wle[None, :, :] + ble[None, :, :]
    diff = k[:, None, :] - ck
    h = jnp.maximum(jnp.einsum('bcd,de->bce', diff, wt1, precision=hi) + bt1, 0.0)
    values = y_emb + jnp.einsum('bce,ed->bcd', h, wt2, precision=hi)
    x = x + jnp.sum(probs[:, :, None] * values, axis=1)
    z = _layernorm(x, p1g, p1b)
    h = jnp.maximum(jnp.dot(z, p1w1, precision=hi) + p1b1, 0.0)
    x = x + jnp.dot(h, p1w2, precision=hi) + p1b2
    z = jnp.maximum(_layernorm(x, hg, hb), 0.0)
    return jnp.dot(z, wh, precision=hi) + bh


# ------------------------------------ main -----------------------------------
if __name__ == "__main__":
    key = jax.random.PRNGKey(0)
    kp, kx, kc, ky = jax.random.split(key, 4)
    params = init_params(kp)
    slabs = pack_params(*params)

    x_num = jax.random.normal(kx, (BATCH, N_NUM_FEATURES), jnp.float32)
    cand_num = jax.random.normal(kc, (N_CANDIDATES, N_NUM_FEATURES), jnp.float32)
    cand_y = jax.random.normal(ky, (N_CANDIDATES,), jnp.float32)

    out = tabr_forward(slabs, x_num, cand_num, cand_y)
    out = jax.block_until_ready(out)

    assert out.shape == (BATCH, 2), out.shape
    assert bool(jnp.all(jnp.isfinite(out)))
    ref = reference_forward(params, x_num, cand_num, cand_y)
    assert bool(jnp.allclose(out, ref, atol=1e-2, rtol=1e-2)), (out, ref)

    print("KERNEL_OK")
</pallas_src>

<mosaic_0001>
module attributes {stable_mosaic.version = 11 : i64} {
  func.func @_tabr_fused_kernel(%arg0: memref<40x16xf32, #tpu.memory_space<vmem>>, %arg1: memref<1x32xf32, #tpu.memory_space<vmem>>, %arg2: memref<136x64xf32, #tpu.memory_space<vmem>>, %arg3: memref<320x32xf32, #tpu.memory_space<vmem>>, %arg4: memref<40x128xf32, #tpu.memory_space<vmem>>, %arg5: memref<8x128xf32, #tpu.memory_space<vmem>>) attributes {dimension_semantics = [], scalar_prefetch = 0 : i64, scratch_operands = 0 : i64, tpu.core_type = #tpu.core_type<tc>} {
    %c0 = arith.constant 0 : index
    %c0_0 = arith.constant 0 : index
    %0 = vector.load %arg2[%c0, %c0_0] : memref<136x64xf32, #tpu.memory_space<vmem>>, vector<32x64xf32>
    %c32 = arith.constant 32 : index
    %c0_1 = arith.constant 0 : index
    %1 = vector.load %arg2[%c32, %c0_1] : memref<136x64xf32, #tpu.memory_space<vmem>>, vector<32x64xf32>
    %c64 = arith.constant 64 : index
    %c0_2 = arith.constant 0 : index
    %2 = vector.load %arg2[%c64, %c0_2] : memref<136x64xf32, #tpu.memory_space<vmem>>, vector<32x64xf32>
    %c96 = arith.constant 96 : index
    %c0_3 = arith.constant 0 : index
    %3 = vector.load %arg2[%c96, %c0_3] : memref<136x64xf32, #tpu.memory_space<vmem>>, vector<32x64xf32>
    %c128 = arith.constant 128 : index
    %c0_4 = arith.constant 0 : index
    %4 = vector.load %arg2[%c128, %c0_4] : memref<136x64xf32, #tpu.memory_space<vmem>>, vector<8x64xf32>
    %5 = vector.extract_strided_slice %4 {offsets = [0, 0], sizes = [1, 64], strides = [1, 1]} : vector<8x64xf32> to vector<1x64xf32>
    %6 = vector.extract_strided_slice %4 {offsets = [1, 0], sizes = [1, 64], strides = [1, 1]} : vector<8x64xf32> to vector<1x64xf32>
    %7 = vector.extract_strided_slice %4 {offsets = [2, 0], sizes = [1, 64], strides = [1, 1]} : vector<8x64xf32> to vector<1x64xf32>
    %8 = vector.extract_strided_slice %4 {offsets = [3, 0], sizes = [1, 64], strides = [1, 1]} : vector<8x64xf32> to vector<1x64xf32>
    %c0_5 = arith.constant 0 : index
    %c0_6 = arith.constant 0 : index
    %9 = vector.load %arg3[%c0_5, %c0_6] : memref<320x32xf32, #tpu.memory_space<vmem>>, vector<16x32xf32>
    %c16 = arith.constant 16 : index
    %c0_7 = arith.constant 0 : index
    %10 = vector.load %arg3[%c16, %c0_7] : memref<320x32xf32, #tpu.memory_space<vmem>>, vector<64x32xf32>
    %c80 = arith.constant 80 : index
    %c0_8 = arith.constant 0 : index
    %11 = vector.load %arg3[%c80, %c0_8] : memref<320x32xf32, #tpu.memory_space<vmem>>, vector<64x32xf32>
    %c144 = arith.constant 144 : index
    %c0_9 = arith.constant 0 : index
    %12 = vector.load %arg3[%c144, %c0_9] : memref<320x32xf32, #tpu.memory_space<vmem>>, vector<32x32xf32>
    %c176 = arith.constant 176 : index
    %c0_10 = arith.constant 0 : index
    %13 = vector.load %arg3[%c176, %c0_10] : memref<320x32xf32, #tpu.memory_space<vmem>>, vector<64x32xf32>
    %c240 = arith.constant 240 : index
    %c0_11 = arith.constant 0 : index
    %14 = vector.load %arg3[%c240, %c0_11] : memref<320x32xf32, #tpu.memory_space<vmem>>, vector<64x32xf32>
    %c304 = arith.constant 304 : index
    %c0_12 = arith.constant 0 : index
    %15 = vector.load %arg3[%c304, %c0_12] : memref<320x32xf32, #tpu.memory_space<vmem>>, vector<16x32xf32>
    %16 = vector.extract_strided_slice %15 {offsets = [0, 0], sizes = [1, 32], strides = [1, 1]} : vector<16x32xf32> to vector<1x32xf32>
    %17 = vector.extract_strided_slice %15 {offsets = [1, 0], sizes = [1, 32], strides = [1, 1]} : vector<16x32xf32> to vector<1x32xf32>
    %18 = vector.extract_strided_slice %15 {offsets = [2, 0], sizes = [1, 32], strides = [1, 1]} : vector<16x32xf32> to vector<1x32xf32>
    %19 = vector.extract_strided_slice %15 {offsets = [3, 0], sizes = [1, 32], strides = [1, 1]} : vector<16x32xf32> to vector<1x32xf32>
    %20 = vector.extract_strided_slice %15 {offsets = [4, 0], sizes = [1, 32], strides = [1, 1]} : vector<16x32xf32> to vector<1x32xf32>
    %21 = vector.extract_strided_slice %15 {offsets = [5, 0], sizes = [1, 32], strides = [1, 1]} : vector<16x32xf32> to vector<1x32xf32>
    %22 = vector.extract_strided_slice %15 {offsets = [6, 0], sizes = [1, 32], strides = [1, 1]} : vector<16x32xf32> to vector<1x32xf32>
    %23 = vector.extract_strided_slice %15 {offsets = [7, 0], sizes = [1, 32], strides = [1, 1]} : vector<16x32xf32> to vector<1x32xf32>
    %24 = vector.extract_strided_slice %15 {offsets = [8, 0], sizes = [1, 32], strides = [1, 1]} : vector<16x32xf32> to vector<1x32xf32>
    %25 = vector.extract_strided_slice %15 {offsets = [9, 0], sizes = [1, 32], strides = [1, 1]} : vector<16x32xf32> to vector<1x32xf32>
    %26 = vector.extract_strided_slice %15 {offsets = [10, 0], sizes = [1, 32], strides = [1, 1]} : vector<16x32xf32> to vector<1x32xf32>
    %27 = vector.extract_strided_slice %15 {offsets = [11, 0], sizes = [1, 32], strides = [1, 1]} : vector<16x32xf32> to vector<1x32xf32>
    %28 = vector.extract_strided_slice %15 {offsets = [12, 0], sizes = [1, 32], strides = [1, 1]} : vector<16x32xf32> to vector<1x32xf32>
    %29 = vector.extract_strided_slice %15 {offsets = [13, 0], sizes = [1, 32], strides = [1, 1]} : vector<16x32xf32> to vector<1x32xf32>
    %30 = vector.extract_strided_slice %15 {offsets = [14, 0], sizes = [1, 32], strides = [1, 1]} : vector<16x32xf32> to vector<1x32xf32>
    %c0_13 = arith.constant 0 : index
    %c0_14 = arith.constant 0 : index
    %31 = vector.load %arg4[%c0_13, %c0_14] : memref<40x128xf32, #tpu.memory_space<vmem>>, vector<32x128xf32>
    %c32_15 = arith.constant 32 : index
    %c0_16 = arith.constant 0 : index
    %32 = vector.load %arg4[%c32_15, %c0_16] : memref<40x128xf32, #tpu.memory_space<vmem>>, vector<1x128xf32>
    %c0_17 = arith.constant 0 : index
    %c0_18 = arith.constant 0 : index
    %33 = vector.load %arg0[%c0_17, %c0_18] : memref<40x16xf32, #tpu.memory_space<vmem>>, vector<40x16xf32>
    %cst = arith.constant dense<0.000000e+00> : vector<40x32xf32>
    %34 = tpu.matmul %33, %9, %cst {dimension_numbers = #tpu.dot_dimension_numbers<[1], [0], [0], [1], [0, 0, 1, 1], [], []>} : vector<40x16xf32>, vector<16x32xf32>, vector<40x32xf32> -> vector<40x32xf32>
    %35 = vector.broadcast %16 : vector<1x32xf32> to vector<40x32xf32>
    %36 = arith.addf %34, %35 : vector<40x32xf32>
    %cst_19 = arith.constant dense<0.000000e+00> : vector<40x64xf32>
    %37 = tpu.matmul %36, %0, %cst_19 {dimension_numbers = #tpu.dot_dimension_numbers<[1], [0], [0], [1], [0, 0, 1, 1], [], []>} : vector<40x32xf32>, vector<32x64xf32>, vector<40x64xf32> -> vector<40x64xf32>
    %38 = vector.broadcast %5 : vector<1x64xf32> to vector<40x64xf32>
    %39 = arith.addf %37, %38 : vector<40x64xf32>
    %cst_20 = arith.constant 0.000000e+00 : f32
    %40 = vector.broadcast %cst_20 : f32 to vector<40x64xf32>
    %41 = arith.maximumf %39, %40 : vector<40x64xf32>
    %cst_21 = arith.constant dense<0.000000e+00> : vector<40x32xf32>
    %42 = tpu.matmul %41, %10, %cst_21 {dimension_numbers = #tpu.dot_dimension_numbers<[1], [0], [0], [1], [0, 0, 1, 1], [], []>} : vector<40x64xf32>, vector<64x32xf32>, vector<40x32xf32> -> vector<40x32xf32>
    %43 = arith.addf %36, %42 : vector<40x32xf32>
    %44 = vector.broadcast %17 : vector<1x32xf32> to vector<40x32xf32>
    %45 = arith.addf %43, %44 : vector<40x32xf32>
    %cst_22 = arith.constant dense<0.000000e+00> : vector<40xf32>
    %46 = vector.multi_reduction <add>, %45, %cst_22 [1] : vector<40x32xf32> to vector<40xf32>
    %47 = vector.shape_cast %46 : vector<40xf32> to vector<40x1xf32>
    %cst_23 = arith.constant 3.200000e+01 : f32
    %48 = vector.broadcast %cst_23 : f32 to vector<40x1xf32>
    %49 = arith.divf %47, %48 : vector<40x1xf32>
    %50 = vector.broadcast %49 : vector<40x1xf32> to vector<40x32xf32>
    %51 = arith.subf %45, %50 : vector<40x32xf32>
    %52 = arith.mulf %51, %51 : vector<40x32xf32>
    %cst_24 = arith.constant dense<0.000000e+00> : vector<40xf32>
    %53 = vector.multi_reduction <add>, %52, %cst_24 [1] : vector<40x32xf32> to vector<40xf32>
    %54 = vector.shape_cast %53 : vector<40xf32> to vector<40x1xf32>
    %cst_25 = arith.constant 3.200000e+01 : f32
    %55 = vector.broadcast %cst_25 : f32 to vector<40x1xf32>
    %56 = arith.divf %54, %55 : vector<40x1xf32>
    %57 = vector.broadcast %49 : vector<40x1xf32> to vector<40x32xf32>
    %58 = arith.subf %45, %57 : vector<40x32xf32>
    %cst_26 = arith.constant 9.99999974E-6 : f32
    %59 = vector.broadcast %cst_26 : f32 to vector<40x1xf32>
    %60 = arith.addf %56, %59 : vector<40x1xf32>
    %61 = math.rsqrt %60 : vector<40x1xf32>
    %62 = vector.broadcast %61 : vector<40x1xf32> to vector<40x32xf32>
    %63 = arith.mulf %58, %62 : vector<40x32xf32>
    %64 = vector.broadcast %18 : vector<1x32xf32> to vector<40x32xf32>
    %65 = arith.mulf %63, %64 : vector<40x32xf32>
    %66 = vector.broadcast %19 : vector<1x32xf32> to vector<40x32xf32>
    %67 = arith.addf %65, %66 : vector<40x32xf32>
    %cst_27 = arith.constant dense<0.000000e+00> : vector<40x64xf32>
    %68 = tpu.matmul %67, %1, %cst_27 {dimension_numbers = #tpu.dot_dimension_numbers<[1], [0], [0], [1], [0, 0, 1, 1], [], []>} : vector<40x32xf32>, vector<32x64xf32>, vector<40x64xf32> -> vector<40x64xf32>
    %69 = vector.broadcast %6 : vector<1x64xf32> to vector<40x64xf32>
    %70 = arith.addf %68, %69 : vector<40x64xf32>
    %cst_28 = arith.constant 0.000000e+00 : f32
    %71 = vector.broadcast %cst_28 : f32 to vector<40x64xf32>
    %72 = arith.maximumf %70, %71 : vector<40x64xf32>
    %cst_29 = arith.constant dense<0.000000e+00> : vector<40x32xf32>
    %73 = tpu.matmul %72, %11, %cst_29 {dimension_numbers = #tpu.dot_dimension_numbers<[1], [0], [0], [1], [0, 0, 1, 1], [], []>} : vector<40x64xf32>, vector<64x32xf32>, vector<40x32xf32> -> vector<40x32xf32>
    %74 = arith.addf %45, %73 : vector<40x32xf32>
    %75 = vector.broadcast %20 : vector<1x32xf32> to vector<40x32xf32>
    %76 = arith.addf %74, %75 : vector<40x32xf32>
    %cst_30 = arith.constant dense<0.000000e+00> : vector<40xf32>
    %77 = vector.multi_reduction <add>, %76, %cst_30 [1] : vector<40x32xf32> to vector<40xf32>
    %78 = vector.shape_cast %77 : vector<40xf32> to vector<40x1xf32>
    %cst_31 = arith.constant 3.200000e+01 : f32
    %79 = vector.broadcast %cst_31 : f32 to vector<40x1xf32>
    %80 = arith.divf %78, %79 : vector<40x1xf32>
    %81 = vector.broadcast %80 : vector<40x1xf32> to vector<40x32xf32>
    %82 = arith.subf %76, %81 : vector<40x32xf32>
    %83 = arith.mulf %82, %82 : vector<40x32xf32>
    %cst_32 = arith.constant dense<0.000000e+00> : vector<40xf32>
    %84 = vector.multi_reduction <add>, %83, %cst_32 [1] : vector<40x32xf32> to vector<40xf32>
    %85 = vector.shape_cast %84 : vector<40xf32> to vector<40x1xf32>
    %cst_33 = arith.constant 3.200000e+01 : f32
    %86 = vector.broadcast %cst_33 : f32 to vector<40x1xf32>
    %87 = arith.divf %85, %86 : vector<40x1xf32>
    %88 = vector.broadcast %80 : vector<40x1xf32> to vector<40x32xf32>
    %89 = arith.subf %76, %88 : vector<40x32xf32>
    %cst_34 = arith.constant 9.99999974E-6 : f32
    %90 = vector.broadcast %cst_34 : f32 to vector<40x1xf32>
    %91 = arith.addf %87, %90 : vector<40x1xf32>
    %92 = math.rsqrt %91 : vector<40x1xf32>
    %93 = vector.broadcast %92 : vector<40x1xf32> to vector<40x32xf32>
    %94 = arith.mulf %89, %93 : vector<40x32xf32>
    %95 = vector.broadcast %21 : vector<1x32xf32> to vector<40x32xf32>
    %96 = arith.mulf %94, %95 : vector<40x32xf32>
    %97 = vector.broadcast %22 : vector<1x32xf32> to vector<40x32xf32>
    %98 = arith.addf %96, %97 : vector<40x32xf32>
    %cst_35 = arith.constant dense<0.000000e+00> : vector<40x32xf32>
    %99 = tpu.matmul %98, %12, %cst_35 {dimension_numbers = #tpu.dot_dimension_numbers<[1], [0], [0], [1], [0, 0, 1, 1], [], []>} : vector<40x32xf32>, vector<32x32xf32>, vector<40x32xf32> -> vector<40x32xf32>
    %100 = vector.broadcast %23 : vector<1x32xf32> to vector<40x32xf32>
    %101 = arith.addf %99, %100 : vector<40x32xf32>
    %102 = vector.extract_strided_slice %76 {offsets = [0, 0], sizes = [8, 32], strides = [1, 1]} : vector<40x32xf32> to vector<8x32xf32>
    %103 = vector.extract_strided_slice %101 {offsets = [0, 0], sizes = [8, 32], strides = [1, 1]} : vector<40x32xf32> to vector<8x32xf32>
    %104 = vector.extract_strided_slice %101 {offsets = [8, 0], sizes = [32, 32], strides = [1, 1]} : vector<40x32xf32> to vector<32x32xf32>
    %c0_36 = arith.constant 0 : index
    %c0_37 = arith.constant 0 : index
    %105 = vector.load %arg1[%c0_36, %c0_37] : memref<1x32xf32, #tpu.memory_space<vmem>>, vector<1x32xf32>
    %cst_38 = arith.constant dense<0.000000e+00> : vector<8x32xf32>
    %106 = tpu.matmul %103, %104, %cst_38 {dimension_numbers = #tpu.dot_dimension_numbers<[1], [1], [0], [0], [0, 0, 1, 0], [], []>} : vector<8x32xf32>, vector<32x32xf32>, vector<8x32xf32> -> vector<8x32xf32>
    %cst_39 = arith.constant 1.000000e+00 : f32
    %107 = vector.broadcast %cst_39 : f32 to vector<8x32xf32>
    %108 = arith.mulf %104, %104 : vector<32x32xf32>
    %cst_40 = arith.constant dense<0.000000e+00> : vector<8x32xf32>
    %109 = tpu.matmul %107, %108, %cst_40 {dimension_numbers = #tpu.dot_dimension_numbers<[1], [1], [0], [0], [0, 0, 1, 0], [], []>} : vector<8x32xf32>, vector<32x32xf32>, vector<8x32xf32> -> vector<8x32xf32>
    %cst_41 = arith.constant 2.000000e+00 : f32
    %110 = vector.broadcast %cst_41 : f32 to vector<8x32xf32>
    %111 = arith.mulf %110, %106 : vector<8x32xf32>
    %112 = arith.subf %111, %109 : vector<8x32xf32>
    %113 = tpu.iota {dimensions = array<i32: 1>} : vector<8x32xi32>
    %114 = arith.sitofp %113 : vector<8x32xi32> to vector<8x32xf32>
    %115 = vector.shape_cast %112 : vector<8x32xf32> to vector<8x32x1xf32>
    %116 = vector.shape_cast %112 : vector<8x32xf32> to vector<8x1x32xf32>
    %117 = vector.shape_cast %114 : vector<8x32xf32> to vector<8x32x1xf32>
    %118 = vector.shape_cast %114 : vector<8x32xf32> to vector<8x1x32xf32>
    %119 = vector.broadcast %116 : vector<8x1x32xf32> to vector<8x32x32xf32>
    %120 = vector.broadcast %115 : vector<8x32x1xf32> to vector<8x32x32xf32>
    %121 = arith.cmpf ogt, %119, %120 : vector<8x32x32xf32>
    %122 = vector.broadcast %116 : vector<8x1x32xf32> to vector<8x32x32xf32>
    %123 = vector.broadcast %115 : vector<8x32x1xf32> to vector<8x32x32xf32>
    %124 = arith.cmpf oeq, %122, %123 : vector<8x32x32xf32>
    %125 = vector.broadcast %118 : vector<8x1x32xf32> to vector<8x32x32xf32>
    %126 = vector.broadcast %117 : vector<8x32x1xf32> to vector<8x32x32xf32>
    %127 = arith.cmpf olt, %125, %126 : vector<8x32x32xf32>
    %128 = arith.andi %124, %127 : vector<8x32x32xi1>
    %129 = arith.ori %121, %128 : vector<8x32x32xi1>
    %130 = arith.extui %129 : vector<8x32x32xi1> to vector<8x32x32xi32>
    %131 = arith.sitofp %130 : vector<8x32x32xi32> to vector<8x32x32xf32>
    %cst_42 = arith.constant dense<0.000000e+00> : vector<8x32xf32>
    %132 = vector.multi_reduction <add>, %131, %cst_42 [2] : vector<8x32x32xf32> to vector<8x32xf32>
    %cst_43 = arith.constant 8.000000e+00 : f32
    %133 = vector.broadcast %cst_43 : f32 to vector<8x32xf32>
    %134 = arith.cmpf olt, %132, %133 : vector<8x32xf32>
    %cst_44 = arith.constant -1.000000e+30 : f32
    %135 = vector.broadcast %cst_44 : f32 to vector<8x32xf32>
    %136 = arith.select %134, %112, %135 : vector<8x32xi1>, vector<8x32xf32>
    %cst_45 = arith.constant dense<0xFF800000> : vector<8xf32>
    %137 = vector.multi_reduction <maximumf>, %136, %cst_45 [1] : vector<8x32xf32> to vector<8xf32>
    %138 = vector.shape_cast %137 : vector<8xf32> to vector<8x1xf32>
    %139 = vector.broadcast %138 : vector<8x1xf32> to vector<8x32xf32>
    %140 = arith.subf %112, %139 : vector<8x32xf32>
    %141 = math.exp %140 : vector<8x32xf32>
    %cst_46 = arith.constant 0.000000e+00 : f32
    %142 = vector.broadcast %cst_46 : f32 to vector<8x32xf32>
    %143 = arith.select %134, %141, %142 : vector<8x32xi1>, vector<8x32xf32>
    %cst_47 = arith.constant dense<0.000000e+00> : vector<8xf32>
    %144 = vector.multi_reduction <add>, %143, %cst_47 [1] : vector<8x32xf32> to vector<8xf32>
    %145 = vector.shape_cast %144 : vector<8xf32> to vector<8x1xf32>
    %146 = tpu.reciprocal %145 {approx = true} : vector<8x1xf32> -> vector<8x1xf32>
    %147 = vector.broadcast %105 : vector<1x32xf32> to vector<8x32xf32>
    %148 = arith.mulf %143, %147 : vector<8x32xf32>
    %cst_48 = arith.constant dense<0.000000e+00> : vector<8xf32>
    %149 = vector.multi_reduction <add>, %148, %cst_48 [1] : vector<8x32xf32> to vector<8xf32>
    %150 = vector.shape_cast %149 : vector<8xf32> to vector<8x1xf32>
    %cst_49 = arith.constant dense<0.000000e+00> : vector<40x64xf32>
    %151 = tpu.matmul %101, %2, %cst_49 {dimension_numbers = #tpu.dot_dimension_numbers<[1], [0], [0], [1], [0, 0, 1, 1], [], []>} : vector<40x32xf32>, vector<32x64xf32>, vector<40x64xf32> -> vector<40x64xf32>
    %152 = vector.extract_strided_slice %151 {offsets = [0, 0], sizes = [8, 64], strides = [1, 1]} : vector<40x64xf32> to vector<8x64xf32>
    %153 = vector.extract_strided_slice %151 {offsets = [8, 0], sizes = [32, 64], strides = [1, 1]} : vector<40x64xf32> to vector<32x64xf32>
    %154 = vector.shape_cast %152 : vector<8x64xf32> to vector<8x1x64xf32>
    %155 = vector.shape_cast %153 : vector<32x64xf32> to vector<1x32x64xf32>
    %156 = vector.broadcast %154 : vector<8x1x64xf32> to vector<8x32x64xf32>
    %157 = vector.broadcast %155 : vector<1x32x64xf32> to vector<8x32x64xf32>
    %158 = arith.subf %156, %157 : vector<8x32x64xf32>
    %159 = vector.shape_cast %7 : vector<1x64xf32> to vector<1x1x64xf32>
    %160 = vector.broadcast %159 : vector<1x1x64xf32> to vector<8x32x64xf32>
    %161 = arith.addf %158, %160 : vector<8x32x64xf32>
    %cst_50 = arith.constant 0.000000e+00 : f32
    %162 = vector.broadcast %cst_50 : f32 to vector<8x32x64xf32>
    %163 = arith.maximumf %161, %162 : vector<8x32x64xf32>
    %164 = vector.shape_cast %143 : vector<8x32xf32> to vector<8x32x1xf32>
    %165 = vector.broadcast %164 : vector<8x32x1xf32> to vector<8x32x64xf32>
    %166 = arith.mulf %165, %163 : vector<8x32x64xf32>
    %cst_51 = arith.constant dense<0.000000e+00> : vector<8x64xf32>
    %167 = vector.multi_reduction <add>, %166, %cst_51 [1] : vector<8x32x64xf32> to vector<8x64xf32>
    %168 = vector.broadcast %150 : vector<8x1xf32> to vector<8x32xf32>
    %169 = vector.broadcast %24 : vector<1x32xf32> to vector<8x32xf32>
    %170 = arith.mulf %168, %169 : vector<8x32xf32>
    %cst_52 = arith.constant dense<0.000000e+00> : vector<8x32xf32>
    %171 = tpu.matmul %167, %13, %cst_52 {dimension_numbers = #tpu.dot_dimension_numbers<[1], [0], [0], [1], [0, 0, 1, 1], [], []>} : vector<8x64xf32>, vector<64x32xf32>, vector<8x32xf32> -> vector<8x32xf32>
    %172 = arith.addf %170, %171 : vector<8x32xf32>
    %173 = vector.broadcast %146 : vector<8x1xf32> to vector<8x32xf32>
    %174 = arith.mulf %172, %173 : vector<8x32xf32>
    %175 = arith.addf %102, %174 : vector<8x32xf32>
    %176 = vector.broadcast %25 : vector<1x32xf32> to vector<8x32xf32>
    %177 = arith.addf %175, %176 : vector<8x32xf32>
    %cst_53 = arith.constant dense<0.000000e+00> : vector<8xf32>
    %178 = vector.multi_reduction <add>, %177, %cst_53 [1] : vector<8x32xf32> to vector<8xf32>
    %179 = vector.shape_cast %178 : vector<8xf32> to vector<8x1xf32>
    %cst_54 = arith.constant 3.200000e+01 : f32
    %180 = vector.broadcast %cst_54 : f32 to vector<8x1xf32>
    %181 = arith.divf %179, %180 : vector<8x1xf32>
    %182 = vector.broadcast %181 : vector<8x1xf32> to vector<8x32xf32>
    %183 = arith.subf %177, %182 : vector<8x32xf32>
    %184 = arith.mulf %183, %183 : vector<8x32xf32>
    %cst_55 = arith.constant dense<0.000000e+00> : vector<8xf32>
    %185 = vector.multi_reduction <add>, %184, %cst_55 [1] : vector<8x32xf32> to vector<8xf32>
    %186 = vector.shape_cast %185 : vector<8xf32> to vector<8x1xf32>
    %cst_56 = arith.constant 3.200000e+01 : f32
    %187 = vector.broadcast %cst_56 : f32 to vector<8x1xf32>
    %188 = arith.divf %186, %187 : vector<8x1xf32>
    %189 = vector.broadcast %181 : vector<8x1xf32> to vector<8x32xf32>
    %190 = arith.subf %177, %189 : vector<8x32xf32>
    %cst_57 = arith.constant 9.99999974E-6 : f32
    %191 = vector.broadcast %cst_57 : f32 to vector<8x1xf32>
    %192 = arith.addf %188, %191 : vector<8x1xf32>
    %193 = math.rsqrt %192 : vector<8x1xf32>
    %194 = vector.broadcast %193 : vector<8x1xf32> to vector<8x32xf32>
    %195 = arith.mulf %190, %194 : vector<8x32xf32>
    %196 = vector.broadcast %26 : vector<1x32xf32> to vector<8x32xf32>
    %197 = arith.mulf %195, %196 : vector<8x32xf32>
    %198 = vector.broadcast %27 : vector<1x32xf32> to vector<8x32xf32>
    %199 = arith.addf %197, %198 : vector<8x32xf32>
    %cst_58 = arith.constant dense<0.000000e+00> : vector<8x64xf32>
    %200 = tpu.matmul %199, %3, %cst_58 {dimension_numbers = #tpu.dot_dimension_numbers<[1], [0], [0], [1], [0, 0, 1, 1], [], []>} : vector<8x32xf32>, vector<32x64xf32>, vector<8x64xf32> -> vector<8x64xf32>
    %201 = vector.broadcast %8 : vector<1x64xf32> to vector<8x64xf32>
    %202 = arith.addf %200, %201 : vector<8x64xf32>
    %cst_59 = arith.constant 0.000000e+00 : f32
    %203 = vector.broadcast %cst_59 : f32 to vector<8x64xf32>
    %204 = arith.maximumf %202, %203 : vector<8x64xf32>
    %cst_60 = arith.constant dense<0.000000e+00> : vector<8x32xf32>
    %205 = tpu.matmul %204, %14, %cst_60 {dimension_numbers = #tpu.dot_dimension_numbers<[1], [0], [0], [1], [0, 0, 1, 1], [], []>} : vector<8x64xf32>, vector<64x32xf32>, vector<8x32xf32> -> vector<8x32xf32>
    %206 = arith.addf %177, %205 : vector<8x32xf32>
    %207 = vector.broadcast %28 : vector<1x32xf32> to vector<8x32xf32>
    %208 = arith.addf %206, %207 : vector<8x32xf32>
    %cst_61 = arith.constant dense<0.000000e+00> : vector<8xf32>
    %209 = vector.multi_reduction <add>, %208, %cst_61 [1] : vector<8x32xf32> to vector<8xf32>
    %210 = vector.shape_cast %209 : vector<8xf32> to vector<8x1xf32>
    %cst_62 = arith.constant 3.200000e+01 : f32
    %211 = vector.broadcast %cst_62 : f32 to vector<8x1xf32>
    %212 = arith.divf %210, %211 : vector<8x1xf32>
    %213 = vector.broadcast %212 : vector<8x1xf32> to vector<8x32xf32>
    %214 = arith.subf %208, %213 : vector<8x32xf32>
    %215 = arith.mulf %214, %214 : vector<8x32xf32>
    %cst_63 = arith.constant dense<0.000000e+00> : vector<8xf32>
    %216 = vector.multi_reduction <add>, %215, %cst_63 [1] : vector<8x32xf32> to vector<8xf32>
    %217 = vector.shape_cast %216 : vector<8xf32> to vector<8x1xf32>
    %cst_64 = arith.constant 3.200000e+01 : f32
    %218 = vector.broadcast %cst_64 : f32 to vector<8x1xf32>
    %219 = arith.divf %217, %218 : vector<8x1xf32>
    %220 = vector.broadcast %212 : vector<8x1xf32> to vector<8x32xf32>
    %221 = arith.subf %208, %220 : vector<8x32xf32>
    %cst_65 = arith.constant 9.99999974E-6 : f32
    %222 = vector.broadcast %cst_65 : f32 to vector<8x1xf32>
    %223 = arith.addf %219, %222 : vector<8x1xf32>
    %224 = math.rsqrt %223 : vector<8x1xf32>
    %225 = vector.broadcast %224 : vector<8x1xf32> to vector<8x32xf32>
    %226 = arith.mulf %221, %225 : vector<8x32xf32>
    %227 = vector.broadcast %29 : vector<1x32xf32> to vector<8x32xf32>
    %228 = arith.mulf %226, %227 : vector<8x32xf32>
    %229 = vector.broadcast %30 : vector<1x32xf32> to vector<8x32xf32>
    %230 = arith.addf %228, %229 : vector<8x32xf32>
    %cst_66 = arith.constant 0.000000e+00 : f32
    %231 = vector.broadcast %cst_66 : f32 to vector<8x32xf32>
    %232 = arith.maximumf %230, %231 : vector<8x32xf32>
    %cst_67 = arith.constant dense<0.000000e+00> : vector<8x128xf32>
    %233 = tpu.matmul %232, %31, %cst_67 {dimension_numbers = #tpu.dot_dimension_numbers<[1], [0], [0], [1], [0, 0, 1, 1], [], []>} : vector<8x32xf32>, vector<32x128xf32>, vector<8x128xf32> -> vector<8x128xf32>
    %234 = vector.broadcast %32 : vector<1x128xf32> to vector<8x128xf32>
    %235 = arith.addf %233, %234 : vector<8x128xf32>
    %c0_68 = arith.constant 0 : index
    %c0_69 = arith.constant 0 : index
    %236 = vector.load %arg5[%c0_68, %c0_69] : memref<8x128xf32, #tpu.memory_space<vmem>>, vector<8x128xf32>
    tpu.vector_store %arg5[%c0_68, %c0_69], %235 {strides = array<i32>} : memref<8x128xf32, #tpu.memory_space<vmem>>, vector<8x128xf32>,
    return
  }
}

</mosaic_0001>

<bundles_post_ra>
// kernel: tabr_forward.1
= control target key start
LH: loop header
LB: loop body
LE: loop exit
PB: predicated region body
PF: predicated region fallthrough
CT: control target
= control target key end

     0   :  { %v6903_v0 = vmov 0.0   ;;  %vm6912_vm0 = vmmov 0   ;;  %vm91_vm1 = vcmask 130048   ;;  %v87_v17 = vlaneseq  ;;  %s6897_s3 = inlined_call_operand.vmem [shape: f32[320,32], index: 3, kind: input, shape index: {}]   ;;  %s6898_s0 = inlined_call_operand.vmem [shape: f32[40,16], index: 0, kind: input, shape index: {}]   ;;  %s6899_s2 = inlined_call_operand.vmem [shape: f32[136,64], index: 2, kind: input, shape index: {}]   ;;  %s6900_s1 = inlined_call_operand.vmem [shape: f32[1,32], index: 1, kind: input, shape index: {}]   ;;  %s6901_s4 = inlined_call_operand.vmem [shape: f32[40,128], index: 4, kind: input, shape index: {}]   ;;  %s6902_s5 = inlined_call_operand.vmem [shape: f32[8,128], index: 5, kind: output, shape index: {}]  }
   0x1   :  { %4223 = vmatprep.subr.mxu0 %v6903_v0  ;;  %v38_v1 = vld [vmem:[%s6897_s3 + $0x8] sm:$0xff]  ;;  %v37_v2 = vld [vmem:[%s6897_s3] sm:$0xff]  ;;  %4227 = vmatprep.mubr.msk.f32.mxu0 %vm6912_vm0, %v6903_v0  ;;  %v23_v4 = vld [vmem:[%s6899_s2 + $0x18] sm:$0xff]  ;;  %vm201_vm2 = vcmask 261120   ;;  %vm6914_vm3 = vcmask 523264  }
   0x2   :  { %4224 = vmatpush3.msra.mxu0 %v38_v1  ;;  %v82_v3 = vld [vmem:[%s6898_s0] sm:$0xff]  ;;  %4242 = vmatprep.subr.mxu1 %v6903_v0  ;;  %v22_v5 = vld [vmem:[%s6899_s2 + $0x10] sm:$0xff]  ;;  %v83_v6 = vld [vmem:[%s6898_s0 + $0x8] sm:$0xff]  ;;  %v4631_v18 = vshrl.u32 %v87_v17, 7 }
   0x3   :  { %4225 = vmatprep.subr.mxu0 %v6903_v0  ;;  %4250 = vmatprep.mubr.msk.f32.mxu1 %vm6912_vm0, %v6903_v0  ;;  %v84_v7 = vld [vmem:[%s6898_s0 + $0x10] sm:$0xff]  ;;  %v85_v8 = vld [vmem:[%s6898_s0 + $0x18] sm:$0xff]  ;;  %v86_v9 = vld [vmem:[%s6898_s0 + $0x20] sm:$0xff] }
   0x4   :  { %4226 = vmatpush3.msra.mxu0 %v37_v2  ;;  %4243 = vmatpush3.msra.mxu1 %v23_v4  ;;  %v21_v10 = vld [vmem:[%s6899_s2 + $0x8] sm:$0xff]  ;;  %v20_v11 = vld [vmem:[%s6899_s2] sm:$0xff]  ;;  %v44_v14 = vld [vmem:[%s6897_s3 + $0x38] sm:$0xff]  ;;  %v4634_v19 = vsub.s32 0, %v4631_v18  ;;  %v4708_v62 = vsub.s32 1, %v4631_v18 }
   0x5   :  { %4228 = vmatmul.mubr.msk.f32.vlgmr.msra.gmra.mxu0 %vm91_vm1, %v82_v3  ;;  %4244 = vmatprep.subr.mxu1 %v6903_v0  ;;  %v46_v12 = vld [vmem:[%s6897_s3 + $0x48] sm:$0xff]  ;;  %v45_v13 = vld [vmem:[%s6897_s3 + $0x40] sm:$0xff]  ;;  %v43_v15 = vld [vmem:[%s6897_s3 + $0x30] sm:$0xff] }
   0x6   :  { %4230 = vmatprep.mubr.msk.f32.mxu0 %vm6912_vm0, %v6903_v0  ;;  %4245 = vmatpush3.msra.mxu1 %v22_v5  ;;  %v42_v16 = vld [vmem:[%s6897_s3 + $0x28] sm:$0xff]  ;;  %7003 = vst [vmem:[#allocation2_spill] sm:$0xff] %v4634_v19  ;;  %v4639_v20 = vld [vmem:[%s6897_s3 + $0x130] sm:$0xff]  ;;  %v41_v37 = vld [vmem:[%s6897_s3 + $0x20] sm:$0xff] }
   0x7   :  { %4246 = vmatprep.subr.mxu1 %v6903_v0  ;;  %4265 = vmatprep.subr.mxu0 %v6903_v0  ;;  %v90_v21 = vrot.slane %v4639_v20, %v4634_v19  ;;  %v40_v38 = vld [vmem:[%s6897_s3 + $0x18] sm:$0xff]  ;;  %v39_v39 = vld [vmem:[%s6897_s3 + $0x10] sm:$0xff]  ;;  %v4688_v40 = vld [vmem:[%s6899_s2 + $0x80] sm:$0xff]  ;;  %7004 = vst [vmem:[#allocation3_spill] sm:$0xff] %v4708_v62  ;;  %v426_v63 = vrot.slane %v4639_v20, %v4708_v62 }
   0x8   :  { %4247 = vmatpush3.msra.mxu1 %v21_v10  ;;  %4266 = vmatpush3.msra.mxu0 %v46_v12  ;;  %v200_v41 = vrot.slane %v4688_v40, %v4634_v19 }
   0x9   :  { %4231 = vmatmul.mubr.msk.f32.gmra.mxu0 %vm91_vm1, %v83_v6  ;;  %4248 = vmatprep.subr.mxu1 %v6903_v0 }
   0xa   :  { %4233 = vmatprep.mubr.msk.f32.mxu0 %vm6912_vm0, %v6903_v0  ;;  %4249 = vmatpush3.msra.mxu1 %v20_v11 }
   0xb   :  { %4296 = vmatprep.subr.mxu1 %v6903_v0  ;;  %4267 = vmatprep.subr.mxu0 %v6903_v0 }
   0xc   :  { %4268 = vmatpush3.msra.mxu0 %v45_v13 }
   0xd   :  { %4234 = vmatmul.mubr.msk.f32.gmra.mxu0 %vm91_vm1, %v84_v7  ;;  %4269 = vmatprep.subr.mxu0 %v6903_v0 }
   0xe   :  { %4236 = vmatprep.mubr.msk.f32.mxu0 %vm6912_vm0, %v6903_v0  ;;  %4270 = vmatpush3.msra.mxu0 %v44_v14 }
   0xf   :  { %4271 = vmatprep.subr.mxu0 %v6903_v0 }
  0x10   :  { %4272 = vmatpush3.msra.mxu0 %v43_v15 }
  0x11   :  { %4237 = vmatmul.mubr.msk.f32.gmra.mxu0 %vm91_vm1, %v85_v8  ;;  %4273 = vmatprep.subr.mxu0 %v6903_v0 }
  0x12   :  { %4239 = vmatprep.mubr.msk.f32.mxu0 %vm6912_vm0, %v6903_v0  ;;  %4274 = vmatpush3.msra.mxu0 %v42_v16 }
  0x13   :  { %4275 = vmatprep.subr.mxu0 %v6903_v0 }
  0x14   :  { %4276 = vmatpush3.msra.mxu0 %v41_v37 }
  0x15   :  { %4240 = vmatmul.mubr.msk.f32.gmra.mxu0 %vm91_vm1, %v86_v9  ;;  %4277 = vmatprep.subr.mxu0 %v6903_v0 }
  0x16   :  { %4281 = vmatprep.mubr.msk.f32.mxu0 %vm6912_vm0, %v6903_v0  ;;  %4278 = vmatpush3.msra.mxu0 %v40_v38 }
  0x17   :  { %4279 = vmatprep.subr.mxu0 %v6903_v0 }
  0x18   :  { %4280 = vmatpush3.msra.mxu0 %v39_v39 }
  0x19   :  { %4319 = vmatprep.subr.mxu0 %v6903_v0 }
  0xc5   :  { %v173_v22 = vpop.f32.mrf.mxu0 }
  0xc6   :  { %v4643_v23 = vadd.f32 %v173_v22, %v90_v21 }
  0xc7   :  { %v4229_v24 = vpop.f32.mrf.mxu0 }
  0xc8   :  { %4251 = vmatmul.mubr.msk.f32.vlgmr.msra.gmra.mxu1 %vm201_vm2, %v4643_v23 }
  0xc9   :  { %v178_v25 = vpop.f32.mrf.mxu0  ;;  %4253 = vmatprep.mubr.msk.f32.mxu1 %vm6912_vm0, %v6903_v0 }
  0xca   :  { %v4649_v26 = vadd.f32 %v178_v25, %v90_v21 }
  0xcb   :  { %v4232_v27 = vpop.f32.mrf.mxu0 }
  0xcc   :  { %4254 = vmatmul.mubr.msk.f32.gmra.mxu1 %vm201_vm2, %v4649_v26 }
  0xcd   :  { %v183_v28 = vpop.f32.mrf.mxu0  ;;  %4256 = vmatprep.mubr.msk.f32.mxu1 %vm6912_vm0, %v6903_v0 }
  0xce   :  { %v4655_v29 = vadd.f32 %v183_v28, %v90_v21 }
  0xcf   :  { %v4235_v30 = vpop.f32.mrf.mxu0 }
  0xd0   :  { %4257 = vmatmul.mubr.msk.f32.gmra.mxu1 %vm201_vm2, %v4655_v29 }
  0xd1   :  { %v188_v31 = vpop.f32.mrf.mxu0  ;;  %4259 = vmatprep.mubr.msk.f32.mxu1 %vm6912_vm0, %v6903_v0 }
  0xd2   :  { %v4661_v32 = vadd.f32 %v188_v31, %v90_v21 }
  0xd3   :  { %v4238_v33 = vpop.f32.mrf.mxu0 }
  0xd4   :  { %4260 = vmatmul.mubr.msk.f32.gmra.mxu1 %vm201_vm2, %v4661_v32 }
  0xd5   :  { %v193_v34 = vpop.f32.mrf.mxu0  ;;  %4262 = vmatprep.mubr.msk.f32.mxu1 %vm6912_vm0, %v6903_v0 }
  0xd6   :  { %v4667_v35 = vadd.f32 %v193_v34, %v90_v21 }
  0xd7   :  { %v4241_v36 = vpop.f32.mrf.mxu0 }
  0xd8   :  { %4263 = vmatmul.mubr.msk.f32.gmra.mxu1 %vm201_vm2, %v4667_v35 }
  0xd9   :  { %4304 = vmatprep.mubr.msk.f32.mxu1 %vm6912_vm0, %v6903_v0 }
 0x188   :  { %v283_v42 = vpop.f32.mrf.mxu1 }
 0x189   :  { %v284_v43 = vadd.f32 %v283_v42, %v200_v41 }
 0x18a   :  { %v4252_v44 = vpop.f32.mrf.mxu1 }
 0x18b   :  { %v307_v45 = vmax.f32 %v284_v43, 0.0 }
 0x18c   :  { %v288_v46 = vpop.f32.mrf.mxu1 }
 0x18d   :  { %v289_v47 = vadd.f32 %v288_v46, %v200_v41  ;;  %4282 = vmatmul.mubr.msk.f32.vlgmr.msra.gmra.mxu0 %vm6914_vm3, %v307_v45 }
 0x18e   :  { %v4255_v48 = vpop.f32.mrf.mxu1  ;;  %4284 = vmatprep.mubr.msk.f32.mxu0 %vm6912_vm0, %v6903_v0 }
 0x18f   :  { %v308_v49 = vmax.f32 %v289_v47, 0.0 }
 0x190   :  { %v293_v50 = vpop.f32.mrf.mxu1 }
 0x191   :  { %v294_v51 = vadd.f32 %v293_v50, %v200_v41  ;;  %4285 = vmatmul.mubr.msk.f32.gmra.mxu0 %vm6914_vm3, %v308_v49 }
 0x192   :  { %v4258_v52 = vpop.f32.mrf.mxu1  ;;  %4287 = vmatprep.mubr.msk.f32.mxu0 %vm6912_vm0, %v6903_v0 }
 0x193   :  { %v309_v53 = vmax.f32 %v294_v51, 0.0 }
 0x194   :  { %v298_v54 = vpop.f32.mrf.mxu1 }
 0x195   :  { %v299_v55 = vadd.f32 %v298_v54, %v200_v41  ;;  %4288 = vmatmul.mubr.msk.f32.gmra.mxu0 %vm6914_vm3, %v309_v53 }
 0x196   :  { %v4261_v56 = vpop.f32.mrf.mxu1  ;;  %4290 = vmatprep.mubr.msk.f32.mxu0 %vm6912_vm0, %v6903_v0 }
 0x197   :  { %v310_v57 = vmax.f32 %v299_v55, 0.0  ;;  %v27_v56 = vld [vmem:[%s6899_s2 + $0x38] sm:$0xff] }
 0x198   :  { %v303_v58 = vpop.f32.mrf.mxu1  ;;  %4297 = vmatpush3.msra.mxu1 %v27_v56 }
 0x199   :  { %v304_v59 = vadd.f32 %v303_v58, %v200_v41  ;;  %4291 = vmatmul.mubr.msk.f32.gmra.mxu0 %vm6914_vm3, %v310_v57  ;;  %4298 = vmatprep.subr.mxu1 %v6903_v0  ;;  %v26_v57 = vld [vmem:[%s6899_s2 + $0x30] sm:$0xff]  ;;  %v25_v58 = vld [vmem:[%s6899_s2 + $0x28] sm:$0xff] }
 0x19a   :  { %v4264_v60 = vpop.f32.mrf.mxu1  ;;  %4293 = vmatprep.mubr.msk.f32.mxu0 %vm6912_vm0, %v6903_v0  ;;  %4299 = vmatpush3.msra.mxu1 %v26_v57 }
 0x19b   :  { %v311_v61 = vmax.f32 %v304_v59, 0.0  ;;  %4300 = vmatprep.subr.mxu1 %v6903_v0  ;;  %v24_v59 = vld [vmem:[%s6899_s2 + $0x20] sm:$0xff]  ;;  %v54_v60 = vld [vmem:[%s6897_s3 + $0x88] sm:$0xff] }
 0x19c   :  { %4301 = vmatpush3.msra.mxu1 %v25_v58  ;;  %4320 = vmatpush3.msra.mxu0 %v54_v60 }
 0x19d   :  { %4294 = vmatmul.mubr.msk.f32.gmra.mxu0 %vm6914_vm3, %v311_v61  ;;  %4302 = vmatprep.subr.mxu1 %v6903_v0  ;;  %v53_v61 = vld [vmem:[%s6897_s3 + $0x80] sm:$0xff] }
 0x19e   :  { %4335 = vmatprep.mubr.msk.f32.mxu0 %vm6912_vm0, %v6903_v0  ;;  %4303 = vmatpush3.msra.mxu1 %v24_v59 }
 0x19f   :  { %4350 = vmatprep.subr.mxu1 %v6903_v0  ;;  %4321 = vmatprep.subr.mxu0 %v6903_v0 }
 0x1a0   :  { %4322 = vmatpush3.msra.mxu0 %v53_v61 }
 0x1a1   :  { %4323 = vmatprep.subr.mxu0 %v6903_v0 }
 0x24d   :  { %v394_v1 = vpop.f32.mrf.mxu0 }
 0x24e   :  { %v418_v2 = vadd.f32 %v394_v1, %v4643_v23  ;;  %v51_v1 = vld [vmem:[%s6897_s3 + $0x70] sm:$0xff] }
 0x24f   :  { %v4283_v3 = vpop.f32.mrf.mxu0 }
 0x250   :  { %v4713_v4 = vadd.f32 %v426_v63, %v418_v2  ;;  %v50_v2 = vld [vmem:[%s6897_s3 + $0x68] sm:$0xff] }
 0x251   :  { %v399_v5 = vpop.f32.mrf.mxu0 }
 0x252   :  { %v419_v6 = vadd.f32 %v399_v5, %v4649_v26  ;;  %v432_v7 = vsel %vm201_vm2, %v4713_v4, 0.0 }
 0x253   :  { %433 = vadd.xlane.f32.xlu0 %v432_v7  ;;  %v4286_v8 = vpop.f32.mrf.mxu0 }
 0x254   :  { %v4718_v9 = vadd.f32 %v426_v63, %v419_v6 }
 0x255   :  { %v404_v10 = vpop.f32.mrf.mxu0 }
 0x256   :  { %v420_v11 = vadd.f32 %v404_v10, %v4655_v29  ;;  %v435_v12 = vsel %vm201_vm2, %v4718_v9, 0.0 }
 0x257   :  { %436 = vadd.xlane.f32.xlu0 %v435_v12  ;;  %v4289_v13 = vpop.f32.mrf.mxu0 }
 0x258   :  { %v4723_v14 = vadd.f32 %v426_v63, %v420_v11 }
 0x259   :  { %v409_v15 = vpop.f32.mrf.mxu0 }
 0x25a   :  { %v421_v16 = vadd.f32 %v409_v15, %v4661_v32  ;;  %v438_v21 = vsel %vm201_vm2, %v4723_v14, 0.0 }
 0x25b   :  { %439 = vadd.xlane.f32.xlu1 %v438_v21  ;;  %v4292_v22 = vpop.f32.mrf.mxu0 }
 0x25c   :  { %v4728_v23 = vadd.f32 %v426_v63, %v421_v16  ;;  %v4804_v16 = vsub.s32 2, %v4631_v18 }
 0x25d   :  { %v414_v24 = vpop.f32.mrf.mxu0 }
 0x25e   :  { %v422_v25 = vadd.f32 %v414_v24, %v4667_v35  ;;  %v441_v26 = vsel %vm201_vm2, %v4728_v23, 0.0  ;;  %7005 = vst [vmem:[#allocation4_spill] sm:$0xff] %v4804_v16  ;;  %v4807_v24 = vsub.s32 3, %v4631_v18 }
 0x25f   :  { %442 = vadd.xlane.f32.xlu1 %v441_v26  ;;  %v4295_v27 = vpop.f32.mrf.mxu0  ;;  %v501_v26 = vrot.slane %v4639_v20, %v4804_v16 }
 0x260   :  { %v4733_v28 = vadd.f32 %v426_v63, %v422_v25  ;;  %v52_v63 = vld [vmem:[%s6897_s3 + $0x78] sm:$0xff]  ;;  %7006 = vst [vmem:[#allocation5_spill] sm:$0xff] %v4807_v24 }
 0x261   :  { %4324 = vmatpush3.msra.mxu0 %v52_v63 }
 0x262   :  { %v444_v29 = vsel %vm201_vm2, %v4733_v28, 0.0  ;;  %4325 = vmatprep.subr.mxu0 %v6903_v0 }
 0x263   :  { %445 = vadd.xlane.f32.xlu0 %v444_v29  ;;  %4326 = vmatpush3.msra.mxu0 %v51_v1 }
 0x264   :  { %4327 = vmatprep.subr.mxu0 %v6903_v0 }
 0x265   :  { %4328 = vmatpush3.msra.mxu0 %v50_v2 }
 0x266   :  { %4329 = vmatprep.subr.mxu0 %v6903_v0 }
 0x2dc   :  { %v434_v30 = vpop.xlane.xlu0 %433 }
 0x2dd   :  { %v448_v31 = vmul.f32 0.03125, %v434_v30 }
 0x2df   :  { %v4738_v32 = vsub.f32 %v4713_v4, %v448_v31 }
 0x2e0   :  { %v437_v33 = vpop.xlane.xlu0 %436 }
 0x2e1   :  { %v449_v34 = vmul.f32 0.03125, %v437_v33  ;;  %v458_v35 = vmul.f32 %v4738_v32, %v4738_v32  ;;  %v510_v33 = vrot.slane %v4639_v20, %v4807_v24 }
 0x2e3   :  { %v4743_v36 = vsub.f32 %v4718_v9, %v449_v34  ;;  %v463_v37 = vsel %vm201_vm2, %v458_v35, 0.0 }
 0x2e4   :  { %v440_v38 = vpop.xlane.xlu1 %439  ;;  %464 = vadd.xlane.f32.xlu1 %v463_v37 }
 0x2e5   :  { %v450_v39 = vmul.f32 0.03125, %v440_v38  ;;  %v459_v41 = vmul.f32 %v4743_v36, %v4743_v36 }
 0x2e7   :  { %v4749_v42 = vsub.f32 %v4723_v14, %v450_v39  ;;  %v466_v43 = vsel %vm201_vm2, %v459_v41, 0.0 }
 0x2e8   :  { %v443_v44 = vpop.xlane.xlu1 %442  ;;  %467 = vadd.xlane.f32.xlu0 %v466_v43 }
 0x2e9   :  { %v451_v45 = vmul.f32 0.03125, %v443_v44  ;;  %v460_v46 = vmul.f32 %v4749_v42, %v4749_v42 }
 0x2eb   :  { %v4755_v47 = vsub.f32 %v4728_v23, %v451_v45  ;;  %v469_v48 = vsel %vm201_vm2, %v460_v46, 0.0 }
 0x2ec   :  { %470 = vadd.xlane.f32.xlu1 %v469_v48  ;;  %v446_v49 = vpop.xlane.xlu0 %445 }
 0x2ed   :  { %v452_v50 = vmul.f32 0.03125, %v446_v49  ;;  %v461_v51 = vmul.f32 %v4755_v47, %v4755_v47 }
 0x2ef   :  { %v4761_v52 = vsub.f32 %v4733_v28, %v452_v50  ;;  %v472_v53 = vsel %vm201_vm2, %v461_v51, 0.0 }
 0x2f0   :  { %473 = vadd.xlane.f32.xlu0 %v472_v53 }
 0x2f1   :  { %v462_v54 = vmul.f32 %v4761_v52, %v4761_v52 }
 0x2f3   :  { %v475_v55 = vsel %vm201_vm2, %v462_v54, 0.0  ;;  %v47_v54 = vld [vmem:[%s6897_s3 + $0x50] sm:$0xff] }
 0x2f4   :  { %476 = vadd.xlane.f32.xlu1 %v475_v55  ;;  %v519_v55 = vrot.slane %v4688_v40, %v4708_v62 }
 0x36d   :  { %v465_v3 = vpop.xlane.xlu1 %464 }
 0x36e   :  { %v478_v5 = vmul.f32 0.03125, %v465_v3 }
 0x370   :  { %v483_v6 = vadd.f32 1e-05, %v478_v5 }
 0x371   :  { %v468_v7 = vpop.xlane.xlu0 %467 }
 0x372   :  { %4485 = vrsqrt.f32 %v483_v6  ;;  %v479_v8 = vmul.f32 0.03125, %v468_v7 }
 0x374   :  { %v484_v10 = vadd.f32 1e-05, %v479_v8 }
 0x375   :  { %v471_v11 = vpop.xlane.xlu1 %470 }
 0x376   :  { %4487 = vrsqrt.f32 %v484_v10  ;;  %v480_v12 = vmul.f32 0.03125, %v471_v11 }
 0x378   :  { %v485_v13 = vadd.f32 1e-05, %v480_v12 }
 0x379   :  { %v474_v15 = vpop.xlane.xlu0 %473 }
 0x37a   :  { %4489 = vrsqrt.f32 %v485_v13  ;;  %v481_v21 = vmul.f32 0.03125, %v474_v15 }
 0x37c   :  { %v486_v22 = vadd.f32 1e-05, %v481_v21  ;;  %v4863_v21 = vsub.s32 4, %v4631_v18 }
 0x37d   :  { %v477_v25 = vpop.xlane.xlu1 %476 }
 0x37e   :  { %4491 = vrsqrt.f32 %v486_v22  ;;  %v482_v27 = vmul.f32 0.03125, %v477_v25  ;;  %7007 = vst [vmem:[#allocation6_spill] sm:$0xff] %v4863_v21  ;;  %v743_v22 = vrot.slane %v4639_v20, %v4863_v21 }
 0x37f   :  { %v4486_v29 = vpop.eup %4485 }
 0x380   :  { %v493_v30 = vmul.f32 %v4486_v29, %v4738_v32  ;;  %v487_v31 = vadd.f32 1e-05, %v482_v27 }
 0x382   :  { %v502_v34 = vmul.f32 %v501_v26, %v493_v30  ;;  %4493 = vrsqrt.f32 %v487_v31 }
 0x383   :  { %v4488_v35 = vpop.eup %4487 }
 0x384   :  { %v511_v37 = vadd.f32 %v510_v33, %v502_v34  ;;  %v494_v38 = vmul.f32 %v4488_v35, %v4743_v36 }
 0x386   :  { %4305 = vmatmul.mubr.msk.f32.vlgmr.msra.gmra.mxu1 %vm201_vm2, %v511_v37  ;;  %v503_v39 = vmul.f32 %v501_v26, %v494_v38 }
 0x387   :  { %v4490_v41 = vpop.eup %4489  ;;  %4307 = vmatprep.mubr.msk.f32.mxu1 %vm6912_vm0, %v6903_v0 }
 0x388   :  { %v512_v43 = vadd.f32 %v510_v33, %v503_v39  ;;  %v495_v32 = vmul.f32 %v4490_v41, %v4749_v42 }
 0x38a   :  { %4308 = vmatmul.mubr.msk.f32.gmra.mxu1 %vm201_vm2, %v512_v43  ;;  %v504_v44 = vmul.f32 %v501_v26, %v495_v32 }
 0x38b   :  { %v4492_v45 = vpop.eup %4491  ;;  %4310 = vmatprep.mubr.msk.f32.mxu1 %vm6912_vm0, %v6903_v0 }
 0x38c   :  { %v513_v46 = vadd.f32 %v510_v33, %v504_v44  ;;  %v496_v36 = vmul.f32 %v4492_v45, %v4755_v47  ;;  %v49_v47 = vld [vmem:[%s6897_s3 + $0x60] sm:$0xff] }
 0x38d   :  { %4330 = vmatpush3.msra.mxu0 %v49_v47 }
 0x38e   :  { %4311 = vmatmul.mubr.msk.f32.gmra.mxu1 %vm201_vm2, %v513_v46  ;;  %v505_v48 = vmul.f32 %v501_v26, %v496_v36  ;;  %4331 = vmatprep.subr.mxu0 %v6903_v0 }
 0x38f   :  { %v4494_v49 = vpop.eup %4493  ;;  %4313 = vmatprep.mubr.msk.f32.mxu1 %vm6912_vm0, %v6903_v0 }
 0x390   :  { %v514_v50 = vadd.f32 %v510_v33, %v505_v48  ;;  %v497_v42 = vmul.f32 %v4494_v49, %v4761_v52  ;;  %v48_v52 = vld [vmem:[%s6897_s3 + $0x58] sm:$0xff] }
 0x391   :  { %4332 = vmatpush3.msra.mxu0 %v48_v52 }
 0x392   :  { %4314 = vmatmul.mubr.msk.f32.gmra.mxu1 %vm201_vm2, %v514_v50  ;;  %v506_v51 = vmul.f32 %v501_v26, %v497_v42  ;;  %4333 = vmatprep.subr.mxu0 %v6903_v0 }
 0x393   :  { %4316 = vmatprep.mubr.msk.f32.mxu1 %vm6912_vm0, %v6903_v0  ;;  %4334 = vmatpush3.msra.mxu0 %v47_v54 }
 0x394   :  { %v515_v53 = vadd.f32 %v510_v33, %v506_v51  ;;  %4373 = vmatprep.subr.mxu0 %v6903_v0 }
 0x396   :  { %4317 = vmatmul.mubr.msk.f32.gmra.mxu1 %vm201_vm2, %v515_v53 }
 0x397   :  { %4358 = vmatprep.mubr.msk.f32.mxu1 %vm6912_vm0, %v6903_v0 }
 0x446   :  { %v601_v56 = vpop.f32.mrf.mxu1 }
 0x447   :  { %v602_v57 = vadd.f32 %v601_v56, %v519_v55 }
 0x448   :  { %v4306_v58 = vpop.f32.mrf.mxu1 }
 0x449   :  { %v625_v59 = vmax.f32 %v602_v57, 0.0 }
 0x44a   :  { %v606_v60 = vpop.f32.mrf.mxu1 }
 0x44b   :  { %v607_v61 = vadd.f32 %v606_v60, %v519_v55  ;;  %4336 = vmatmul.mubr.msk.f32.vlgmr.msra.gmra.mxu0 %vm6914_vm3, %v625_v59 }
 0x44c   :  { %v4309_v63 = vpop.f32.mrf.mxu1  ;;  %4338 = vmatprep.mubr.msk.f32.mxu0 %vm6912_vm0, %v6903_v0 }
 0x44d   :  { %v626_v1 = vmax.f32 %v607_v61, 0.0 }
 0x44e   :  { %v611_v2 = vpop.f32.mrf.mxu1 }
 0x44f   :  { %v612_v3 = vadd.f32 %v611_v2, %v519_v55  ;;  %4339 = vmatmul.mubr.msk.f32.gmra.mxu0 %vm6914_vm3, %v626_v1 }
 0x450   :  { %v4312_v5 = vpop.f32.mrf.mxu1  ;;  %4341 = vmatprep.mubr.msk.f32.mxu0 %vm6912_vm0, %v6903_v0 }
 0x451   :  { %v627_v40 = vmax.f32 %v612_v3, 0.0 }
 0x452   :  { %v616_v6 = vpop.f32.mrf.mxu1 }
 0x453   :  { %v617_v7 = vadd.f32 %v616_v6, %v519_v55  ;;  %4342 = vmatmul.mubr.msk.f32.gmra.mxu0 %vm6914_vm3, %v627_v40 }
 0x454   :  { %v4315_v8 = vpop.f32.mrf.mxu1  ;;  %4344 = vmatprep.mubr.msk.f32.mxu0 %vm6912_vm0, %v6903_v0 }
 0x455   :  { %v628_v10 = vmax.f32 %v617_v7, 0.0 }
 0x456   :  { %v621_v11 = vpop.f32.mrf.mxu1 }
 0x457   :  { %v622_v12 = vadd.f32 %v621_v11, %v519_v55  ;;  %4345 = vmatmul.mubr.msk.f32.gmra.mxu0 %vm6914_vm3, %v628_v10  ;;  %v58_v11 = vld [vmem:[%s6897_s3 + $0xa8] sm:$0xff] }
 0x458   :  { %v4318_v13 = vpop.f32.mrf.mxu1  ;;  %4347 = vmatprep.mubr.msk.f32.mxu0 %vm6912_vm0, %v6903_v0  ;;  %4351 = vmatpush3.msra.mxu1 %v58_v11 }
 0x459   :  { %v629_v15 = vmax.f32 %v622_v12, 0.0  ;;  %4352 = vmatprep.subr.mxu1 %v6903_v0  ;;  %v57_v12 = vld [vmem:[%s6897_s3 + $0xa0] sm:$0xff]  ;;  %v56_v13 = vld [vmem:[%s6897_s3 + $0x98] sm:$0xff] }
 0x45a   :  { %4353 = vmatpush3.msra.mxu1 %v57_v12 }
 0x45b   :  { %4348 = vmatmul.mubr.msk.f32.gmra.mxu0 %vm6914_vm3, %v629_v15  ;;  %4354 = vmatprep.subr.mxu1 %v6903_v0  ;;  %v55_v15 = vld [vmem:[%s6897_s3 + $0x90] sm:$0xff] }
 0x45c   :  { %4381 = vmatprep.mubr.msk.f32.mxu0 %vm6912_vm0, %v6903_v0  ;;  %4355 = vmatpush3.msra.mxu1 %v56_v13 }
 0x45d   :  { %4356 = vmatprep.subr.mxu1 %v6903_v0 }
 0x45e   :  { %4357 = vmatpush3.msra.mxu1 %v55_v15 }
 0x45f   :  { %4384 = vmatprep.subr.mxu1 %v6903_v0 }
 0x50b   :  { %v711_v25 = vpop.f32.mrf.mxu0 }
 0x50c   :  { %v735_v26 = vadd.f32 %v711_v25, %v4713_v4 }
 0x50d   :  { %v4337_v27 = vpop.f32.mrf.mxu0 }
 0x50e   :  { %v4868_v29 = vadd.f32 %v743_v22, %v735_v26 }
 0x50f   :  { %v716_v30 = vpop.f32.mrf.mxu0 }
 0x510   :  { %7008 = vst [vmem:[#allocation7_spill] sm:$0xff] %v4868_v29  ;;  %v736_v31 = vadd.f32 %v716_v30, %v4718_v9  ;;  %v749_v33 = vsel %vm201_vm2, %v4868_v29, 0.0 }
 0x511   :  { %750 = vadd.xlane.f32.xlu0 %v749_v33  ;;  %v4340_v34 = vpop.f32.mrf.mxu0 }
 0x512   :  { %v745_v35 = vadd.f32 %v743_v22, %v736_v31 }
 0x513   :  { %v721_v37 = vpop.f32.mrf.mxu0 }
 0x514   :  { %v737_v38 = vadd.f32 %v721_v37, %v4723_v14  ;;  %v752_v39 = vsel %vm201_vm2, %v745_v35, 0.0 }
 0x515   :  { %753 = vadd.xlane.f32.xlu1 %v752_v39  ;;  %v4343_v41 = vpop.f32.mrf.mxu0 }
 0x516   :  { %v746_v4 = vadd.f32 %v743_v22, %v737_v38  ;;  %v4919_v38 = vsub.s32 5, %v4631_v18 }
 0x517   :  { %v726_v43 = vpop.f32.mrf.mxu0 }
 0x518   :  { %v738_v32 = vadd.f32 %v726_v43, %v4728_v23  ;;  %v755_v44 = vsel %vm201_vm2, %v746_v4, 0.0  ;;  %7009 = vst [vmem:[#allocation8_spill] sm:$0xff] %v4919_v38 }
 0x519   :  { %756 = vadd.xlane.f32.xlu0 %v755_v44  ;;  %v4346_v9 = vpop.f32.mrf.mxu0 }
 0x51a   :  { %v747_v45 = vadd.f32 %v743_v22, %v738_v32  ;;  %v817_v32 = vrot.slane %v4639_v20, %v4919_v38 }
 0x51b   :  { %v731_v46 = vpop.f32.mrf.mxu0 }
 0x51c   :  { %v739_v36 = vadd.f32 %v731_v46, %v4733_v28  ;;  %v758_v48 = vsel %vm201_vm2, %v747_v45, 0.0 }
 0x51d   :  { %759 = vadd.xlane.f32.xlu1 %v758_v48  ;;  %v4349_v14 = vpop.f32.mrf.mxu0 }
 0x51e   :  { %v748_v49 = vadd.f32 %v743_v22, %v739_v36 }
 0x520   :  { %v761_v50 = vsel %vm201_vm2, %v748_v49, 0.0 }
 0x521   :  { %762 = vadd.xlane.f32.xlu0 %v761_v50 }
 0x59a   :  { %v751_v42 = vpop.xlane.xlu0 %750 }
 0x59b   :  { %v764_v51 = vmul.f32 0.03125, %v751_v42 }
 0x59d   :  { %v769_v23 = vsub.f32 %v4868_v29, %v764_v51 }
 0x59e   :  { %v754_v53 = vpop.xlane.xlu1 %753 }
 0x59f   :  { %v765_v47 = vmul.f32 0.03125, %v754_v53  ;;  %v774_v52 = vmul.f32 %v769_v23, %v769_v23 }
 0x5a1   :  { %v4881_v54 = vsub.f32 %v745_v35, %v765_v47  ;;  %v779_v55 = vsel %vm201_vm2, %v774_v52, 0.0 }
 0x5a2   :  { %v757_v28 = vpop.xlane.xlu0 %756  ;;  %780 = vadd.xlane.f32.xlu1 %v779_v55 }
 0x5a3   :  { %v766_v56 = vmul.f32 0.03125, %v757_v28  ;;  %v775_v57 = vmul.f32 %v4881_v54, %v4881_v54 }
 0x5a5   :  { %v4886_v58 = vsub.f32 %v746_v4, %v766_v56  ;;  %v782_v59 = vsel %vm201_vm2, %v775_v57, 0.0  ;;  %v4922_v4 = vsub.s32 6, %v4631_v18 }
 0x5a6   :  { %v760_v60 = vpop.xlane.xlu1 %759  ;;  %783 = vadd.xlane.f32.xlu0 %v782_v59 }
 0x5a7   :  { %v767_v61 = vmul.f32 0.03125, %v760_v60  ;;  %v776_v63 = vmul.f32 %v4886_v58, %v4886_v58  ;;  %7010 = vst [vmem:[#allocation9_spill] sm:$0xff] %v4922_v4  ;;  %v826_v36 = vrot.slane %v4639_v20, %v4922_v4 }
 0x5a9   :  { %v4891_v1 = vsub.f32 %v747_v45, %v767_v61  ;;  %v785_v2 = vsel %vm201_vm2, %v776_v63, 0.0  ;;  %v4948_v61 = vand.u32 127, %v87_v17  ;;  %v4958_v17 = vsub.s32 7, %v4631_v18 }
 0x5aa   :  { %786 = vadd.xlane.f32.xlu1 %v785_v2  ;;  %v763_v3 = vpop.xlane.xlu0 %762 }
 0x5ab   :  { %v768_v5 = vmul.f32 0.03125, %v763_v3  ;;  %v777_v40 = vmul.f32 %v4891_v1, %v4891_v1  ;;  %v4951_v63 = vcvt.s32.f32 %v4948_v61 }
 0x5ad   :  { %v4896_v6 = vsub.f32 %v748_v49, %v768_v5  ;;  %v788_v7 = vsel %vm201_vm2, %v777_v40, 0.0 }
 0x5ae   :  { %789 = vadd.xlane.f32.xlu0 %v788_v7 }
 0x5af   :  { %v778_v8 = vmul.f32 %v4896_v6, %v4896_v6 }
 0x5b1   :  { %v791_v10 = vsel %vm201_vm2, %v778_v8, 0.0 }
 0x5b2   :  { %792 = vadd.xlane.f32.xlu1 %v791_v10  ;;  %v835_v10 = vrot.slane %v4639_v20, %v4958_v17 }
 0x5c3   :  { %1328 = vbcast.lane.b32.xlu1 %v4951_v63, 264 }
 0x5c4   :  { %1324 = vbcast.lane.b32.xlu0 %v4951_v63, 256 }
 0x5c8   :  { %1332 = vbcast.lane.b32.xlu0 %v4951_v63, 272 }
 0x5cc   :  { %1336 = vbcast.lane.b32.xlu0 %v4951_v63, 280 }
 0x62b   :  { %v781_v22 = vpop.xlane.xlu1 %780 }
 0x62c   :  { %v794_v25 = vmul.f32 0.03125, %v781_v22 }
 0x62e   :  { %v799_v26 = vadd.f32 1e-05, %v794_v25 }
 0x62f   :  { %v784_v27 = vpop.xlane.xlu0 %783 }
 0x630   :  { %4495 = vrsqrt.f32 %v799_v26  ;;  %v795_v30 = vmul.f32 0.03125, %v784_v27 }
 0x632   :  { %v800_v31 = vadd.f32 1e-05, %v795_v30 }
 0x633   :  { %v787_v33 = vpop.xlane.xlu1 %786 }
 0x634   :  { %4497 = vrsqrt.f32 %v800_v31  ;;  %v796_v34 = vmul.f32 0.03125, %v787_v33  ;;  %v31_v33 = vld [vmem:[%s6899_s2 + $0x58] sm:$0xff] }
 0x636   :  { %v801_v35 = vadd.f32 1e-05, %v796_v34  ;;  %v30_v34 = vld [vmem:[%s6899_s2 + $0x50] sm:$0xff] }
 0x637   :  { %v790_v37 = vpop.xlane.xlu0 %789 }
 0x638   :  { %4499 = vrsqrt.f32 %v801_v35  ;;  %v797_v39 = vmul.f32 0.03125, %v790_v37  ;;  %v4517_v35 = vmov 1.0   ;;  %v29_v37 = vld [vmem:[%s6899_s2 + $0x48] sm:$0xff] }
 0x63a   :  { %v802_v41 = vadd.f32 1e-05, %v797_v39  ;;  %v28_v39 = vld [vmem:[%s6899_s2 + $0x40] sm:$0xff] }
 0x63b   :  { %v793_v43 = vpop.xlane.xlu1 %792 }
 0x63c   :  { %4501 = vrsqrt.f32 %v802_v41  ;;  %v798_v44 = vmul.f32 0.03125, %v793_v43  ;;  %v4518_v41 = vmov 1966171168  }
 0x63d   :  { %v4496_v9 = vpop.eup %4495  ;;  %v1276_v43 = vunpack.c.l.s4 %v4518_v41 }
 0x63e   :  { %v809_v45 = vmul.f32 %v4496_v9, %v769_v23  ;;  %v803_v46 = vadd.f32 1e-05, %v798_v44 }
 0x640   :  { %v818_v48 = vmul.f32 %v817_v32, %v809_v45  ;;  %4503 = vrsqrt.f32 %v803_v46 }
 0x641   :  { %v4498_v14 = vpop.eup %4497 }
 0x642   :  { %v827_v49 = vadd.f32 %v826_v36, %v818_v48  ;;  %v810_v50 = vmul.f32 %v4498_v14, %v4881_v54 }
 0x644   :  { %4359 = vmatmul.mubr.msk.f32.vlgmr.msra.gmra.mxu1 %vm201_vm2, %v827_v49  ;;  %v819_v42 = vmul.f32 %v817_v32, %v810_v50 }
 0x645   :  { %v4500_v51 = vpop.eup %4499  ;;  %4361 = vmatprep.mubr.msk.f32.mxu1 %vm6912_vm0, %v6903_v0 }
 0x646   :  { %v828_v53 = vadd.f32 %v826_v36, %v819_v42  ;;  %v811_v23 = vmul.f32 %v4500_v51, %v4886_v58 }
 0x648   :  { %4362 = vmatmul.mubr.msk.f32.gmra.mxu1 %vm201_vm2, %v828_v53  ;;  %v820_v47 = vmul.f32 %v817_v32, %v811_v23 }
 0x649   :  { %v4502_v52 = vpop.eup %4501  ;;  %4364 = vmatprep.mubr.msk.f32.mxu1 %vm6912_vm0, %v6903_v0 }
 0x64a   :  { %v829_v55 = vadd.f32 %v826_v36, %v820_v47  ;;  %v812_v54 = vmul.f32 %v4502_v52, %v4891_v1 }
 0x64c   :  { %4365 = vmatmul.mubr.msk.f32.gmra.mxu1 %vm201_vm2, %v829_v55  ;;  %v821_v28 = vmul.f32 %v817_v32, %v812_v54 }
 0x64d   :  { %v4504_v56 = vpop.eup %4503  ;;  %4367 = vmatprep.mubr.msk.f32.mxu1 %vm6912_vm0, %v6903_v0 }
 0x64e   :  { %v830_v57 = vadd.f32 %v826_v36, %v821_v28  ;;  %v813_v58 = vmul.f32 %v4504_v56, %v4896_v6 }
 0x650   :  { %4368 = vmatmul.mubr.msk.f32.gmra.mxu1 %vm201_vm2, %v830_v57  ;;  %v822_v59 = vmul.f32 %v817_v32, %v813_v58 }
 0x651   :  { %4370 = vmatprep.mubr.msk.f32.mxu1 %vm6912_vm0, %v6903_v0 }
 0x652   :  { %v831_v60 = vadd.f32 %v826_v36, %v822_v59  ;;  %v1277_v36 = vunpack.c.0.s8 %v1276_v43 }
 0x654   :  { %4371 = vmatmul.mubr.msk.f32.gmra.mxu1 %vm201_vm2, %v831_v60  ;;  %v5024_v49 = vsub.s32 %v1277_v36, %v4631_v18 }
 0x655   :  { %4392 = vmatprep.mubr.msk.f32.mxu1 %vm6912_vm0, %v6903_v0 }
 0x704   :  { %v917_v1 = vpop.f32.mrf.mxu1 }
 0x705   :  { %v918_v31 = vadd.f32 %v917_v1, %v835_v10 }
 0x706   :  { %v4360_v2 = vpop.f32.mrf.mxu1 }
 0x708   :  { %v922_v3 = vpop.f32.mrf.mxu1 }
 0x709   :  { %v923_v20 = vadd.f32 %v922_v3, %v835_v10 }
 0x70a   :  { %v4363_v5 = vpop.f32.mrf.mxu1 }
 0x70b   :  { %v1027_v30 = vmul.f32 %v923_v20, %v923_v20 }
 0x70c   :  { %v927_v40 = vpop.f32.mrf.mxu1 }
 0x70d   :  { %v928_v25 = vadd.f32 %v927_v40, %v835_v10 }
 0x70e   :  { %v4366_v6 = vpop.f32.mrf.mxu1 }
 0x70f   :  { %v1028_v27 = vmul.f32 %v928_v25, %v928_v25 }
 0x710   :  { %v932_v7 = vpop.f32.mrf.mxu1 }
 0x711   :  { %v933_v15 = vadd.f32 %v932_v7, %v835_v10 }
 0x712   :  { %v4369_v8 = vpop.f32.mrf.mxu1 }
 0x713   :  { %v1029_v26 = vmul.f32 %v933_v15, %v933_v15 }
 0x714   :  { %v937_v11 = vpop.f32.mrf.mxu1 }
 0x715   :  { %v938_v12 = vadd.f32 %v937_v11, %v835_v10 }
 0x716   :  { %v4372_v13 = vpop.f32.mrf.mxu1 }
 0x717   :  { %v1030_v22 = vmul.f32 %v938_v12, %v938_v12  ;;  %4374 = vmatpush3.xpose.msk.msra.mxu0 %vm201_vm2, %v938_v12 }
 0x718   :  { %4375 = vmatprep.subr.mxu0 %v6903_v0 }
 0x719   :  { %4385 = vmatpush3.xpose.msk.msra.mxu1 %vm201_vm2, %v1030_v22 }
 0x71a   :  { %4386 = vmatprep.subr.mxu1 %v6903_v0 }
 0x71b   :  { %4376 = vmatpush3.xpose.msk.msra.mxu0 %vm201_vm2, %v933_v15 }
 0x71c   :  { %4377 = vmatprep.subr.mxu0 %v6903_v0 }
 0x71d   :  { %4387 = vmatpush3.xpose.msk.msra.mxu1 %vm201_vm2, %v1029_v26 }
 0x71e   :  { %4388 = vmatprep.subr.mxu1 %v6903_v0 }
 0x71f   :  { %4378 = vmatpush3.xpose.msk.msra.mxu0 %vm201_vm2, %v928_v25 }
 0x720   :  { %4379 = vmatprep.subr.mxu0 %v6903_v0 }
 0x721   :  { %4389 = vmatpush3.xpose.msk.msra.mxu1 %vm201_vm2, %v1028_v27 }
 0x722   :  { %4390 = vmatprep.subr.mxu1 %v6903_v0 }
 0x723   :  { %4380 = vmatpush3.xpose.msk.msra.mxu0 %vm201_vm2, %v923_v20 }
 0x724   :  { %4395 = vmatprep.subr.mxu0 %v6903_v0 }
 0x725   :  { %4391 = vmatpush3.xpose.msk.msra.mxu1 %vm201_vm2, %v1027_v30  ;;  %v4519_v30 = vmov 0  }
 0x726   :  { %4382 = vmatmul.mubr.msk.f32.vlgmr.msra.gmra.mxu0 %vm201_vm2, %v918_v31  ;;  %4418 = vmatprep.subr.mxu1 %v6903_v0 }
 0x727   :  { %4396 = vmatpush3.msra.mxu0 %v31_v33  ;;  %4403 = vmatprep.mubr.msk.f32.mxu0 %vm6912_vm0, %v6903_v0 }
 0x728   :  { %4393 = vmatmul.mubr.msk.f32.vlgmr.msra.gmra.mxu1 %vm201_vm2, %v4517_v35  ;;  %4397 = vmatprep.subr.mxu0 %v6903_v0 }
 0x729   :  { %4398 = vmatpush3.msra.mxu0 %v30_v34  ;;  %4434 = vmatprep.mubr.msk.f32.mxu1 %vm6912_vm0, %v6903_v0 }
 0x72a   :  { %4399 = vmatprep.subr.mxu0 %v6903_v0  ;;  %4484 = vset.pattern.permute.xlu1 %v4519_v30 }
 0x72b   :  { %4400 = vmatpush3.msra.mxu0 %v29_v37  ;;  %4483 = vset.pattern.permute.xlu0 %v4519_v30 }
 0x72c   :  { %4401 = vmatprep.subr.mxu0 %v6903_v0 }
 0x72d   :  { %4402 = vmatpush3.msra.mxu0 %v28_v39 }
 0x72e   :  { %4404 = vmatmul.mubr.msk.f32.vlgmr.msra.gmra.mxu0 %vm201_vm2, %v918_v31  ;;  %4437 = vmatprep.subr.mxu0 %v6903_v0 }
 0x72f   :  { %4406 = vmatprep.mubr.msk.f32.mxu0 %vm6912_vm0, %v6903_v0 }
 0x732   :  { %4407 = vmatmul.mubr.msk.f32.gmra.mxu0 %vm201_vm2, %v923_v20 }
 0x733   :  { %4409 = vmatprep.mubr.msk.f32.mxu0 %vm6912_vm0, %v6903_v0 }
 0x736   :  { %4410 = vmatmul.mubr.msk.f32.gmra.mxu0 %vm201_vm2, %v928_v25 }
 0x737   :  { %4412 = vmatprep.mubr.msk.f32.mxu0 %vm6912_vm0, %v6903_v0 }
 0x73a   :  { %4413 = vmatmul.mubr.msk.f32.gmra.mxu0 %vm201_vm2, %v933_v15 }
 0x73b   :  { %4415 = vmatprep.mubr.msk.f32.mxu0 %vm6912_vm0, %v6903_v0 }
 0x73e   :  { %4416 = vmatmul.mubr.msk.f32.gmra.mxu0 %vm201_vm2, %v938_v12 }
 0x73f   :  { %4445 = vmatprep.mubr.msk.f32.mxu0 %vm6912_vm0, %v6903_v0 }
 0x7e6   :  { %v1023_v32 = vpop.f32.mrf.mxu0 }
 0x7e7   :  { %v1116_v44 = vmul.f32 2.0, %v1023_v32 }
 0x7e8   :  { %v4383_v9 = vpop.f32.mrf.mxu0  ;;  %v1112_v45 = vpop.f32.mrf.mxu1 }
 0x7e9   :  { %v5015_v46 = vsub.f32 %v1116_v44, %v1112_v45 }
 0x7ea   :  { %v4394_v48 = vpop.f32.mrf.mxu1 }
 0x7eb   :  { %v5019_v14 = vrot.slane %v5015_v46, %v4634_v19  ;;  %v5029_v53 = vrot.slane %v5015_v46, %v4708_v62  ;;  %v5041_v59 = vrot.slane %v5015_v46, %v4804_v16  ;;  %v5063_v11 = vrot.slane %v5015_v46, %v4807_v24 }
 0x7ec   :  { %v5099_v41 = vrot.slane %v5015_v46, %v4863_v21 }
 0x7ed   :  { %1130 = vbcast.lane.b32.xlu1 %v5019_v14, 264  ;;  %1126 = vbcast.lane.b32.xlu0 %v5019_v14, 256 }
 0x7ee   :  { %v3265_v50 = vpop.f32.mrf.mxu0 }
 0x7ef   :  { %v3290_v42 = vcombine.high %v3265_v50, %v3265_v50  ;;  %v3297_v51 = vrot.slane %v3265_v50, %v5024_v49 }
 0x7f0   :  { %v4405_v23 = vpop.f32.mrf.mxu0 }
 0x7f1   :  { %v3304_v47 = vrot.slane %v3290_v42, %v5024_v49  ;;  %v3305_v52 = vcombine.high %v3297_v51, %v3297_v51  ;;  %v3313_v55 = vrot.slane %v3297_v51, %v5024_v49  ;;  %1145 = vbcast.lane.b32.xlu1 %v5029_v53, 256  ;;  %1134 = vbcast.lane.b32.xlu0 %v5019_v14, 272 }
 0x7f2   :  { %v5035_v54 = vpop.f32.mrf.mxu0 }
 0x7f3   :  { %7011 = vst [vmem:[#allocation10_spill] sm:$0xff] %v5035_v54  ;;  %v3306_v28 = vcombine.high %v3304_v47, %v3304_v47  ;;  %v3320_v56 = vrot.slane %v3304_v47, %v5024_v49  ;;  %v3327_v57 = vrot.slane %v3305_v52, %v5024_v49  ;;  %v3335_v2 = vcombine.high %v3313_v55, %v3313_v55 }
 0x7f4   :  { %v4408_v58 = vpop.f32.mrf.mxu0  ;;  %v5049_v5 = vrot.slane %v3313_v55, %v4634_v19  ;;  %v5134_v55 = vrot.slane %v5015_v46, %v4919_v38 }
 0x7f5   :  { %v3334_v60 = vrot.slane %v3306_v28, %v5024_v49  ;;  %1149 = vbcast.lane.b32.xlu1 %v5029_v53, 264  ;;  %1164 = vbcast.lane.b32.xlu0 %v5041_v59, 256  ;;  %v5052_v40 = vrot.slane %v3327_v57, %v4634_v19  ;;  %v3337_v7 = vcombine.high %v3327_v57, %v3327_v57 }
 0x7f6   :  { %v5046_v1 = vpop.f32.mrf.mxu0  ;;  %7013 = vst [vmem:[#allocation12_spill] sm:$0xff] %v5049_v5  ;;  %v5059_v8 = vrot.slane %v3335_v2, %v4634_v19  ;;  %v5090_v34 = vrot.slane %v3320_v56, %v4634_v19  ;;  %v3336_v39 = vcombine.high %v3320_v56, %v3320_v56  ;;  %v1346_v57 = vrot.slane %v4951_v63, %v5024_v49 }
 0x7f7   :  { %7012 = vst [vmem:[#allocation11_spill] sm:$0xff] %v5046_v1  ;;  %7014 = vst [vmem:[#allocation13_spill] sm:$0xff] %v5052_v40  ;;  %v5076_v25 = vrot.slane %v3337_v7, %v4634_v19  ;;  %v5104_v32 = vrot.slane %v3334_v60, %v4634_v19  ;;  %v3338_v36 = vcombine.high %v3334_v60, %v3334_v60 }
 0x7f8   :  { %v4411_v3 = vpop.f32.mrf.mxu0  ;;  %7016 = vst [vmem:[#allocation15_spill] sm:$0xff] %v5059_v8  ;;  %7019 = vst [vmem:[#allocation18_spill] sm:$0xff] %v5090_v34  ;;  %v5119_v42 = vrot.slane %v3336_v39, %v4634_v19  ;;  %v5168_v7 = vrot.slane %v5015_v46, %v4922_v4  ;;  %v5176_v39 = vrot.slane %v5015_v46, %v4958_v17 }
 0x7f9   :  { %1153 = vbcast.lane.b32.xlu1 %v5029_v53, 272  ;;  %1157 = vbcast.lane.b32.xlu0 %v5029_v53, 280  ;;  %7018 = vst [vmem:[#allocation17_spill] sm:$0xff] %v5076_v25  ;;  %7020 = vst [vmem:[#allocation19_spill] sm:$0xff] %v5104_v32  ;;  %v5130_v52 = vrot.slane %v3338_v36, %v4634_v19  ;;  %v1362_v51 = vrot.slane %v1346_v57, %v5024_v49 }
 0x7fa   :  { %v5056_v6 = vpop.f32.mrf.mxu0  ;;  %7021 = vst [vmem:[#allocation20_spill] sm:$0xff] %v5119_v42 }
 0x7fb   :  { %7015 = vst [vmem:[#allocation14_spill] sm:$0xff] %v5056_v6  ;;  %7022 = vst [vmem:[#allocation21_spill] sm:$0xff] %v5130_v52  ;;  %v1384_v37 = vcombine.high %v1362_v51, %v1362_v51 }
 0x7fc   :  { %v4414_v10 = vpop.f32.mrf.mxu0 }
 0x7fd   :  { %1168 = vbcast.lane.b32.xlu1 %v5041_v59, 264  ;;  %1183 = vbcast.lane.b32.xlu0 %v5063_v11, 256 }
 0x7fe   :  { %v5073_v22 = vpop.f32.mrf.mxu0 }
 0x7ff   :  { %7017 = vst [vmem:[#allocation16_spill] sm:$0xff] %v5073_v22 }
 0x800   :  { %v4417_v26 = vpop.f32.mrf.mxu0 }
 0x801   :  { %1138 = vbcast.lane.b32.xlu1 %v5019_v14, 280  ;;  %1191 = vbcast.lane.b32.xlu0 %v5063_v11, 272 }
 0x805   :  { %1172 = vbcast.lane.b32.xlu1 %v5041_v59, 272  ;;  %1206 = vbcast.lane.b32.xlu0 %v5099_v41, 264 }
 0x809   :  { %1187 = vbcast.lane.b32.xlu1 %v5063_v11, 264  ;;  %1210 = vbcast.lane.b32.xlu0 %v5099_v41, 272 }
 0x80d   :  { %1176 = vbcast.lane.b32.xlu1 %v5041_v59, 280  ;;  %1225 = vbcast.lane.b32.xlu0 %v5134_v55, 264 }
 0x811   :  { %1202 = vbcast.lane.b32.xlu1 %v5099_v41, 256  ;;  %1229 = vbcast.lane.b32.xlu0 %v5134_v55, 272 }
 0x815   :  { %1195 = vbcast.lane.b32.xlu1 %v5063_v11, 280  ;;  %1244 = vbcast.lane.b32.xlu0 %v5168_v7, 264 }
 0x819   :  { %1221 = vbcast.lane.b32.xlu1 %v5134_v55, 256  ;;  %1248 = vbcast.lane.b32.xlu0 %v5168_v7, 272 }
 0x81d   :  { %1214 = vbcast.lane.b32.xlu1 %v5099_v41, 280  ;;  %1263 = vbcast.lane.b32.xlu0 %v5176_v39, 264 }
 0x821   :  { %1240 = vbcast.lane.b32.xlu1 %v5168_v7, 256  ;;  %1267 = vbcast.lane.b32.xlu0 %v5176_v39, 272 }
 0x825   :  { %1233 = vbcast.lane.b32.xlu1 %v5134_v55, 280  ;;  %1825 = vbcast.lane.b32.xlu0 %v5019_v14, 256 }
 0x829   :  { %1259 = vbcast.lane.b32.xlu1 %v5176_v39, 256  ;;  %1833 = vbcast.lane.b32.xlu0 %v5019_v14, 272 }
 0x82d   :  { %1252 = vbcast.lane.b32.xlu1 %v5168_v7, 280  ;;  %1863 = vbcast.lane.b32.xlu0 %v5041_v59, 256 }
 0x831   :  { %1271 = vbcast.lane.b32.xlu1 %v5176_v39, 280  ;;  %1837 = vbcast.lane.b32.xlu0 %v5019_v14, 280 }
 0x835   :  { %1829 = vbcast.lane.b32.xlu1 %v5019_v14, 264  ;;  %1871 = vbcast.lane.b32.xlu0 %v5041_v59, 272  ;;  %v5203_v14 = vpop.permute.xlu0 %1324 }
 0x839   :  { %1844 = vbcast.lane.b32.xlu1 %v5029_v53, 256  ;;  %1886 = vbcast.lane.b32.xlu0 %v5063_v11, 264  ;;  %v5208_v3 = vpop.permute.xlu0 %1332 }
 0x83d   :  { %1848 = vbcast.lane.b32.xlu1 %v5029_v53, 264  ;;  %1890 = vbcast.lane.b32.xlu0 %v5063_v11, 272  ;;  %v5215_v36 = vpop.permute.xlu0 %1336 }
 0x841   :  { %1852 = vbcast.lane.b32.xlu1 %v5029_v53, 272  ;;  %1905 = vbcast.lane.b32.xlu0 %v5099_v41, 264 }
 0x845   :  { %1867 = vbcast.lane.b32.xlu1 %v5041_v59, 264  ;;  %1909 = vbcast.lane.b32.xlu0 %v5099_v41, 272 }
 0x849   :  { %1856 = vbcast.lane.b32.xlu1 %v5029_v53, 280  ;;  %1924 = vbcast.lane.b32.xlu0 %v5134_v55, 264  ;;  %v5213_v53 = vpop.permute.xlu1 %1328 }
 0x84d   :  { %1882 = vbcast.lane.b32.xlu1 %v5063_v11, 256  ;;  %1928 = vbcast.lane.b32.xlu0 %v5134_v55, 272 }
 0x851   :  { %1875 = vbcast.lane.b32.xlu1 %v5041_v59, 280  ;;  %1943 = vbcast.lane.b32.xlu0 %v5168_v7, 264 }
 0x855   :  { %1901 = vbcast.lane.b32.xlu1 %v5099_v41, 256  ;;  %1947 = vbcast.lane.b32.xlu0 %v5168_v7, 272 }
 0x859   :  { %1894 = vbcast.lane.b32.xlu1 %v5063_v11, 280  ;;  %1962 = vbcast.lane.b32.xlu0 %v5176_v39, 264  ;;  %v1281_v11 = vrot.slane %v5015_v46, %v5024_v49 }
 0x85b   :  { %v1297_v56 = vrot.slane %v1281_v11, %v5024_v49  ;;  %v1289_v28 = vcombine.high %v1281_v11, %v1281_v11 }
 0x85d   :  { %1920 = vbcast.lane.b32.xlu1 %v5134_v55, 256  ;;  %1966 = vbcast.lane.b32.xlu0 %v5176_v39, 272  ;;  %v5239_v50 = vrot.slane %v1297_v56, %v4634_v19  ;;  %v5242_v48 = vrot.slane %v1289_v28, %v5024_v49  ;;  %v1319_v43 = vcombine.high %v1297_v56, %v1297_v56 }
 0x85f   :  { %v5220_v59 = vpop.permute.xlu1 %1130  ;;  %v1127_v26 = vpop.permute.xlu0 %1126  ;;  %v1321_v33 = vcombine.high %v5242_v48, %v5242_v48 }
 0x860   :  { %vm1460_vm4 = vcmp.eq.f32.partialorder %v5239_v50, %v1127_v26  ;;  %vm1428_vm6 = vcmp.gt.f32.partialorder %v5239_v50, %v1127_v26 }
 0x861   :  { %1913 = vbcast.lane.b32.xlu1 %v5099_v41, 280  ;;  %v1354_v41 = vcombine.high %v1346_v57, %v1346_v57  ;;  %v5256_v57 = vrot.slane %v5242_v48, %v4634_v19  ;;  %v1339_v48 = vcombine.high %v4951_v63, %v4951_v63  ;;  %v5334_v27 = vrot.slane %v1321_v33, %v4634_v19 }
 0x863   :  { %v1146_v10 = vpop.permute.xlu1 %1145  ;;  %v1135_v2 = vpop.permute.xlu0 %1134  ;;  %v1376_v11 = vrot.slane %v1354_v41, %v5024_v49  ;;  %v1353_v33 = vrot.slane %v1339_v48, %v5024_v49 }
 0x864   :  { %vm1464_vm8 = vcmp.eq.f32.partialorder %v5256_v57, %v1146_v10  ;;  %vm1432_vm11 = vcmp.gt.f32.partialorder %v5256_v57, %v1146_v10 }
 0x865   :  { %1939 = vbcast.lane.b32.xlu1 %v5168_v7, 256  ;;  %v5259_v28 = vrot.slane %v1376_v11, %v4634_v19 }
 0x867   :  { %v1150_v60 = vpop.permute.xlu1 %1149  ;;  %v5226_v58 = vpop.permute.xlu0 %1164  ;;  %vm1536_vm9 = vcmp.lt.f32.partialorder %v5259_v28, %v5203_v14  ;;  %vm1537_vm15 = vcmp.lt.f32.partialorder %v5259_v28, %v5213_v53 }
 0x868   :  { %vm1568_vm12 = vmand %vm1464_vm8, %vm1536_vm9  ;;  %vm1465_vm13 = vcmp.eq.f32.partialorder %v5256_v57, %v1150_v60  ;;  %vm1433_vm1 = vcmp.gt.f32.partialorder %v5256_v57, %v1150_v60  ;;  %v5293_v60 = vrot.slane %v1384_v37, %v4634_v19  ;;  %vm1430_vm8 = vcmp.gt.f32.partialorder %v5239_v50, %v1135_v2 }
 0x869   :  { %1932 = vbcast.lane.b32.xlu1 %v5134_v55, 280  ;;  %v5245_v55 = vrot.slane %v1362_v51, %v4634_v19  ;;  %vm1600_vm14 = vmor %vm1432_vm11, %vm1568_vm12  ;;  %v5288_v51 = vrot.slane %v1319_v43, %v4634_v19 }
 0x86a   :  { %v4077_v56 = vsel %vm1600_vm14, 1.0, %v6903_v0  ;;  %vm1540_vm11 = vcmp.lt.f32.partialorder %v5293_v60, %v5203_v14 }
 0x86b   :  { %v5232_v47 = vpop.permute.xlu1 %1153  ;;  %v5234_v23 = vpop.permute.xlu0 %1157  ;;  %vm1532_vm5 = vcmp.lt.f32.partialorder %v5245_v55, %v5203_v14 }
 0x86c   :  { %vm1564_vm7 = vmand %vm1460_vm4, %vm1532_vm5  ;;  %vm1462_vm5 = vcmp.eq.f32.partialorder %v5239_v50, %v1135_v2 }
 0x86d   :  { %1958 = vbcast.lane.b32.xlu1 %v5176_v39, 256  ;;  %vm1596_vm10 = vmor %vm1428_vm6, %vm1564_vm7  ;;  %vm1534_vm6 = vcmp.lt.f32.partialorder %v5245_v55, %v5208_v3 }
 0x86e   :  { %v4073_v26 = vsel %vm1596_vm10, 1.0, %v6903_v0  ;;  %vm1569_vm4 = vmand %vm1465_vm13, %vm1537_vm15  ;;  %vm1468_vm10 = vcmp.eq.f32.partialorder %v5288_v51, %v5226_v58  ;;  %vm1436_vm13 = vcmp.gt.f32.partialorder %v5288_v51, %v5226_v58  ;;  %v1274_v58 = vcombine.high %v5015_v46, %v5015_v46 }
 0x86f   :  { %v5247_v45 = vpop.permute.xlu1 %1168  ;;  %v5261_v9 = vpop.permute.xlu0 %1183  ;;  %v1692_v10 = vsel %vm201_vm2, %v4073_v26, 0.0  ;;  %vm1601_vm7 = vmor %vm1433_vm1, %vm1569_vm4  ;;  %v1704_v26 = vsel %vm201_vm2, %v4077_v56, 0.0  ;;  %vm1535_vm1 = vcmp.lt.f32.partialorder %v5245_v55, %v5215_v36  ;;  %v1386_v56 = vcombine.high %v1376_v11, %v1376_v11 }
 0x870   :  { %vm1566_vm9 = vmand %vm1462_vm5, %vm1534_vm6  ;;  %v4078_v43 = vsel %vm1601_vm7, 1.0, %v6903_v0  ;;  %v1288_v20 = vrot.slane %v1274_v58, %v5024_v49 }
 0x871   :  { %1951 = vbcast.lane.b32.xlu1 %v5168_v7, 280  ;;  %vm1598_vm12 = vmor %vm1430_vm8, %vm1566_vm9  ;;  %v1707_v2 = vsel %vm201_vm2, %v4078_v43, 0.0  ;;  %vm1461_vm8 = vcmp.eq.f32.partialorder %v5239_v50, %v5220_v59 }
 0x872   :  { %vm1572_vm14 = vmand %vm1468_vm10, %vm1540_vm11  ;;  %vm1542_vm10 = vcmp.lt.f32.partialorder %v5293_v60, %v5208_v3  ;;  %v1290_v48 = vcombine.high %v1288_v20, %v1288_v20 }
 0x873   :  { %v5263_v44 = vpop.permute.xlu1 %1138  ;;  %v5274_v41 = vpop.permute.xlu0 %1191  ;;  %vm1604_vm4 = vmor %vm1436_vm13, %vm1572_vm14  ;;  %vm1533_vm14 = vcmp.lt.f32.partialorder %v5245_v55, %v5213_v53  ;;  %v5373_v55 = vrot.slane %v1353_v33, %v5024_v49 }
 0x874   :  { %vm1463_vm15 = vcmp.eq.f32.partialorder %v5239_v50, %v5263_v44  ;;  %vm1431_vm5 = vcmp.gt.f32.partialorder %v5239_v50, %v5263_v44  ;;  %v4081_v31 = vsel %vm1604_vm4, 1.0, %v6903_v0  ;;  %vm1466_vm4 = vcmp.eq.f32.partialorder %v5256_v57, %v5232_v47 }
 0x875   :  { %1970 = vbcast.lane.b32.xlu1 %v5176_v39, 280  ;;  %vm1567_vm6 = vmand %vm1463_vm15, %vm1535_vm1  ;;  %v1716_v63 = vsel %vm201_vm2, %v4081_v31, 0.0  ;;  %vm1429_vm15 = vcmp.gt.f32.partialorder %v5239_v50, %v5220_v59  ;;  %v5364_v31 = vrot.slane %v1288_v20, %v5024_v49 }
 0x876   :  { %vm1599_vm9 = vmor %vm1431_vm5, %vm1567_vm6 }
 0x877   :  { %v5270_v7 = vpop.permute.xlu1 %1172  ;;  %v5290_v35 = vpop.permute.xlu0 %1206  ;;  %v4076_v30 = vsel %vm1599_vm9, 1.0, %v6903_v0  ;;  %vm1565_vm1 = vmand %vm1461_vm8, %vm1533_vm14  ;;  %vm1469_vm14 = vcmp.eq.f32.partialorder %v5288_v51, %v5247_v45 }
 0x878   :  { %vm1470_vm7 = vcmp.eq.f32.partialorder %v5288_v51, %v5270_v7  ;;  %vm1438_vm11 = vcmp.gt.f32.partialorder %v5288_v51, %v5270_v7  ;;  %v1701_v59 = vsel %vm201_vm2, %v4076_v30, 0.0 }
 0x87b   :  { %v5281_v39 = vpop.permute.xlu1 %1187  ;;  %v5308_v37 = vpop.permute.xlu0 %1210 }
 0x87c   :  { %1693 = vadd.xlane.f32.xlu0 %v1692_v10  ;;  %vm1473_vm13 = vcmp.eq.f32.partialorder %v5334_v27, %v5281_v39  ;;  %vm1441_vm8 = vcmp.gt.f32.partialorder %v5334_v27, %v5281_v39 }
 0x87f   :  { %v5302_v10 = vpop.permute.xlu1 %1176 }
 0x880   :  { %1705 = vadd.xlane.f32.xlu0 %v1704_v26  ;;  %v4075_v26 = vsel %vm1598_vm12, 1.0, %v6903_v0  ;;  %vm1574_vm12 = vmand %vm1470_vm7, %vm1542_vm10  ;;  %vm1538_vm7 = vcmp.lt.f32.partialorder %v5259_v28, %v5208_v3  ;;  %vm1474_vm10 = vcmp.eq.f32.partialorder %v5334_v27, %v5274_v41 }
 0x881   :  { %v1698_v11 = vsel %vm201_vm2, %v4075_v26, 0.0  ;;  %v5337_v26 = vpop.permute.xlu0 %1225  ;;  %vm1606_vm6 = vmor %vm1438_vm11, %vm1574_vm12  ;;  %vm1434_vm12 = vcmp.gt.f32.partialorder %v5256_v57, %v5232_v47 }
 0x882   :  { %vm5385_vm11 = vmor %vm1429_vm15, %vm1565_vm1  ;;  %v4083_v58 = vsel %vm1606_vm6, 1.0, %v6903_v0 }
 0x883   :  { %v5322_v43 = vpop.permute.xlu1 %1202  ;;  %v1722_v20 = vsel %vm201_vm2, %v4083_v58, 0.0 }
 0x884   :  { %1708 = vadd.xlane.f32.xlu0 %v1707_v2  ;;  %v5326_v2 = vrot.slane %v1386_v56, %v4634_v19  ;;  %v5391_v56 = vrot.slane %v5373_v55, %v4634_v19 }
 0x885   :  { %v5382_v50 = vpop.permute.xlu0 %1229 }
 0x886   :  { %vm1545_vm5 = vcmp.lt.f32.partialorder %v5326_v2, %v5213_v53  ;;  %vm1546_vm15 = vcmp.lt.f32.partialorder %v5326_v2, %v5208_v3 }
 0x887   :  { %v5368_v44 = vpop.permute.xlu1 %1195  ;;  %vm1577_vm9 = vmand %vm1473_vm13, %vm1545_vm5  ;;  %vm1442_vm5 = vcmp.gt.f32.partialorder %v5334_v27, %v5274_v41 }
 0x888   :  { %1699 = vadd.xlane.f32.xlu0 %v1698_v11  ;;  %vm1570_vm13 = vmand %vm1466_vm4, %vm1538_vm7  ;;  %v5405_v11 = vrot.slane %v5364_v31, %v4634_v19 }
 0x889   :  { %vm1609_vm1 = vmor %vm1441_vm8, %vm1577_vm9  ;;  %vm1541_vm8 = vcmp.lt.f32.partialorder %v5293_v60, %v5213_v53  ;;  %vm1539_vm9 = vcmp.lt.f32.partialorder %v5259_v28, %v5215_v36  ;;  %v5448_v28 = vrot.slane %v1290_v48, %v5024_v49 }
 0x88a   :  { %vm5415_vm4 = vmand %vm1474_vm10, %vm1546_vm15  ;;  %vm1477_vm6 = vcmp.eq.f32.partialorder %v5405_v11, %v5290_v35  ;;  %vm1467_vm10 = vcmp.eq.f32.partialorder %v5256_v57, %v5234_v23  ;;  %vm1445_vm15 = vcmp.gt.f32.partialorder %v5405_v11, %v5290_v35 }
 0x88b   :  { %v5421_v30 = vpop.permute.xlu1 %1221  ;;  %vm5424_vm7 = vmor %vm1434_vm12, %vm1570_vm13  ;;  %vm1549_vm13 = vcmp.lt.f32.partialorder %v5391_v56, %v5213_v53 }
 0x88c   :  { %1717 = vadd.xlane.f32.xlu0 %v1716_v63  ;;  %v1355_v63 = vcombine.high %v1353_v33, %v1353_v33  ;;  %v4086_v33 = vsel %vm1609_vm1, 1.0, %v6903_v0  ;;  %vm5441_vm12 = vmand %vm1469_vm14, %vm1541_vm8  ;;  %vm1437_vm14 = vcmp.gt.f32.partialorder %v5288_v51, %v5247_v45  ;;  %v4079_v13 = vsel %vm5424_vm7, 1.0, %v6903_v0 }
 0x88d   :  { %vm5464_vm1 = vmand %vm1477_vm6, %vm1549_vm13  ;;  %v1731_v45 = vsel %vm201_vm2, %v4086_v33, 0.0  ;;  %v1710_v7 = vsel %vm201_vm2, %v4079_v13, 0.0 }
 0x88e   :  { %vm5468_vm8 = vmand %vm1467_vm10, %vm1539_vm9  ;;  %v5475_v41 = vrot.slane %v1355_v63, %v5024_v49  ;;  %vm1472_vm9 = vcmp.eq.f32.partialorder %v5334_v27, %v5261_v9  ;;  %vm1550_vm10 = vcmp.lt.f32.partialorder %v5391_v56, %v5208_v3  ;;  %v5497_v63 = vrot.slane %v5448_v28, %v4634_v19 }
 0x88f   :  { %vm5487_vm6 = vmor %vm1437_vm14, %vm5441_vm12  ;;  %v5503_v33 = vpop.permute.xlu1 %1214  ;;  %vm1446_vm12 = vcmp.gt.f32.partialorder %v5405_v11, %v5308_v37 }
 0x890   :  { %1702 = vadd.xlane.f32.xlu0 %v1701_v59  ;;  %v4074_v59 = vsel %vm5385_vm11, 1.0, %v6903_v0  ;;  %vm1610_vm11 = vmor %vm1442_vm5, %vm5415_vm4  ;;  %vm1478_vm5 = vcmp.eq.f32.partialorder %v5405_v11, %v5308_v37  ;;  %vm1435_vm4 = vcmp.gt.f32.partialorder %v5256_v57, %v5234_v23  ;;  %v5501_v39 = vrot.slane %v5475_v41, %v4634_v19 }
 0x891   :  { %v1695_v47 = vsel %vm201_vm2, %v4074_v59, 0.0  ;;  %v4087_v15 = vsel %vm1610_vm11, 1.0, %v6903_v0  ;;  %vm1613_vm7 = vmor %vm1445_vm15, %vm5464_vm1  ;;  %vm1544_vm11 = vcmp.lt.f32.partialorder %v5326_v2, %v5203_v14  ;;  %vm1481_vm14 = vcmp.eq.f32.partialorder %v5497_v63, %v5337_v26 }
 0x892   :  { %vm5515_vm13 = vmand %vm1478_vm5, %vm1550_vm10  ;;  %v1734_v35 = vsel %vm201_vm2, %v4087_v15, 0.0  ;;  %vm1440_vm1 = vcmp.gt.f32.partialorder %v5334_v27, %v5261_v9  ;;  %v4090_v13 = vsel %vm1613_vm7, 1.0, %v6903_v0  ;;  %v4082_v15 = vsel %vm5487_vm6, 1.0, %v6903_v0 }
 0x893   :  { %vm5532_vm15 = vmor %vm1435_vm4, %vm5468_vm8  ;;  %vm1471_vm8 = vcmp.eq.f32.partialorder %v5288_v51, %v5302_v10  ;;  %vm1553_vm4 = vcmp.lt.f32.partialorder %v5501_v39, %v5213_v53  ;;  %v1320_v23 = vcombine.high %v5364_v31, %v5364_v31  ;;  %v1385_v57 = vcombine.high %v5373_v55, %v5373_v55  ;;  %v5575_v31 = vpop.permute.xlu1 %1240 }
 0x894   :  { %1723 = vadd.xlane.f32.xlu0 %v1722_v20  ;;  %v5450_v20 = vpop.permute.xlu0 %1244  ;;  %vm5541_vm5 = vmand %vm1472_vm9, %vm1544_vm11  ;;  %vm1449_vm6 = vcmp.gt.f32.partialorder %v5497_v63, %v5337_v26  ;;  %vm1543_vm7 = vcmp.lt.f32.partialorder %v5293_v60, %v5215_v36  ;;  %vm1482_vm11 = vcmp.eq.f32.partialorder %v5497_v63, %v5382_v50  ;;  %v1743_v37 = vsel %vm201_vm2, %v4090_v13, 0.0 }
 0x895   :  { %vm1614_vm9 = vmor %vm1446_vm12, %vm5515_vm13  ;;  %v1719_v55 = vsel %vm201_vm2, %v4082_v15, 0.0  ;;  %vm1439_vm13 = vcmp.gt.f32.partialorder %v5288_v51, %v5302_v10  ;;  %v5603_v9 = vrot.slane %v1320_v23, %v4634_v19  ;;  %v1322_v51 = vcombine.high %v5448_v28, %v5448_v28 }
 0x896   :  { %vm5567_vm10 = vmand %vm1481_vm14, %vm1553_vm4  ;;  %v4091_v59 = vsel %vm1614_vm9, 1.0, %v6903_v0  ;;  %vm1548_vm9 = vcmp.lt.f32.partialorder %v5391_v56, %v5203_v14  ;;  %v1387_v10 = vcombine.high %v5475_v41, %v5475_v41 }
 0x897   :  { %vm5584_vm12 = vmor %vm1440_vm1, %vm5541_vm5  ;;  %vm1476_vm1 = vcmp.eq.f32.partialorder %v5405_v11, %v5322_v43  ;;  %vm1554_vm5 = vcmp.lt.f32.partialorder %v5501_v39, %v5208_v3  ;;  %v1746_v13 = vsel %vm201_vm2, %v4091_v59, 0.0  ;;  %v5706_v59 = vrot.slane %v1322_v51, %v4634_v19 }
 0x898   :  { %1732 = vadd.xlane.f32.xlu0 %v1731_v45  ;;  %v5523_v58 = vpop.permute.xlu0 %1248  ;;  %vm5590_vm14 = vmand %vm1471_vm8, %vm1543_vm7  ;;  %vm1450_vm8 = vcmp.gt.f32.partialorder %v5497_v63, %v5382_v50  ;;  %vm1485_vm7 = vcmp.eq.f32.partialorder %v5603_v9, %v5450_v20  ;;  %v4085_v48 = vsel %vm5584_vm12, 1.0, %v6903_v0 }
 0x899   :  { %1696 = vadd.xlane.f32.xlu1 %v1695_v47  ;;  %vm5620_vm4 = vmand %vm1482_vm11, %vm1554_vm5  ;;  %v1728_v41 = vsel %vm201_vm2, %v4085_v48, 0.0 }
 0x89a   :  { %vm5641_vm11 = vmand %vm1476_vm1, %vm1548_vm9  ;;  %vm1453_vm1 = vcmp.gt.f32.partialorder %v5603_v9, %v5450_v20  ;;  %vm1486_vm9 = vcmp.eq.f32.partialorder %v5603_v9, %v5523_v58 }
 0x89b   :  { %vm1618_vm12 = vmor %vm1450_vm8, %vm5620_vm4  ;;  %vm1443_vm4 = vcmp.gt.f32.partialorder %v5334_v27, %v5368_v44 }
 0x89c   :  { %1735 = vadd.xlane.f32.xlu0 %v1734_v35  ;;  %v4080_v35 = vsel %vm5532_vm15, 1.0, %v6903_v0  ;;  %v5608_v47 = vpop.permute.xlu0 %1263  ;;  %vm1617_vm15 = vmor %vm1449_vm6, %vm5567_vm10  ;;  %vm1444_vm10 = vcmp.gt.f32.partialorder %v5405_v11, %v5322_v43  ;;  %v4095_v60 = vsel %vm1618_vm12, 1.0, %v6903_v0  ;;  %vm1552_vm12 = vcmp.lt.f32.partialorder %v5501_v39, %v5203_v14 }
 0x89d   :  { %1711 = vadd.xlane.f32.xlu1 %v1710_v7  ;;  %v5606_v7 = vrot.slane %v1385_v57, %v4634_v19  ;;  %v1713_v26 = vsel %vm201_vm2, %v4080_v35, 0.0  ;;  %vm5635_vm6 = vmor %vm1439_vm13, %vm5590_vm14  ;;  %v4094_v57 = vsel %vm1617_vm15, 1.0, %v6903_v0  ;;  %vm1475_vm13 = vcmp.eq.f32.partialorder %v5334_v27, %v5368_v44 }
 0x89e   :  { %vm1547_vm15 = vcmp.lt.f32.partialorder %v5326_v2, %v5215_v36  ;;  %v1755_v50 = vsel %vm201_vm2, %v4094_v57, 0.0  ;;  %vm5684_vm8 = vmor %vm1444_vm10, %vm5641_vm11  ;;  %v4084_v43 = vsel %vm5635_vm6, 1.0, %v6903_v0  ;;  %vm1480_vm10 = vcmp.eq.f32.partialorder %v5497_v63, %v5421_v30 }
 0x89f   :  { %vm1557_vm14 = vcmp.lt.f32.partialorder %v5606_v7, %v5213_v53  ;;  %vm1558_vm11 = vcmp.lt.f32.partialorder %v5606_v7, %v5208_v3  ;;  %v5709_v35 = vrot.slane %v1387_v10, %v4634_v19  ;;  %vm1454_vm6 = vcmp.gt.f32.partialorder %v5603_v9, %v5523_v58 }
 0x8a0   :  { %1744 = vadd.xlane.f32.xlu0 %v1743_v37  ;;  %v5657_v37 = vpop.permute.xlu1 %1233  ;;  %vm5669_vm5 = vmand %vm1485_vm7, %vm1557_vm14  ;;  %v1268_v28 = vpop.permute.xlu0 %1267  ;;  %v1758_v20 = vsel %vm201_vm2, %v4095_v60, 0.0  ;;  %v4089_v48 = vsel %vm5684_vm8, 1.0, %v6903_v0 }
 0x8a1   :  { %1720 = vadd.xlane.f32.xlu1 %v1719_v55  ;;  %vm5693_vm7 = vmand %vm1475_vm13, %vm1547_vm15  ;;  %vm1489_vm15 = vcmp.eq.f32.partialorder %v5706_v59, %v5608_v47  ;;  %v1740_v44 = vsel %vm201_vm2, %v4089_v48, 0.0 }
 0x8a2   :  { %vm1621_vm13 = vmor %vm1453_vm1, %vm5669_vm5  ;;  %vm1448_vm5 = vcmp.gt.f32.partialorder %v5497_v63, %v5421_v30 }
 0x8a3   :  { %vm5721_vm14 = vmand %vm1486_vm9, %vm1558_vm11  ;;  %v4098_v57 = vsel %vm1621_vm13, 1.0, %v6903_v0  ;;  %vm1457_vm11 = vcmp.gt.f32.partialorder %v5706_v59, %v5608_v47  ;;  %vm1551_vm13 = vcmp.lt.f32.partialorder %v5391_v56, %v5215_v36 }
 0x8a4   :  { %1747 = vadd.xlane.f32.xlu0 %v1746_v13  ;;  %v5729_v13 = vpop.permute.xlu1 %1259  ;;  %vm5738_vm1 = vmor %vm1443_vm4, %vm5693_vm7  ;;  %vm1479_vm4 = vcmp.eq.f32.partialorder %v5405_v11, %v5503_v33  ;;  %vm1561_vm7 = vcmp.lt.f32.partialorder %v5709_v35, %v5213_v53  ;;  %v5756_v27 = vpop.permute.xlu0 %1825  ;;  %v1767_v53 = vsel %vm201_vm2, %v4098_v57, 0.0 }
 0x8a5   :  { %1714 = vadd.xlane.f32.xlu1 %v1713_v26  ;;  %v1725_v26 = vsel %vm201_vm2, %v4084_v43, 0.0  ;;  %vm5744_vm9 = vmand %vm1480_vm10, %vm1552_vm12  ;;  %vm1490_vm12 = vcmp.eq.f32.partialorder %v5706_v59, %v1268_v28  ;;  %v4088_v10 = vsel %vm5738_vm1, 1.0, %v6903_v0 }
 0x8a6   :  { %vm1622_vm10 = vmor %vm1454_vm6, %vm5721_vm14 }
 0x8a7   :  { %vm1593_vm8 = vmand %vm1489_vm15, %vm1561_vm7  ;;  %v4099_v56 = vsel %vm1622_vm10, 1.0, %v6903_v0  ;;  %vm1447_vm15 = vcmp.gt.f32.partialorder %v5405_v11, %v5503_v33  ;;  %vm1484_vm10 = vcmp.eq.f32.partialorder %v5603_v9, %v5575_v31  ;;  %v1737_v11 = vsel %vm201_vm2, %v4088_v10, 0.0 }
 0x8a8   :  { %1756 = vadd.xlane.f32.xlu0 %v1755_v50  ;;  %vm5778_vm6 = vmor %vm1448_vm5, %vm5744_vm9  ;;  %vm1562_vm5 = vcmp.lt.f32.partialorder %v5709_v35, %v5208_v3  ;;  %v1253_v30 = vpop.permute.xlu1 %1252  ;;  %v5800_v55 = vpop.permute.xlu0 %1833  ;;  %v1770_v50 = vsel %vm201_vm2, %v4099_v56, 0.0 }
 0x8a9   :  { %1729 = vadd.xlane.f32.xlu1 %v1728_v41  ;;  %vm5782_vm14 = vmand %vm1479_vm4, %vm1551_vm13  ;;  %vm1458_vm4 = vcmp.gt.f32.partialorder %v5706_v59, %v1268_v28  ;;  %v4093_v33 = vsel %vm5778_vm6, 1.0, %v6903_v0  ;;  %vm1452_vm13 = vcmp.gt.f32.partialorder %v5603_v9, %v5575_v31  ;;  %vm1555_vm6 = vcmp.lt.f32.partialorder %v5501_v39, %v5215_v36 }
 0x8aa   :  { %vm1625_vm9 = vmor %vm1457_vm11, %vm1593_vm8  ;;  %vm1556_vm11 = vcmp.lt.f32.partialorder %v5606_v7, %v5203_v14  ;;  %v1752_v41 = vsel %vm201_vm2, %v4093_v33, 0.0 }
 0x8ab   :  { %vm1594_vm7 = vmand %vm1490_vm12, %vm1562_vm5  ;;  %v4102_v3 = vsel %vm1625_vm9, 1.0, %v6903_v0  ;;  %vm1483_vm5 = vcmp.eq.f32.partialorder %v5497_v63, %v5657_v37 }
 0x8ac   :  { %1759 = vadd.xlane.f32.xlu0 %v1758_v20  ;;  %vm1615_vm1 = vmor %vm1447_vm15, %vm5782_vm14  ;;  %v1272_v47 = vpop.permute.xlu1 %1271  ;;  %v1779_v28 = vsel %vm201_vm2, %v4102_v3, 0.0  ;;  %v5822_v60 = vpop.permute.xlu0 %1863  ;;  %vm1451_vm15 = vcmp.gt.f32.partialorder %v5497_v63, %v5657_v37 }
 0x8ad   :  { %1726 = vadd.xlane.f32.xlu1 %v1725_v26  ;;  %vm1626_vm8 = vmor %vm1458_vm4, %vm1594_vm7  ;;  %v4092_v2 = vsel %vm1615_vm1, 1.0, %v6903_v0  ;;  %vm1488_vm4 = vcmp.eq.f32.partialorder %v5706_v59, %v5729_v13  ;;  %vm1560_vm7 = vcmp.lt.f32.partialorder %v5709_v35, %v5203_v14  ;;  %vm1456_vm1 = vcmp.gt.f32.partialorder %v5706_v59, %v5729_v13 }
 0x8ae   :  { %vm1588_vm12 = vmand %vm1484_vm10, %vm1556_vm11  ;;  %v4103_v49 = vsel %vm1626_vm8, 1.0, %v6903_v0  ;;  %v1749_v43 = vsel %vm201_vm2, %v4092_v2, 0.0  ;;  %vm1487_vm8 = vcmp.eq.f32.partialorder %v5603_v9, %v1253_v30 }
 0x8af   :  { %vm1620_vm14 = vmor %vm1452_vm13, %vm1588_vm12  ;;  %v1782_v31 = vsel %vm201_vm2, %v4103_v49, 0.0  ;;  %vm1559_vm13 = vcmp.lt.f32.partialorder %v5606_v7, %v5215_v36 }
 0x8b0   :  { %1768 = vadd.xlane.f32.xlu0 %v1767_v53  ;;  %vm1587_vm9 = vmand %vm1483_vm5, %vm1555_vm6  ;;  %v4097_v45 = vsel %vm1620_vm14, 1.0, %v6903_v0  ;;  %v5833_v39 = vpop.permute.xlu1 %1829  ;;  %v5838_v63 = vpop.permute.xlu0 %1837  ;;  %vm1455_vm5 = vcmp.gt.f32.partialorder %v5603_v9, %v1253_v30  ;;  %vm1491_vm14 = vcmp.eq.f32.partialorder %v5706_v59, %v1272_v47 }
 0x8b1   :  { %1741 = vadd.xlane.f32.xlu1 %v1740_v44  ;;  %vm1619_vm10 = vmor %vm1451_vm15, %vm1587_vm9  ;;  %v1764_v37 = vsel %vm201_vm2, %v4097_v45, 0.0  ;;  %vm1563_vm15 = vcmp.lt.f32.partialorder %v5709_v35, %v5215_v36 }
 0x8b2   :  { %vm1592_vm11 = vmand %vm1488_vm4, %vm1560_vm7  ;;  %v4096_v20 = vsel %vm1619_vm10, 1.0, %v6903_v0  ;;  %vm1459_vm4 = vcmp.gt.f32.partialorder %v5706_v59, %v1272_v47 }
 0x8b3   :  { %vm1624_vm12 = vmor %vm1456_vm1, %vm1592_vm11  ;;  %v1761_v13 = vsel %vm201_vm2, %v4096_v20, 0.0 }
 0x8b4   :  { %1771 = vadd.xlane.f32.xlu0 %v1770_v50  ;;  %vm1591_vm6 = vmand %vm1487_vm8, %vm1559_vm13  ;;  %v5846_v14 = vpop.permute.xlu1 %1844  ;;  %v4101_v26 = vsel %vm1624_vm12, 1.0, %v6903_v0  ;;  %v5852_v15 = vpop.permute.xlu0 %1871 }
 0x8b5   :  { %1738 = vadd.xlane.f32.xlu1 %v1737_v11  ;;  %vm1623_vm9 = vmor %vm1455_vm5, %vm1591_vm6  ;;  %v1776_v9 = vsel %vm201_vm2, %v4101_v26, 0.0 }
 0x8b6   :  { %vm1595_vm7 = vmand %vm1491_vm14, %vm1563_vm15  ;;  %v4100_v7 = vsel %vm1623_vm9, 1.0, %v6903_v0 }
 0x8b7   :  { %vm1627_vm10 = vmor %vm1459_vm4, %vm1595_vm7  ;;  %v1773_v48 = vsel %vm201_vm2, %v4100_v7, 0.0 }
 0x8b8   :  { %1780 = vadd.xlane.f32.xlu0 %v1779_v28  ;;  %v1849_v23 = vpop.permute.xlu1 %1848  ;;  %v5857_v57 = vpop.permute.xlu0 %1886  ;;  %v4104_v36 = vsel %vm1627_vm10, 1.0, %v6903_v0 }
 0x8b9   :  { %1753 = vadd.xlane.f32.xlu1 %v1752_v41  ;;  %v1785_v53 = vsel %vm201_vm2, %v4104_v36, 0.0 }
 0x8bc   :  { %1783 = vadd.xlane.f32.xlu0 %v1782_v31  ;;  %v1853_v35 = vpop.permute.xlu1 %1852  ;;  %v5862_v59 = vpop.permute.xlu0 %1890 }
 0x8bd   :  { %1750 = vadd.xlane.f32.xlu1 %v1749_v43 }
 0x8c0   :  { %v1868_v44 = vpop.permute.xlu1 %1867  ;;  %v5864_v58 = vpop.permute.xlu0 %1905 }
 0x8c1   :  { %1765 = vadd.xlane.f32.xlu1 %v1764_v37 }
 0x8c4   :  { %v1857_v51 = vpop.permute.xlu1 %1856  ;;  %v5866_v56 = vpop.permute.xlu0 %1909 }
 0x8c5   :  { %1762 = vadd.xlane.f32.xlu1 %v1761_v13 }
 0x8c8   :  { %v1883_v10 = vpop.permute.xlu1 %1882  ;;  %v5868_v30 = vpop.permute.xlu0 %1924 }
 0x8c9   :  { %1777 = vadd.xlane.f32.xlu1 %v1776_v9 }
 0x8cc   :  { %v5870_v50 = vpop.permute.xlu1 %1875  ;;  %v5872_v11 = vpop.permute.xlu0 %1928 }
 0x8cd   :  { %1774 = vadd.xlane.f32.xlu1 %v1773_v48 }
 0x8d0   :  { %v5874_v3 = vpop.permute.xlu1 %1901  ;;  %v5876_v33 = vpop.permute.xlu0 %1943 }
 0x8d1   :  { %1786 = vadd.xlane.f32.xlu1 %v1785_v53 }
 0x8d4   :  { %v5878_v47 = vpop.permute.xlu1 %1894  ;;  %v5880_v28 = vpop.permute.xlu0 %1947 }
 0x8d8   :  { %v5882_v41 = vpop.permute.xlu1 %1920  ;;  %v5884_v49 = vpop.permute.xlu0 %1962 }
 0x8dc   :  { %v5886_v2 = vpop.permute.xlu1 %1913  ;;  %v5888_v31 = vpop.permute.xlu0 %1966 }
 0x8e0   :  { %v5890_v43 = vpop.permute.xlu1 %1939 }
 0x8e4   :  { %v5900_v13 = vpop.permute.xlu1 %1932 }
 0x8e8   :  { %v5907_v7 = vpop.permute.xlu1 %1958 }
 0x905   :  { %v5892_v45 = vpop.xlane.xlu0 %1693 }
 0x906   :  { %vm1788_vm1 = vcmp.lt.f32.partialorder %v5892_v45, 8.0 }
 0x907   :  { %v2004_v37 = vsel %vm1788_vm1, %v5756_v27, -1e+30  ;;  %v5913_v27 = vpop.permute.xlu1 %1951 }
 0x908   :  { %2069 = vperm.xlu0 %4483, %v2004_v37  }
 0x909   :  { %v5898_v20 = vpop.xlane.xlu0 %1705 }
 0x90a   :  { %vm1792_vm13 = vcmp.lt.f32.partialorder %v5898_v20, 8.0 }
 0x90b   :  { %v5917_v37 = vpop.permute.xlu1 %1970  ;;  %v2008_v52 = vsel %vm1792_vm13, %v5846_v14, -1e+30 }
 0x90d   :  { %v5902_v26 = vpop.xlane.xlu0 %1708 }
 0x90e   :  { %vm1793_vm11 = vcmp.lt.f32.partialorder %v5902_v26, 8.0 }
 0x90f   :  { %v2009_v9 = vsel %vm1793_vm11, %v1849_v23, -1e+30 }
 0x910   :  { %2084 = vperm.xlu0 %4483, %v2009_v9  }
 0x911   :  { %v5909_v48 = vpop.xlane.xlu0 %1699 }
 0x912   :  { %vm6974_vm5 = vcmp.lt.f32.partialorder %v5909_v48, 8.0 }
 0x915   :  { %v5911_v36 = vpop.xlane.xlu0 %1717 }
 0x916   :  { %vm1796_vm14 = vcmp.lt.f32.partialorder %v5911_v36, 8.0 }
 0x919   :  { %v5915_v53 = vpop.xlane.xlu0 %1702 }
 0x91a   :  { %vm6917_vm9 = vcmp.lt.f32.partialorder %v5915_v53, 8.0 }
 0x91d   :  { %v5919_v12 = vpop.xlane.xlu0 %1723 }
 0x91e   :  { %vm6970_vm7 = vcmp.lt.f32.partialorder %v5919_v12, 8.0 }
 0x921   :  { %v5924_v23 = vpop.xlane.xlu0 %1732 }
 0x922   :  { %v5921_v0 = vpop.xlane.xlu1 %1696  ;;  %vm6972_vm0 = vcmp.lt.f32.partialorder %v5924_v23, 8.0 }
 0x923   :  { %vm1789_vm8 = vcmp.lt.f32.partialorder %v5921_v0, 8.0 }
 0x924   :  { %v2005_v9 = vsel %vm1789_vm8, %v5833_v39, -1e+30 }
 0x925   :  { %2072 = vperm.xlu1 %4484, %v2005_v9   ;;  %v5939_v32 = vpop.xlane.xlu0 %1735  ;;  %v2006_v9 = vsel %vm6974_vm5, %v5800_v55, -1e+30  ;;  %vm2332_vm5 = vcmask 1046534  }
 0x926   :  { %v5930_v29 = vpop.xlane.xlu1 %1711 }
 0x927   :  { %vm6973_vm12 = vcmp.lt.f32.partialorder %v5930_v29, 8.0 }
 0x928   :  { %v2010_v42 = vsel %vm6973_vm12, %v1853_v35, -1e+30  ;;  %vm2330_vm12 = vcmask 1045509  }
 0x929   :  { %2081 = vperm.xlu1 %4484, %v2008_v52   ;;  %2087 = vperm.xlu0 %4483, %v2010_v42   ;;  %v2012_v42 = vsel %vm1796_vm14, %v5822_v60, -1e+30  ;;  %v5956_v52 = vpop.xlane.xlu0 %1744 }
 0x92a   :  { %v5941_v39 = vpop.xlane.xlu1 %1720 }
 0x92b   :  { %vm1797_vm6 = vcmp.lt.f32.partialorder %v5941_v39, 8.0 }
 0x92c   :  { %v2013_v14 = vsel %vm1797_vm6, %v1868_v44, -1e+30 }
 0x92d   :  { %2096 = vperm.xlu0 %4483, %v2013_v14   ;;  %2075 = vperm.xlu1 %4484, %v2006_v9   ;;  %v2007_v9 = vsel %vm6917_vm9, %v5838_v63, -1e+30  ;;  %vm6922_vm9 = vcmp.lt.f32.partialorder %v5956_v52, 8.0 }
 0x92e   :  { %v5950_v35 = vpop.xlane.xlu1 %1714 }
 0x92f   :  { %vm6916_vm15 = vcmp.lt.f32.partialorder %v5950_v35, 8.0 }
 0x930   :  { %v2011_v55 = vsel %vm6916_vm15, %v1857_v51, -1e+30  ;;  %v5970_v51 = vpop.xlane.xlu0 %1747 }
 0x931   :  { %2090 = vperm.xlu0 %4483, %v2011_v55   ;;  %2093 = vperm.xlu1 %4484, %v2012_v42   ;;  %7071 = vst [vmem:[#allocation22_spill] sm:$0xff] %v5970_v51  ;;  %v2014_v42 = vsel %vm6970_vm7, %v5852_v15, -1e+30  ;;  %v2017_v55 = vsel %vm6972_vm0, %v5857_v57, -1e+30  ;;  %vm6975_vm7 = vcmask 1042434  }
 0x932   :  { %v5961_v44 = vpop.xlane.xlu1 %1729  ;;  %vm2328_vm0 = vcmask 1044484  }
 0x933   :  { %vm6971_vm4 = vcmp.lt.f32.partialorder %v5961_v44, 8.0 }
 0x934   :  { %v2016_v60 = vsel %vm6971_vm4, %v1883_v10, -1e+30  ;;  %vm2326_vm4 = vcmask 1043459  }
 0x935   :  { %2105 = vperm.xlu0 %4483, %v2016_v60   ;;  %2078 = vperm.xlu1 %4484, %v2007_v9   ;;  %v5988_v9 = vpop.xlane.xlu0 %1756 }
 0x936   :  { %v5972_v14 = vpop.xlane.xlu1 %1726  ;;  %7073 = vst [vmem:[#allocation24_spill] sm:$0xff] %v5988_v9 }
 0x937   :  { %7072 = vst [vmem:[#allocation23_spill] sm:$0xff] %v5972_v14  ;;  %vm6915_vm10 = vcmp.lt.f32.partialorder %v5972_v14, 8.0 }
 0x938   :  { %v2015_v63 = vsel %vm6915_vm10, %v5870_v50, -1e+30  ;;  %vm6920_vm10 = vcmp.lt.f32.partialorder %v5939_v32, 8.0 }
 0x939   :  { %2102 = vperm.xlu0 %4483, %v2015_v63   ;;  %2099 = vperm.xlu1 %4484, %v2014_v42   ;;  %v2018_v60 = vsel %vm6920_vm10, %v5862_v59, -1e+30  ;;  %v2021_v63 = vsel %vm6922_vm9, %v5864_v58, -1e+30 }
 0x93a   :  { %v5982_v10 = vpop.xlane.xlu1 %1741 }
 0x93b   :  { %vm6918_vm3 = vcmp.lt.f32.partialorder %v5982_v10, 8.0 }
 0x93c   :  { %v2020_v15 = vsel %vm6918_vm3, %v5874_v3, -1e+30  ;;  %v6004_v3 = vpop.xlane.xlu0 %1759 }
 0x93d   :  { %2117 = vperm.xlu0 %4483, %v2020_v15   ;;  %2108 = vperm.xlu1 %4484, %v2017_v55   ;;  %7075 = vst [vmem:[#allocation26_spill] sm:$0xff] %v6004_v3 }
 0x93e   :  { %v5994_v50 = vpop.xlane.xlu1 %1738 }
 0x93f   :  { %7074 = vst [vmem:[#allocation25_spill] sm:$0xff] %v5994_v50  ;;  %vm6919_vm15 = vcmp.lt.f32.partialorder %v5994_v50, 8.0 }
 0x940   :  { %v2019_v57 = vsel %vm6919_vm15, %v5878_v47, -1e+30  ;;  %vm6923_vm15 = vcmp.lt.f32.partialorder %v5970_v51, 8.0  ;;  %v6022_v15 = vpop.xlane.xlu0 %1768 }
 0x941   :  { %2114 = vperm.xlu0 %4483, %v2019_v57   ;;  %2111 = vperm.xlu1 %4484, %v2018_v60   ;;  %v2022_v55 = vsel %vm6923_vm15, %v5866_v56, -1e+30  ;;  %7078 = vst [vmem:[#allocation29_spill] sm:$0xff] %v6022_v15  ;;  %vm6928_vm15 = vcmp.lt.f32.partialorder %v6004_v3, 8.0 }
 0x942   :  { %v6006_v42 = vpop.xlane.xlu1 %1753 }
 0x943   :  { %7076 = vst [vmem:[#allocation27_spill] sm:$0xff] %v6006_v42  ;;  %vm6921_vm3 = vcmp.lt.f32.partialorder %v6006_v42, 8.0 }
 0x944   :  { %v2024_v59 = vsel %vm6921_vm3, %v5882_v41, -1e+30  ;;  %vm6926_vm3 = vcmp.lt.f32.partialorder %v5988_v9, 8.0 }
 0x945   :  { %2129 = vperm.xlu0 %4483, %v2024_v59   ;;  %2120 = vperm.xlu1 %4484, %v2021_v63   ;;  %v2025_v60 = vsel %vm6926_vm3, %v5868_v30, -1e+30  ;;  %v2026_v63 = vsel %vm6928_vm15, %v5872_v11, -1e+30 }
 0x946   :  { %v6016_v47 = vpop.xlane.xlu1 %1750 }
 0x947   :  { %7077 = vst [vmem:[#allocation28_spill] sm:$0xff] %v6016_v47  ;;  %vm6924_vm10 = vcmp.lt.f32.partialorder %v6016_v47, 8.0  ;;  %v6103_v47 = vsub.s32 %v4948_v61, %v4631_v18 }
 0x948   :  { %v2023_v58 = vsel %vm6924_vm10, %v5886_v2, -1e+30  ;;  %v6038_v2 = vpop.xlane.xlu0 %1771 }
 0x949   :  { %2126 = vperm.xlu0 %4483, %v2023_v58   ;;  %2123 = vperm.xlu1 %4484, %v2022_v55   ;;  %7080 = vst [vmem:[#allocation31_spill] sm:$0xff] %v6038_v2 }
 0x94a   :  { %v6028_v41 = vpop.xlane.xlu1 %1765 }
 0x94b   :  { %7079 = vst [vmem:[#allocation30_spill] sm:$0xff] %v6028_v41  ;;  %vm6925_vm9 = vcmp.lt.f32.partialorder %v6028_v41, 8.0 }
 0x94c   :  { %v2028_v56 = vsel %vm6925_vm9, %v5890_v43, -1e+30  ;;  %vm6929_vm9 = vcmp.lt.f32.partialorder %v6022_v15, 8.0  ;;  %v6056_v55 = vpop.xlane.xlu0 %1780 }
 0x94d   :  { %2141 = vperm.xlu0 %4483, %v2028_v56   ;;  %2132 = vperm.xlu1 %4484, %v2025_v60   ;;  %v2029_v59 = vsel %vm6929_vm9, %v5876_v33, -1e+30  ;;  %7083 = vst [vmem:[#allocation34_spill] sm:$0xff] %v6056_v55  ;;  %vm6968_vm9 = vcmp.lt.f32.partialorder %v6056_v55, 8.0  ;;  %v2182_v55 = vadd.s32 4294967272, %v4948_v61 }
 0x94e   :  { %v6040_v57 = vpop.xlane.xlu1 %1762  ;;  %v2033_v56 = vsel %vm6968_vm9, %v5884_v49, -1e+30  ;;  %vm2322_vm9 = vcmask 1041409  }
 0x94f   :  { %7081 = vst [vmem:[#allocation32_spill] sm:$0xff] %v6040_v57  ;;  %vm6927_vm10 = vcmp.lt.f32.partialorder %v6040_v57, 8.0  ;;  %v6118_v51 = vsub.s32 %v2182_v55, %v4631_v18 }
 0x950   :  { %v2027_v30 = vsel %vm6927_vm10, %v5900_v13, -1e+30  ;;  %vm6967_vm10 = vcmp.lt.f32.partialorder %v6038_v2, 8.0 }
 0x951   :  { %2138 = vperm.xlu0 %4483, %v2027_v30   ;;  %2135 = vperm.xlu1 %4484, %v2026_v63   ;;  %v2030_v58 = vsel %vm6967_vm10, %v5880_v28, -1e+30  ;;  %vm2187_vm10 = vcmask 261312  }
 0x952   :  { %v6050_v43 = vpop.xlane.xlu1 %1777 }
 0x953   :  { %7082 = vst [vmem:[#allocation33_spill] sm:$0xff] %v6050_v43  ;;  %vm6930_vm3 = vcmp.lt.f32.partialorder %v6050_v43, 8.0 }
 0x954   :  { %v2032_v11 = vsel %vm6930_vm3, %v5907_v7, -1e+30  ;;  %v6072_v7 = vpop.xlane.xlu0 %1783 }
 0x955   :  { %2153 = vperm.xlu0 %4483, %v2032_v11   ;;  %2144 = vperm.xlu1 %4484, %v2029_v59   ;;  %7085 = vst [vmem:[#allocation36_spill] sm:$0xff] %v6072_v7 }
 0x956   :  { %v6062_v13 = vpop.xlane.xlu1 %1774 }
 0x957   :  { %7084 = vst [vmem:[#allocation35_spill] sm:$0xff] %v6062_v13  ;;  %vm6931_vm15 = vcmp.lt.f32.partialorder %v6062_v13, 8.0  ;;  %v2168_v13 = vadd.s32 4294967288, %v4948_v61 }
 0x958   :  { %v2031_v33 = vsel %vm6931_vm15, %v5913_v27, -1e+30  ;;  %vm6966_vm15 = vcmp.lt.f32.partialorder %v6072_v7, 8.0 }
 0x959   :  { %2150 = vperm.xlu0 %4483, %v2031_v33   ;;  %2147 = vperm.xlu1 %4484, %v2030_v58   ;;  %v2034_v27 = vsel %vm6966_vm15, %v5888_v31, -1e+30  ;;  %v6106_v2 = vsub.s32 %v2168_v13, %v4631_v18  ;;  %vm2180_vm15 = vcmask 195712  }
 0x95a   :  { %v6074_v60 = vpop.xlane.xlu1 %1786 }
 0x95b   :  { %7086 = vst [vmem:[#allocation37_spill] sm:$0xff] %v6074_v60  ;;  %vm6964_vm3 = vcmp.lt.f32.partialorder %v6074_v60, 8.0  ;;  %v2175_v60 = vadd.s32 4294967280, %v4948_v61 }
 0x95c   :  { %v2035_v28 = vsel %vm6964_vm3, %v5917_v37, -1e+30  ;;  %vm2173_vm3 = vcmask 130112  }
 0x95d   :  { %2162 = vperm.xlu0 %4483, %v2035_v28   ;;  %2156 = vperm.xlu1 %4484, %v2033_v56   ;;  %v6109_v43 = vsub.s32 %v2175_v60, %v4631_v18 }
 0x961   :  { %2159 = vperm.xlu1 %4484, %v2034_v27  }
 0x983   :  { %v2070_v63 = vpop.permute.xlu0 %2069 }
 0x984   :  { %v2167_v42 = vrot.slane %v2070_v63, %v6103_v47 }
 0x98b   :  { %v2085_v30 = vpop.permute.xlu0 %2084 }
 0x98c   :  { %v2196_v15 = vrot.slane %v2085_v30, %v6106_v2 }
 0x9a0   :  { %v2073_v59 = vpop.permute.xlu1 %2072 }
 0x9a1   :  { %v2172_v14 = vrot.slane %v2073_v59, %v6106_v2 }
 0x9a3   :  { %v2174_v59 = vsel %vm2173_vm3, %v2172_v14, %v2167_v42 }
 0x9a4   :  { %v2082_v11 = vpop.permute.xlu1 %2081  ;;  %v2088_v58 = vpop.permute.xlu0 %2087 }
 0x9a5   :  { %v2192_v50 = vrot.slane %v2082_v11, %v6103_v47  ;;  %v2201_v13 = vrot.slane %v2088_v58, %v6109_v43 }
 0x9a7   :  { %v2197_v61 = vsel %vm2173_vm3, %v2196_v15, %v2192_v50 }
 0x9a8   :  { %v2076_v33 = vpop.permute.xlu1 %2075  ;;  %v2097_v49 = vpop.permute.xlu0 %2096  ;;  %v2202_v58 = vsel %vm2180_vm15, %v2201_v13, %v2197_v61 }
 0x9a9   :  { %v2179_v60 = vrot.slane %v2076_v33, %v6109_v43  ;;  %v2215_v18 = vrot.slane %v2097_v49, %v6106_v2 }
 0x9ab   :  { %v2181_v63 = vsel %vm2180_vm15, %v2179_v60, %v2174_v59 }
 0x9ac   :  { %v2094_v22 = vpop.permute.xlu1 %2093  ;;  %v6087_v34 = vpop.permute.xlu0 %2090 }
 0x9ad   :  { %v2211_v11 = vrot.slane %v2094_v22, %v6103_v47  ;;  %v2206_v50 = vrot.slane %v6087_v34, %v6118_v51 }
 0x9af   :  { %v2216_v15 = vsel %vm2173_vm3, %v2215_v18, %v2211_v11 }
 0x9b0   :  { %v6089_v37 = vpop.permute.xlu1 %2078  ;;  %v2106_v25 = vpop.permute.xlu0 %2105 }
 0x9b1   :  { %v2186_v14 = vrot.slane %v6089_v37, %v6118_v51  ;;  %v2230_v49 = vrot.slane %v2106_v25, %v6103_v47 }
 0x9b4   :  { %v2100_v28 = vpop.permute.xlu1 %2099  ;;  %v6091_v56 = vpop.permute.xlu0 %2102 }
 0x9b5   :  { %v2220_v55 = vrot.slane %v2100_v28, %v6109_v43  ;;  %v2225_v28 = vrot.slane %v6091_v56, %v6118_v51 }
 0x9b7   :  { %v2221_v60 = vsel %vm2180_vm15, %v2220_v55, %v2216_v15 }
 0x9b8   :  { %v2109_v6 = vpop.permute.xlu1 %2108  ;;  %v2118_v8 = vpop.permute.xlu0 %2117 }
 0x9b9   :  { %v2234_v22 = vrot.slane %v2109_v6, %v6106_v2  ;;  %v2249_v61 = vrot.slane %v2118_v8, %v6103_v47 }
 0x9bc   :  { %v2112_v31 = vpop.permute.xlu1 %2111  ;;  %v6093_v27 = vpop.permute.xlu0 %2114 }
 0x9bd   :  { %v2239_v42 = vrot.slane %v2112_v31, %v6109_v43  ;;  %v2244_v25 = vrot.slane %v6093_v27, %v6118_v51 }
 0x9c0   :  { %v2121_v40 = vpop.permute.xlu1 %2120  ;;  %v6095_v1 = vpop.permute.xlu0 %2129 }
 0x9c1   :  { %v2253_v33 = vrot.slane %v2121_v40, %v6106_v2  ;;  %v2235_v40 = vsel %vm2173_vm3, %v2234_v22, %v2230_v49  ;;  %v2226_v22 = vsel %vm2187_vm10, %v2225_v28, %v2221_v60 }
 0x9c2   :  { %v2240_v56 = vsel %vm2180_vm15, %v2239_v42, %v2235_v40 }
 0x9c3   :  { %v2254_v59 = vsel %vm2173_vm3, %v2253_v33, %v2249_v61 }
 0x9c4   :  { %v2124_v54 = vpop.permute.xlu1 %2123  ;;  %v6097_v5 = vpop.permute.xlu0 %2126 }
 0x9c5   :  { %v2258_v13 = vrot.slane %v2124_v54, %v6109_v43  ;;  %v2268_v54 = vrot.slane %v6095_v1, %v6103_v47  ;;  %v2263_v8 = vrot.slane %v6097_v5, %v6118_v51 }
 0x9c7   :  { %v2259_v18 = vsel %vm2180_vm15, %v2258_v13, %v2254_v59 }
 0x9c8   :  { %v2133_v57 = vpop.permute.xlu1 %2132  ;;  %v2142_v7 = vpop.permute.xlu0 %2141 }
 0x9c9   :  { %v2272_v34 = vrot.slane %v2133_v57, %v6106_v2 }
 0x9cb   :  { %v2273_v27 = vsel %vm2173_vm3, %v2272_v34, %v2268_v54 }
 0x9cc   :  { %v2136_v3 = vpop.permute.xlu1 %2135  ;;  %v6113_v41 = vpop.permute.xlu0 %2138 }
 0x9cd   :  { %v2277_v37 = vrot.slane %v2136_v3, %v6109_v43  ;;  %v2287_v3 = vrot.slane %v2142_v7, %v6103_v47  ;;  %v2282_v1 = vrot.slane %v6113_v41, %v6118_v51  ;;  %v2207_v7 = vsel %vm2187_vm10, %v2206_v50, %v2202_v58 }
 0x9ce   :  { %v2264_v41 = vsel %vm2187_vm10, %v2263_v8, %v2259_v18 }
 0x9cf   :  { %v2278_v15 = vsel %vm2180_vm15, %v2277_v37, %v2273_v27 }
 0x9d0   :  { %v2145_v30 = vpop.permute.xlu1 %2144  ;;  %v2154_v9 = vpop.permute.xlu0 %2153  ;;  %v2283_v34 = vsel %vm2187_vm10, %v2282_v1, %v2278_v15 }
 0x9d1   :  { %v2291_v31 = vrot.slane %v2145_v30, %v6106_v2  ;;  %v2188_v30 = vsel %vm2187_vm10, %v2186_v14, %v2181_v63  ;;  %v2245_v63 = vsel %vm2187_vm10, %v2244_v25, %v2240_v56 }
 0x9d2   :  { %v2323_v49 = vsel %vm2322_vm9, %v2207_v7, %v2188_v30 }
 0x9d3   :  { %v2292_v42 = vsel %vm2173_vm3, %v2291_v31, %v2287_v3  ;;  %v2325_v13 = vsel %vm6975_vm7, %v2226_v22, %v2323_v49  ;;  %vm2334_vm7 = vcmask 1047559  }
 0x9d4   :  { %v2148_v6 = vpop.permute.xlu1 %2147  ;;  %v2151_v11 = vpop.permute.xlu0 %2150  ;;  %v2327_v58 = vsel %vm2326_vm4, %v2245_v63, %v2325_v13 }
 0x9d5   :  { %v2296_v57 = vrot.slane %v2148_v6, %v6109_v43  ;;  %v2301_v5 = vrot.slane %v2151_v11, %v6118_v51  ;;  %v2306_v6 = vrot.slane %v2154_v9, %v6103_v47  ;;  %v2329_v37 = vsel %vm2328_vm0, %v2264_v41, %v2327_v58 }
 0x9d6   :  { %v2331_v9 = vsel %vm2330_vm12, %v2283_v34, %v2329_v37 }
 0x9d7   :  { %v2297_v14 = vsel %vm2180_vm15, %v2296_v57, %v2292_v42 }
 0x9d8   :  { %v2157_v55 = vpop.permute.xlu1 %2156  ;;  %v2163_v28 = vpop.permute.xlu0 %2162  ;;  %v2302_v50 = vsel %vm2187_vm10, %v2301_v5, %v2297_v14 }
 0x9d9   :  { %v2310_v33 = vrot.slane %v2157_v55, %v6106_v2  ;;  %v2320_v11 = vrot.slane %v2163_v28, %v6118_v51  ;;  %v2333_v54 = vsel %vm2332_vm5, %v2302_v50, %v2331_v9 }
 0x9db   :  { %v2311_v31 = vsel %vm2173_vm3, %v2310_v33, %v2306_v6 }
 0x9dc   :  { %v2160_v60 = vpop.permute.xlu1 %2159 }
 0x9dd   :  { %v2315_v61 = vrot.slane %v2160_v60, %v6109_v43 }
 0x9df   :  { %v2316_v40 = vsel %vm2180_vm15, %v2315_v61, %v2311_v31 }
 0x9e0   :  { %v2321_v25 = vsel %vm2187_vm10, %v2320_v11, %v2316_v40 }
 0x9e1   :  { %v2335_v57 = vsel %vm2334_vm7, %v2321_v25, %v2333_v54 }
 0x9e2   :  { %v2337_v56 = vsel %vm201_vm2, %v2335_v57, -inf }
 0x9e3   :  { %2338 = vmax.xlane.f32.xlu1 %v2337_v56  ;;  %v7104_v56 = vld [vmem:[#allocation27_spill] sm:$0xff] }
 0xa6c   :  { %v2339_v59 = vpop.xlane.xlu1 %2338 }
 0xa6d   :  { %v2340_v8 = vsub.f32 %v5015_v46, %v2339_v59 }
 0xa6f   :  { %v2341_v3 = vmul.f32 1.442695, %v2340_v8  ;;  %v7107_v8 = vld [vmem:[#allocation22_spill] sm:$0xff] }
 0xa71   :  { %4505 = vpow2.f32 %v2341_v3 }
 0xa7e   :  { %v4506_v30 = vpop.eup %4505 }
 0xa7f   :  { %v2404_v18 = vrot.slane %v4506_v30, %v4807_v24  ;;  %v2347_v27 = vrot.slane %v4506_v30, %v4634_v19  ;;  %v2442_v1 = vrot.slane %v4506_v30, %v4919_v38  ;;  %v2366_v55 = vrot.slane %v4506_v30, %v4708_v62  ;;  %v7159_v24 = vld [vmem:[#allocation15_spill] sm:$0xff] }
 0xa80   :  { %v2423_v22 = vrot.slane %v4506_v30, %v4863_v21  ;;  %v2461_v46 = vrot.slane %v4506_v30, %v4922_v4  ;;  %v2385_v15 = vrot.slane %v4506_v30, %v4804_v16  ;;  %v2480_v42 = vrot.slane %v4506_v30, %v4958_v17  ;;  %v7110_v30 = vld [vmem:[#allocation23_spill] sm:$0xff] }
 0xa81   :  { %2410 = vbcast.lane.b32.xlu1 %v2404_v18, 264  ;;  %2349 = vbcast.lane.b32.xlu0 %v2347_v27, 256 }
 0xa85   :  { %2414 = vbcast.lane.b32.xlu1 %v2404_v18, 272  ;;  %2353 = vbcast.lane.b32.xlu0 %v2347_v27, 264 }
 0xa89   :  { %2448 = vbcast.lane.b32.xlu1 %v2442_v1, 264  ;;  %2368 = vbcast.lane.b32.xlu0 %v2366_v55, 256 }
 0xa8d   :  { %2433 = vbcast.lane.b32.xlu1 %v2423_v22, 272  ;;  %2372 = vbcast.lane.b32.xlu0 %v2366_v55, 264 }
 0xa91   :  { %2467 = vbcast.lane.b32.xlu1 %v2461_v46, 264  ;;  %2387 = vbcast.lane.b32.xlu0 %v2385_v15, 256 }
 0xa95   :  { %2452 = vbcast.lane.b32.xlu1 %v2442_v1, 272  ;;  %2391 = vbcast.lane.b32.xlu0 %v2385_v15, 264 }
 0xa99   :  { %2486 = vbcast.lane.b32.xlu1 %v2480_v42, 264  ;;  %2357 = vbcast.lane.b32.xlu0 %v2347_v27, 272 }
 0xa9d   :  { %2471 = vbcast.lane.b32.xlu1 %v2461_v46, 272  ;;  %2376 = vbcast.lane.b32.xlu0 %v2366_v55, 272 }
 0xaa1   :  { %2490 = vbcast.lane.b32.xlu1 %v2480_v42, 272  ;;  %2406 = vbcast.lane.b32.xlu0 %v2404_v18, 256 }
 0xaa5   :  { %2494 = vbcast.lane.b32.xlu1 %v2480_v42, 280  ;;  %2395 = vbcast.lane.b32.xlu0 %v2385_v15, 272 }
 0xaa9   :  { %2425 = vbcast.lane.b32.xlu0 %v2423_v22, 256 }
 0xaad   :  { %2429 = vbcast.lane.b32.xlu0 %v2423_v22, 264 }
 0xab1   :  { %2361 = vbcast.lane.b32.xlu0 %v2347_v27, 280 }
 0xab5   :  { %2380 = vbcast.lane.b32.xlu0 %v2366_v55, 280  ;;  %v7112_v55 = vld [vmem:[#allocation29_spill] sm:$0xff] }
 0xab9   :  { %2444 = vbcast.lane.b32.xlu0 %v2442_v1, 256 }
 0xabd   :  { %2399 = vbcast.lane.b32.xlu0 %v2385_v15, 280 }
 0xac1   :  { %2463 = vbcast.lane.b32.xlu0 %v2461_v46, 256 }
 0xac5   :  { %2418 = vbcast.lane.b32.xlu0 %v2404_v18, 280 }
 0xac9   :  { %2482 = vbcast.lane.b32.xlu0 %v2480_v42, 256 }
 0xacd   :  { %2437 = vbcast.lane.b32.xlu0 %v2423_v22, 280 }
 0xad1   :  { %2456 = vbcast.lane.b32.xlu0 %v2442_v1, 280 }
 0xad5   :  { %2475 = vbcast.lane.b32.xlu0 %v2461_v46, 280  ;;  %v7115_v46 = vld [vmem:[#allocation30_spill] sm:$0xff] }
 0xaf3   :  { %v2350_v17 = vpop.permute.xlu0 %2349  ;;  %v2411_v34 = vpop.permute.xlu1 %2410 }
 0xaf4   :  { %v6199_v5 = vsel %vm1788_vm1, %v2350_v17, 0.0  ;;  %vm7087_vm1 = vcmp.lt.f32.partialorder %v5909_v48, 8.0  ;;  %v7118_v17 = vld [vmem:[#allocation26_spill] sm:$0xff] }
 0xaf5   :  { %2593 = vperm.xlu0 %4483, %v6199_v5  }
 0xaf7   :  { %v2354_v7 = vpop.permute.xlu0 %2353  ;;  %v2415_v58 = vpop.permute.xlu1 %2414 }
 0xaf8   :  { %v6204_v63 = vsel %vm1789_vm8, %v2354_v7, 0.0  ;;  %vm7089_vm8 = vcmp.lt.f32.partialorder %v5924_v23, 8.0 }
 0xaf9   :  { %2596 = vperm.xlu1 %4484, %v6204_v63   ;;  %v6239_v60 = vsel %vm7089_vm8, %v2411_v34, 0.0  ;;  %vm7098_vm8 = vcmp.lt.f32.partialorder %v5939_v32, 8.0 }
 0xafa   :  { %7090 = vst [vmem:[#allocation38_spill] sm:$0xff] %v6239_v60  ;;  %v6269_v25 = vsel %vm7098_vm8, %v2415_v58, 0.0  ;;  %vm7113_vm8 = vcmp.lt.f32.partialorder %v7112_v55, 8.0  ;;  %v66_v55 = vld [vmem:[%s6897_s3 + $0xe8] sm:$0xff] }
 0xafb   :  { %v2369_v14 = vpop.permute.xlu0 %2368  ;;  %v2449_v61 = vpop.permute.xlu1 %2448  ;;  %7099 = vst [vmem:[#allocation41_spill] sm:$0xff] %v6269_v25  ;;  %4419 = vmatpush3.msra.mxu1 %v66_v55 }
 0xafc   :  { %v6209_v33 = vsel %vm1792_vm13, %v2369_v14, 0.0  ;;  %vm7091_vm13 = vcmp.lt.f32.partialorder %v5961_v44, 8.0  ;;  %v7121_v14 = vld [vmem:[#allocation25_spill] sm:$0xff] }
 0xafd   :  { %2605 = vperm.xlu0 %4483, %v6209_v33  }
 0xaff   :  { %v2373_v49 = vpop.permute.xlu0 %2372  ;;  %v2434_v11 = vpop.permute.xlu1 %2433 }
 0xb00   :  { %v6214_v45 = vsel %vm1793_vm11, %v2373_v49, 0.0  ;;  %vm7088_vm11 = vcmp.lt.f32.partialorder %v5930_v29, 8.0 }
 0xb01   :  { %2608 = vperm.xlu1 %4484, %v6214_v45  }
 0xb03   :  { %v2388_v41 = vpop.permute.xlu0 %2387 }
 0xb04   :  { %v6219_v0 = vsel %vm1796_vm14, %v2388_v41, 0.0  ;;  %vm7093_vm14 = vcmp.lt.f32.partialorder %v5982_v10, 8.0  ;;  %v2468_v10 = vpop.permute.xlu1 %2467 }
 0xb05   :  { %2617 = vperm.xlu0 %4483, %v6219_v0   ;;  %v6299_v22 = vsel %vm7113_vm8, %v2468_v10, 0.0  ;;  %v7136_v10 = vld [vmem:[#allocation36_spill] sm:$0xff] }
 0xb06   :  { %7114 = vst [vmem:[#allocation23_spill] sm:$0xff] %v6299_v22 }
 0xb07   :  { %v2392_v28 = vpop.permute.xlu0 %2391 }
 0xb08   :  { %v6224_v20 = vsel %vm1797_vm6, %v2392_v28, 0.0  ;;  %vm7092_vm6 = vcmp.lt.f32.partialorder %v5919_v12, 8.0  ;;  %v2453_v32 = vpop.permute.xlu1 %2452 }
 0xb09   :  { %2620 = vperm.xlu1 %4484, %v6224_v20  }
 0xb0b   :  { %v2358_v13 = vpop.permute.xlu0 %2357 }
 0xb0c   :  { %v6229_v26 = vsel %vm7087_vm1, %v2358_v13, 0.0  ;;  %vm7095_vm1 = vcmp.lt.f32.partialorder %v5956_v52, 8.0  ;;  %v2487_v27 = vpop.permute.xlu1 %2486  ;;  %v7124_v13 = vld [vmem:[#allocation34_spill] sm:$0xff] }
 0xb0d   :  { %2599 = vperm.xlu0 %4483, %v6229_v26  }
 0xb0f   :  { %v2377_v36 = vpop.permute.xlu0 %2376 }
 0xb10   :  { %v6234_v6 = vsel %vm7088_vm11, %v2377_v36, 0.0  ;;  %vm7097_vm11 = vcmp.lt.f32.partialorder %v5915_v53, 8.0  ;;  %v7101_v53 = vld [vmem:[#allocation24_spill] sm:$0xff]  ;;  %v2472_v41 = vpop.permute.xlu1 %2471  ;;  %v7127_v36 = vld [vmem:[#allocation33_spill] sm:$0xff] }
 0xb11   :  { %2611 = vperm.xlu1 %4484, %v6234_v6  }
 0xb13   :  { %v2407_v39 = vpop.permute.xlu0 %2406 }
 0xb14   :  { %v6243_v48 = vsel %vm7091_vm13, %v2407_v39, 0.0  ;;  %vm7100_vm13 = vcmp.lt.f32.partialorder %v5950_v35, 8.0  ;;  %v2491_v58 = vpop.permute.xlu1 %2490 }
 0xb15   :  { %2632 = vperm.xlu1 %4484, %v6239_v60   ;;  %2629 = vperm.xlu0 %4483, %v6243_v48   ;;  %v7200_v60 = vld [vmem:[#allocation21_spill] sm:$0xff] }
 0xb17   :  { %v2396_v50 = vpop.permute.xlu0 %2395 }
 0xb18   :  { %v6249_v29 = vsel %vm7092_vm6, %v2396_v50, 0.0  ;;  %vm7102_vm6 = vcmp.lt.f32.partialorder %v7101_v53, 8.0 }
 0xb19   :  { %2623 = vperm.xlu0 %4483, %v6249_v29   ;;  %v6279_v57 = vsel %vm7102_vm6, %v2449_v61, 0.0  ;;  %vm7119_vm6 = vcmp.lt.f32.partialorder %v7118_v17, 8.0  ;;  %v7130_v61 = vld [vmem:[#allocation31_spill] sm:$0xff]  ;;  %v64_v17 = vld [vmem:[%s6897_s3 + $0xd8] sm:$0xff] }
 0xb1a   :  { %7103 = vst [vmem:[#allocation24_spill] sm:$0xff] %v6279_v57  ;;  %v6309_v7 = vsel %vm7119_vm6, %v2453_v32, 0.0  ;;  %vm7131_vm8 = vcmp.lt.f32.partialorder %v7130_v61, 8.0  ;;  %vm7137_vm6 = vcmp.lt.f32.partialorder %v7136_v10, 8.0  ;;  %v7149_v61 = vld [vmem:[#allocation12_spill] sm:$0xff] }
 0xb1b   :  { %v2426_v23 = vpop.permute.xlu0 %2425  ;;  %7120 = vst [vmem:[#allocation30_spill] sm:$0xff] %v6309_v7 }
 0xb1c   :  { %v6254_v37 = vsel %vm7093_vm14, %v2426_v23, 0.0  ;;  %vm7105_vm14 = vcmp.lt.f32.partialorder %v7104_v56, 8.0  ;;  %v6329_v23 = vsel %vm7131_vm8, %v2472_v41, 0.0  ;;  %v2495_v56 = vpop.permute.xlu1 %2494  ;;  %v62_v41 = vld [vmem:[%s6897_s3 + $0xc8] sm:$0xff]  ;;  %vm7156_vm8 = vcmask 523264  }
 0xb1d   :  { %7094 = vst [vmem:[#allocation39_spill] sm:$0xff] %v6254_v37  ;;  %2641 = vperm.xlu1 %4484, %v6254_v37   ;;  %7132 = vst [vmem:[#allocation33_spill] sm:$0xff] %v6329_v23 }
 0xb1f   :  { %v2430_v44 = vpop.permute.xlu0 %2429 }
 0xb20   :  { %v6259_v31 = vsel %vm7095_vm1, %v2430_v44, 0.0  ;;  %vm7108_vm1 = vcmp.lt.f32.partialorder %v7107_v8, 8.0  ;;  %v7133_v44 = vld [vmem:[#allocation28_spill] sm:$0xff] }
 0xb21   :  { %7096 = vst [vmem:[#allocation40_spill] sm:$0xff] %v6259_v31  ;;  %2644 = vperm.xlu0 %4483, %v6259_v31   ;;  %v6289_v3 = vsel %vm7108_vm1, %v2434_v11, 0.0  ;;  %vm7125_vm1 = vcmp.lt.f32.partialorder %v7124_v13, 8.0  ;;  %v60_v13 = vld [vmem:[%s6897_s3 + $0xb8] sm:$0xff] }
 0xb22   :  { %7109 = vst [vmem:[#allocation22_spill] sm:$0xff] %v6289_v3  ;;  %v6319_v34 = vsel %vm7125_vm1, %v2487_v27, 0.0 }
 0xb23   :  { %v2362_v12 = vpop.permute.xlu0 %2361  ;;  %7126 = vst [vmem:[#allocation25_spill] sm:$0xff] %v6319_v34 }
 0xb24   :  { %v6264_v40 = vsel %vm7097_vm11, %v2362_v12, 0.0  ;;  %vm7111_vm11 = vcmp.lt.f32.partialorder %v7110_v30, 8.0  ;;  %v7145_v30 = vld [vmem:[#allocation35_spill] sm:$0xff] }
 0xb25   :  { %2602 = vperm.xlu1 %4484, %v6264_v40  }
 0xb27   :  { %v2381_v9 = vpop.permute.xlu0 %2380 }
 0xb28   :  { %v6273_v52 = vsel %vm7100_vm13, %v2381_v9, 0.0  ;;  %vm7116_vm13 = vcmp.lt.f32.partialorder %v7115_v46, 8.0  ;;  %v6339_v9 = vsel %vm7137_vm6, %v2491_v58, 0.0  ;;  %v65_v46 = vld [vmem:[%s6897_s3 + $0xe0] sm:$0xff]  ;;  %vm7161_vm6 = vmmov %vm7156_vm8 }
 0xb29   :  { %2635 = vperm.xlu1 %4484, %v6269_v25   ;;  %2614 = vperm.xlu0 %4483, %v6273_v52   ;;  %7138 = vst [vmem:[#allocation28_spill] sm:$0xff] %v6339_v9  ;;  %v4513_v58 = vld [vmem:[%s6899_s2 + $0x80] sm:$0xff] }
 0xb2b   :  { %v2445_v54 = vpop.permute.xlu0 %2444 }
 0xb2c   :  { %v6283_v59 = vsel %vm7105_vm14, %v2445_v54, 0.0  ;;  %vm7122_vm14 = vcmp.lt.f32.partialorder %v7121_v14, 8.0  ;;  %v7139_v54 = vld [vmem:[#allocation32_spill] sm:$0xff] }
 0xb2d   :  { %7106 = vst [vmem:[#allocation27_spill] sm:$0xff] %v6283_v59  ;;  %2656 = vperm.xlu1 %4484, %v6279_v57   ;;  %2653 = vperm.xlu0 %4483, %v6283_v59   ;;  %v63_v14 = vld [vmem:[%s6897_s3 + $0xd0] sm:$0xff] }
 0xb2f   :  { %v2400_v35 = vpop.permute.xlu0 %2399 }
 0xb30   :  { %v6293_v18 = vsel %vm7111_vm11, %v2400_v35, 0.0  ;;  %vm7128_vm11 = vcmp.lt.f32.partialorder %v7127_v36, 8.0  ;;  %v7142_v35 = vld [vmem:[#allocation37_spill] sm:$0xff]  ;;  %v59_v36 = vld [vmem:[%s6897_s3 + $0xb0] sm:$0xff] }
 0xb31   :  { %2647 = vperm.xlu1 %4484, %v6289_v3   ;;  %2626 = vperm.xlu0 %4483, %v6293_v18   ;;  %vm7143_vm1 = vcmp.lt.f32.partialorder %v7142_v35, 8.0 }
 0xb32   :  { %v6349_v8 = vsel %vm7143_vm1, %v2495_v56, 0.0  ;;  %vm7167_vm1 = vmmov %vm7161_vm6 }
 0xb33   :  { %v2464_v1 = vpop.permute.xlu0 %2463  ;;  %7144 = vst [vmem:[#allocation32_spill] sm:$0xff] %v6349_v8 }
 0xb34   :  { %v6303_v15 = vsel %vm7116_vm13, %v2464_v1, 0.0  ;;  %vm7134_vm13 = vcmp.lt.f32.partialorder %v7133_v44, 8.0  ;;  %v4105_v1 = vld [vmem:[%s6900_s1] ss:$0 sm:$0xff] }
 0xb35   :  { %7117 = vst [vmem:[#allocation29_spill] sm:$0xff] %v6303_v15  ;;  %2668 = vperm.xlu1 %4484, %v6299_v22   ;;  %2665 = vperm.xlu0 %4483, %v6303_v15   ;;  %v7150_v44 = vld [vmem:[#allocation10_spill] sm:$0xff] }
 0xb37   :  { %v2419_v42 = vpop.permute.xlu0 %2418 }
 0xb38   :  { %v6313_v49 = vsel %vm7122_vm14, %v2419_v42, 0.0  ;;  %vm7140_vm14 = vcmp.lt.f32.partialorder %v7139_v54, 8.0  ;;  %v7148_v42 = vmov 0.0   ;;  %v7152_v54 = vld [vmem:[#allocation11_spill] sm:$0xff] }
 0xb39   :  { %7123 = vst [vmem:[#allocation26_spill] sm:$0xff] %v6313_v49  ;;  %2659 = vperm.xlu1 %4484, %v6309_v7   ;;  %2638 = vperm.xlu0 %4483, %v6313_v49   ;;  %v7153_v56 = vsub.f32 %v7149_v61, %v7152_v54 }
 0xb3a   :  { %4420 = vmatprep.subr.mxu1 %v7148_v42 }
 0xb3b   :  { %v2483_v28 = vpop.permute.xlu0 %2482  ;;  %4421 = vmatpush3.msra.mxu1 %v65_v46 }
 0xb3c   :  { %v6323_v39 = vsel %vm7128_vm11, %v2483_v28, 0.0  ;;  %vm7146_vm11 = vcmp.lt.f32.partialorder %v7145_v30, 8.0  ;;  %4422 = vmatprep.subr.mxu1 %v7148_v42  ;;  %v61_v28 = vld [vmem:[%s6897_s3 + $0xc0] sm:$0xff] }
 0xb3d   :  { %7129 = vst [vmem:[#allocation34_spill] sm:$0xff] %v6323_v39  ;;  %2680 = vperm.xlu1 %4484, %v6319_v34   ;;  %2677 = vperm.xlu0 %4483, %v6323_v39   ;;  %v7170_v34 = vld [vmem:[#allocation17_spill] sm:$0xff] }
 0xb3e   :  { %4423 = vmatpush3.msra.mxu1 %v64_v17 }
 0xb3f   :  { %v2438_v50 = vpop.permute.xlu0 %2437  ;;  %4424 = vmatprep.subr.mxu1 %v7148_v42 }
 0xb40   :  { %v6333_v11 = vsel %vm7134_vm13, %v2438_v50, 0.0  ;;  %4425 = vmatpush3.msra.mxu1 %v63_v14  ;;  %v6396_v50 = vrot.slane %v4513_v58, %v4804_v16  ;;  %vm7157_vm13 = vmmov %vm7156_vm8  ;;  %v7164_v16 = vld [vmem:[#allocation14_spill] sm:$0xff] }
 0xb41   :  { %7135 = vst [vmem:[#allocation31_spill] sm:$0xff] %v6333_v11  ;;  %2671 = vperm.xlu1 %4484, %v6329_v23   ;;  %2650 = vperm.xlu0 %4483, %v6333_v11   ;;  %v7165_v62 = vsub.f32 %v7149_v61, %v7164_v16 }
 0xb42   :  { %4426 = vmatprep.subr.mxu1 %v7148_v42 }
 0xb43   :  { %v2457_v12 = vpop.permute.xlu0 %2456  ;;  %4427 = vmatpush3.msra.mxu1 %v62_v41 }
 0xb44   :  { %v6343_v53 = vsel %vm7140_vm14, %v2457_v12, 0.0  ;;  %4428 = vmatprep.subr.mxu1 %v7148_v42  ;;  %v7151_v12 = vsub.f32 %v7149_v61, %v7150_v44  ;;  %vm7162_vm14 = vmmov %vm7161_vm6 }
 0xb45   :  { %7141 = vst [vmem:[#allocation36_spill] sm:$0xff] %v6343_v53  ;;  %2683 = vperm.xlu1 %4484, %v6339_v9   ;;  %2662 = vperm.xlu0 %4483, %v6343_v53  }
 0xb46   :  { %4429 = vmatpush3.msra.mxu1 %v61_v28  ;;  %v3415_v10 = vadd.f32 %v6396_v50, %v7151_v12  ;;  %v7154_v28 = vld [vmem:[#allocation13_spill] sm:$0xff] }
 0xb47   :  { %v2476_v32 = vpop.permute.xlu0 %2475  ;;  %4430 = vmatprep.subr.mxu1 %v7148_v42  ;;  %v7166_v19 = vsub.f32 %v7154_v28, %v7164_v16 }
 0xb48   :  { %v6353_v27 = vsel %vm7146_vm11, %v2476_v32, 0.0  ;;  %4431 = vmatpush3.msra.mxu1 %v60_v13  ;;  %v3416_v32 = vadd.f32 %v6396_v50, %v7153_v56  ;;  %v3447_v30 = vmax.f32 %v3415_v10, 0.0  ;;  %v7155_v13 = vsub.f32 %v7154_v28, %v7150_v44  ;;  %vm7168_vm11 = vmmov %vm7167_vm1 }
 0xb49   :  { %7147 = vst [vmem:[#allocation37_spill] sm:$0xff] %v6353_v27  ;;  %2686 = vperm.xlu1 %4484, %v6349_v8   ;;  %2674 = vperm.xlu0 %4483, %v6353_v27   ;;  %v7158_v10 = vsub.f32 %v7154_v28, %v7152_v54 }
 0xb4a   :  { %4432 = vmatprep.subr.mxu1 %v7148_v42  ;;  %v3448_v55 = vmax.f32 %v3416_v32, 0.0 }
 0xb4b   :  { %4433 = vmatpush3.msra.mxu1 %v59_v36  ;;  %v3419_v36 = vadd.f32 %v6396_v50, %v7155_v13  ;;  %v3420_v32 = vadd.f32 %v6396_v50, %v7158_v10 }
 0xb4c   :  { %4448 = vmatprep.subr.mxu1 %v7148_v42 }
 0xb4d   :  { %2862 = vbcast.lane.b32.xlu1 %v4105_v1, 264  ;;  %2858 = vbcast.lane.b32.xlu0 %v4105_v1, 256  ;;  %v3451_v4 = vmax.f32 %v3419_v36, 0.0 }
 0xb51   :  { %2870 = vbcast.lane.b32.xlu1 %v4105_v1, 280  ;;  %2866 = vbcast.lane.b32.xlu0 %v4105_v1, 272 }
 0xb70   :  { %v2594_v35 = vpop.permute.xlu0 %2593 }
 0xb71   :  { %v3511_v1 = vmul.f32 %v3447_v30, %v2594_v35  ;;  %v2691_v17 = vrot.slane %v2594_v35, %v6103_v47 }
 0xb73   :  { %v3543_v58 = vsel %vm7156_vm8, %v3511_v1, 0.0  ;;  %vm7169_vm8 = vmmov %vm7167_vm1 }
 0xb74   :  { %v2597_v46 = vpop.permute.xlu1 %2596 }
 0xb75   :  { %v2695_v14 = vrot.slane %v2597_v46, %v6106_v2  ;;  %v3512_v41 = vmul.f32 %v3448_v55, %v2597_v46  ;;  %v3452_v46 = vmax.f32 %v3420_v32, 0.0 }
 0xb77   :  { %v2696_v12 = vsel %vm2173_vm3, %v2695_v14, %v2691_v17  ;;  %v3544_v56 = vsel %vm7157_vm13, %v3512_v41, 0.0  ;;  %v7160_v17 = vsub.f32 %v7159_v24, %v7150_v44  ;;  %vm7174_vm13 = vmmov %vm7167_vm1 }
 0xb78   :  { %v3545_v35 = vadd.f32 %v3544_v56, %v3543_v58  ;;  %v2606_v30 = vpop.permute.xlu0 %2605 }
 0xb79   :  { %v3515_v55 = vmul.f32 %v3451_v4, %v2606_v30  ;;  %v2710_v21 = vrot.slane %v2606_v30, %v6103_v47  ;;  %v3423_v14 = vadd.f32 %v6396_v50, %v7160_v17  ;;  %v7163_v4 = vsub.f32 %v7159_v24, %v7152_v54 }
 0xb7a   :  { %v3417_v17 = vadd.f32 %v6396_v50, %v7165_v62 }
 0xb7b   :  { %v3556_v41 = vsel %vm7161_vm6, %v3515_v55, 0.0  ;;  %v3424_v36 = vadd.f32 %v6396_v50, %v7163_v4  ;;  %v3455_v30 = vmax.f32 %v3423_v14, 0.0  ;;  %vm7175_vm6 = vmmov %vm7167_vm1 }
 0xb7c   :  { %v2609_v38 = vpop.permute.xlu1 %2608 }
 0xb7d   :  { %v2714_v13 = vrot.slane %v2609_v38, %v6106_v2  ;;  %v3516_v1 = vmul.f32 %v3452_v46, %v2609_v38  ;;  %v3456_v46 = vmax.f32 %v3424_v36, 0.0  ;;  %v3449_v36 = vmax.f32 %v3417_v17, 0.0 }
 0xb7f   :  { %v2715_v10 = vsel %vm2173_vm3, %v2714_v13, %v2710_v21  ;;  %v3557_v58 = vsel %vm7162_vm14, %v3516_v1, 0.0  ;;  %vm7176_vm14 = vmmov %vm7167_vm1 }
 0xb80   :  { %v3558_v56 = vadd.f32 %v3557_v58, %v3556_v41  ;;  %v2618_v32 = vpop.permute.xlu0 %2617  ;;  %v3421_v41 = vadd.f32 %v6396_v50, %v7166_v19  ;;  %v7171_v19 = vsub.f32 %v7170_v34, %v7152_v54 }
 0xb81   :  { %v3519_v38 = vmul.f32 %v3455_v30, %v2618_v32  ;;  %v2729_v21 = vrot.slane %v2618_v32, %v6103_v47 }
 0xb82   :  { %v3453_v8 = vmax.f32 %v3421_v41, 0.0 }
 0xb83   :  { %v3569_v14 = vsel %vm7167_vm1, %v3519_v38, 0.0  ;;  %v3428_v38 = vadd.f32 %v6396_v50, %v7171_v19 }
 0xb84   :  { %v2621_v55 = vpop.permute.xlu1 %2620 }
 0xb85   :  { %v2733_v13 = vrot.slane %v2621_v55, %v6106_v2  ;;  %v3520_v1 = vmul.f32 %v3456_v46, %v2621_v55 }
 0xb87   :  { %v2734_v58 = vsel %vm2173_vm3, %v2733_v13, %v2729_v21  ;;  %v3570_v4 = vsel %vm7168_vm11, %v3520_v1, 0.0  ;;  %v7172_v21 = vsub.f32 %v7170_v34, %v7150_v44  ;;  %vm7184_vm11 = vmmov %vm7167_vm1 }
 0xb88   :  { %v3571_v30 = vadd.f32 %v3570_v4, %v3569_v14  ;;  %v2600_v62 = vpop.permute.xlu0 %2599 }
 0xb89   :  { %v2700_v9 = vrot.slane %v2600_v62, %v6109_v43  ;;  %v3513_v32 = vmul.f32 %v3449_v36, %v2600_v62  ;;  %v3427_v17 = vadd.f32 %v6396_v50, %v7172_v21  ;;  %v3460_v62 = vmax.f32 %v3428_v38, 0.0 }
 0xb8b   :  { %v2701_v46 = vsel %vm2180_vm15, %v2700_v9, %v2696_v12  ;;  %v3546_v55 = vsel %vm7169_vm8, %v3513_v32, 0.0  ;;  %v7173_v9 = vsub.f32 %v7159_v24, %v7164_v16  ;;  %v3459_v32 = vmax.f32 %v3427_v17, 0.0  ;;  %vm7185_vm8 = vmmov %vm7167_vm1 }
 0xb8c   :  { %v3547_v13 = vadd.f32 %v3546_v55, %v3545_v35  ;;  %v2612_v1 = vpop.permute.xlu1 %2611 }
 0xb8d   :  { %v2719_v14 = vrot.slane %v2612_v1, %v6109_v43  ;;  %v3517_v4 = vmul.f32 %v3453_v8, %v2612_v1  ;;  %v3425_v12 = vadd.f32 %v6396_v50, %v7173_v9 }
 0xb8f   :  { %v6462_v41 = vsel %vm2180_vm15, %v2719_v14, %v2715_v10  ;;  %v3559_v36 = vsel %vm7174_vm13, %v3517_v4, 0.0  ;;  %v3457_v14 = vmax.f32 %v3425_v12, 0.0  ;;  %vm7190_vm13 = vmmov %vm7167_vm1 }
 0xb90   :  { %v6465_v19 = vadd.f32 %v3559_v36, %v3558_v56  ;;  %v2633_v21 = vpop.permute.xlu1 %2632  ;;  %v2630_v35 = vpop.permute.xlu0 %2629  ;;  %v7177_v36 = vld [vmem:[#allocation18_spill] sm:$0xff] }
 0xb91   :  { %v2752_v55 = vrot.slane %v2633_v21, %v6106_v2  ;;  %v3524_v27 = vmul.f32 %v3460_v62, %v2633_v21  ;;  %v2748_v8 = vrot.slane %v2630_v35, %v6103_v47  ;;  %v3523_v1 = vmul.f32 %v3459_v32, %v2630_v35 }
 0xb92   :  { %v7178_v39 = vsub.f32 %v7177_v36, %v7150_v44  ;;  %v7179_v32 = vsub.f32 %v7177_v36, %v7152_v54 }
 0xb93   :  { %v3583_v23 = vsel %vm7175_vm6, %v3524_v27, 0.0  ;;  %v2753_v9 = vsel %vm2173_vm3, %v2752_v55, %v2748_v8  ;;  %v3582_v10 = vsel %vm7176_vm14, %v3523_v1, 0.0  ;;  %vm7195_vm6 = vmmov %vm7167_vm1 }
 0xb94   :  { %v3584_v4 = vadd.f32 %v3583_v23, %v3582_v10  ;;  %v2624_v38 = vpop.permute.xlu0 %2623  ;;  %v3431_v62 = vadd.f32 %v6396_v50, %v7178_v39  ;;  %v3432_v12 = vadd.f32 %v6396_v50, %v7179_v32  ;;  %v7180_v10 = vld [vmem:[#allocation16_spill] sm:$0xff]  ;;  %v7182_v32 = vsub.f32 %v7170_v34, %v7164_v16  ;;  %vm7196_vm14 = vmmov %vm7167_vm1 }
 0xb95   :  { %v2738_v56 = vrot.slane %v2624_v38, %v6109_v43  ;;  %v3521_v17 = vmul.f32 %v3457_v14, %v2624_v38  ;;  %v7181_v14 = vsub.f32 %v7149_v61, %v7180_v10 }
 0xb96   :  { %v3463_v55 = vmax.f32 %v3431_v62, 0.0  ;;  %v3464_v1 = vmax.f32 %v3432_v12, 0.0  ;;  %v7183_v62 = vsub.f32 %v7154_v28, %v7180_v10 }
 0xb97   :  { %v6478_v21 = vsel %vm2180_vm15, %v2738_v56, %v2734_v58  ;;  %v3572_v27 = vsel %vm7167_vm1, %v3521_v17, 0.0  ;;  %v3418_v39 = vadd.f32 %v6396_v50, %v7181_v14 }
 0xb98   :  { %v6485_v23 = vadd.f32 %v3572_v27, %v3571_v30  ;;  %v2642_v35 = vpop.permute.xlu1 %2641  ;;  %v3429_v30 = vadd.f32 %v6396_v50, %v7182_v32  ;;  %v3422_v27 = vadd.f32 %v6396_v50, %v7183_v62 }
 0xb99   :  { %v3527_v8 = vmul.f32 %v3463_v55, %v2642_v35  ;;  %v2767_v38 = vrot.slane %v2642_v35, %v6103_v47  ;;  %v3450_v55 = vmax.f32 %v3418_v39, 0.0 }
 0xb9a   :  { %v3454_v53 = vmax.f32 %v3422_v27, 0.0 }
 0xb9b   :  { %v3595_v61 = vsel %vm7184_vm11, %v3527_v8, 0.0  ;;  %v7189_v8 = vsub.f32 %v7177_v36, %v7164_v16  ;;  %vm7199_vm11 = vmmov %vm7167_vm1 }
 0xb9c   :  { %v2645_v58 = vpop.permute.xlu0 %2644 }
 0xb9d   :  { %v2771_v56 = vrot.slane %v2645_v58, %v6106_v2  ;;  %v3528_v17 = vmul.f32 %v3464_v1, %v2645_v58  ;;  %v7186_v58 = vld [vmem:[#allocation19_spill] sm:$0xff] }
 0xb9e   :  { %v7187_v22 = vsub.f32 %v7186_v58, %v7152_v54  ;;  %v7188_v28 = vsub.f32 %v7186_v58, %v7150_v44 }
 0xb9f   :  { %v6503_v12 = vsel %vm2173_vm3, %v2771_v56, %v2767_v38  ;;  %v3596_v35 = vsel %vm7185_vm8, %v3528_v17, 0.0  ;;  %v3433_v38 = vadd.f32 %v6396_v50, %v7189_v8  ;;  %vm7202_vm8 = vmmov %vm7167_vm1 }
 0xba0   :  { %v6506_v14 = vadd.f32 %v3596_v35, %v3595_v61  ;;  %v2603_v1 = vpop.permute.xlu1 %2602  ;;  %v3436_v32 = vadd.f32 %v6396_v50, %v7187_v22  ;;  %v3435_v62 = vadd.f32 %v6396_v50, %v7188_v28  ;;  %v3461_v35 = vmax.f32 %v3429_v30, 0.0  ;;  %v7192_v30 = vld [vmem:[#allocation20_spill] sm:$0xff] }
 0xba1   :  { %v2705_v39 = vrot.slane %v2603_v1, %v6118_v51  ;;  %v3514_v56 = vmul.f32 %v3450_v55, %v2603_v1  ;;  %v3465_v28 = vmax.f32 %v3433_v38, 0.0  ;;  %v7194_v1 = vsub.f32 %v7192_v30, %v7150_v44 }
 0xba2   :  { %v3468_v57 = vmax.f32 %v3436_v32, 0.0  ;;  %v3467_v11 = vmax.f32 %v3435_v62, 0.0 }
 0xba3   :  { %v2706_v17 = vsel %vm2187_vm10, %v2705_v39, %v2701_v46  ;;  %v3548_v61 = vsel %vm7190_vm13, %v3514_v56, 0.0  ;;  %v7191_v46 = vsub.f32 %v7159_v24, %v7180_v10  ;;  %v3439_v32 = vadd.f32 %v6396_v50, %v7194_v1  ;;  %vm7203_vm13 = vmmov %vm7167_vm1 }
 0xba4   :  { %v3549_v22 = vadd.f32 %v3548_v61, %v3547_v13  ;;  %v2636_v7 = vpop.permute.xlu1 %2635  ;;  %v2615_v15 = vpop.permute.xlu0 %2614  ;;  %v7193_v13 = vsub.f32 %v7192_v30, %v7152_v54 }
 0xba5   :  { %v2757_v3 = vrot.slane %v2636_v7, %v6109_v43  ;;  %v3525_v59 = vmul.f32 %v3461_v35, %v2636_v7  ;;  %v2724_v8 = vrot.slane %v2615_v15, %v6118_v51  ;;  %v3518_v31 = vmul.f32 %v3454_v53, %v2615_v15 }
 0xba6   :  { %v3550_v49 = vrot.slane %v3549_v22, 4  ;;  %v3426_v55 = vadd.f32 %v6396_v50, %v7191_v46  ;;  %v3440_v27 = vadd.f32 %v6396_v50, %v7193_v13  ;;  %v3471_v37 = vmax.f32 %v3439_v32, 0.0 }
 0xba7   :  { %v6538_v7 = vsel %vm2180_vm15, %v2757_v3, %v2753_v9  ;;  %v3585_v15 = vsel %vm7195_vm6, %v3525_v59, 0.0  ;;  %v2725_v24 = vsel %vm2187_vm10, %v2724_v8, %v6462_v41  ;;  %v3561_v53 = vsel %vm7196_vm14, %v3518_v31, 0.0  ;;  %vm7206_vm14 = vmmov %vm7167_vm1 }
 0xba8   :  { %v3551_v62 = vadd.f32 %v3550_v49, %v3549_v22  ;;  %v6544_v38 = vadd.f32 %v3585_v15, %v3584_v4  ;;  %v2840_v39 = vsel %vm2322_vm9, %v2725_v24, %v2706_v17  ;;  %v3562_v56 = vadd.f32 %v3561_v53, %v6465_v19  ;;  %v2657_v61 = vpop.permute.xlu1 %2656  ;;  %v2654_v35 = vpop.permute.xlu0 %2653 }
 0xba9   :  { %v2790_v46 = vrot.slane %v2657_v61, %v6106_v2  ;;  %v3532_v3 = vmul.f32 %v3468_v57, %v2657_v61  ;;  %v2786_v9 = vrot.slane %v2654_v35, %v6103_v47  ;;  %v3531_v59 = vmul.f32 %v3467_v11, %v2654_v35 }
 0xbaa   :  { %v3552_v13 = vrot.slane %v3551_v62, 2  ;;  %v3563_v1 = vrot.slane %v3562_v56, 4  ;;  %v7197_v31 = vsub.f32 %v7186_v58, %v7164_v16  ;;  %v7198_v41 = vsub.f32 %v7170_v34, %v7180_v10 }
 0xbab   :  { %v3609_v4 = vsel %vm7167_vm1, %v3532_v3, 0.0  ;;  %v2791_v17 = vsel %vm2173_vm3, %v2790_v46, %v2786_v9  ;;  %v3608_v57 = vsel %vm7199_vm11, %v3531_v59, 0.0  ;;  %v3458_v22 = vmax.f32 %v3426_v55, 0.0  ;;  %vm7208_vm11 = vmmov %vm7167_vm1 }
 0xbac   :  { %v3437_v49 = vadd.f32 %v6396_v50, %v7197_v31  ;;  %v3430_v19 = vadd.f32 %v6396_v50, %v7198_v41  ;;  %v3553_v11 = vadd.f32 %v3552_v13, %v3551_v62  ;;  %v3564_v8 = vadd.f32 %v3563_v1, %v3562_v56  ;;  %v2648_v24 = vpop.permute.xlu1 %2647  ;;  %v2627_v53 = vpop.permute.xlu0 %2626 }
 0xbad   :  { %v3610_v15 = vadd.f32 %v3609_v4, %v3608_v57  ;;  %v3472_v61 = vmax.f32 %v3440_v27, 0.0  ;;  %v2776_v35 = vrot.slane %v2648_v24, %v6109_v43  ;;  %v3529_v31 = vmul.f32 %v3465_v28, %v2648_v24 }
 0xbae   :  { %v2743_v34 = vrot.slane %v2627_v53, %v6118_v51  ;;  %v3522_v25 = vmul.f32 %v3458_v22, %v2627_v53  ;;  %v3565_v41 = vrot.slane %v3564_v8, 2  ;;  %v3469_v3 = vmax.f32 %v3437_v49, 0.0 }
 0xbaf   :  { %v7201_v46 = vsub.f32 %v7200_v60, %v7152_v54  ;;  %v6569_v62 = vsel %vm2180_vm15, %v2776_v35, %v6503_v12  ;;  %v3598_v27 = vsel %vm7202_vm8, %v3529_v31, 0.0  ;;  %v3554_v9 = vrot.slane %v3553_v11, 1  ;;  %vm7209_vm8 = vmmov %vm7167_vm1 }
 0xbb0   :  { %v2744_v28 = vsel %vm2187_vm10, %v2743_v34, %v6478_v21  ;;  %v3574_v56 = vsel %vm7203_vm13, %v3522_v25, 0.0  ;;  %v3566_v59 = vadd.f32 %v3565_v41, %v3564_v8  ;;  %v6576_v32 = vadd.f32 %v3598_v27, %v6506_v14  ;;  %v2669_v13 = vpop.permute.xlu1 %2668  ;;  %v2666_v1 = vpop.permute.xlu0 %2665  ;;  %vm7214_vm13 = vmmov %vm7167_vm1 }
 0xbb1   :  { %v3444_v55 = vadd.f32 %v6396_v50, %v7201_v46  ;;  %vm7204_vm6 = vcmask 1042434   ;;  %v3575_v49 = vadd.f32 %v3574_v56, %v6485_v23  ;;  %v2809_v12 = vrot.slane %v2669_v13, %v6106_v2 }
 0xbb2   :  { %v2841_v54 = vsel %vm7204_vm6, %v2744_v28, %v2840_v39  ;;  %v3536_v4 = vmul.f32 %v3472_v61, %v2669_v13  ;;  %v2805_v57 = vrot.slane %v2666_v1, %v6103_v47  ;;  %v3567_v22 = vrot.slane %v3566_v59, 1  ;;  %vm7215_vm6 = vmmov %vm7167_vm1 }
 0xbb3   :  { %v3535_v21 = vmul.f32 %v3471_v37, %v2666_v1  ;;  %v3462_v24 = vmax.f32 %v3430_v19, 0.0  ;;  %v7205_v25 = vsub.f32 %v7200_v60, %v7150_v44  ;;  %v3576_v8 = vrot.slane %v3575_v49, 4 }
 0xbb4   :  { %v3622_v39 = vsel %vm7206_vm14, %v3536_v4, 0.0  ;;  %v2810_v53 = vsel %vm2173_vm3, %v2809_v12, %v2805_v57  ;;  %v7207_v23 = vsub.f32 %v7192_v30, %v7164_v16  ;;  %v3555_v35 = vadd.f32 %v3554_v9, %v3553_v11  ;;  %v2660_v19 = vpop.permute.xlu1 %2659  ;;  %v2639_v34 = vpop.permute.xlu0 %2638 }
 0xbb5   :  { %v3443_v14 = vadd.f32 %v6396_v50, %v7205_v25  ;;  %v3568_v31 = vadd.f32 %v3567_v22, %v3566_v59  ;;  %v3621_v37 = vsel %vm7167_vm1, %v3535_v21, 0.0  ;;  %v3476_v41 = vmax.f32 %v3444_v55, 0.0 }
 0xbb6   :  { %v3441_v61 = vadd.f32 %v6396_v50, %v7207_v23  ;;  %v3577_v44 = vadd.f32 %v3576_v8, %v3575_v49  ;;  %v3623_v46 = vadd.f32 %v3622_v39, %v3621_v37  ;;  %v2795_v27 = vrot.slane %v2660_v19, %v6109_v43 }
 0xbb7   :  { %v3533_v28 = vmul.f32 %v3469_v3, %v2660_v19  ;;  %v3660_v56 = vsel %vm2322_vm9, %v3568_v31, %v3555_v35  ;;  %v2762_v13 = vrot.slane %v2639_v34, %v6118_v51  ;;  %v3526_v1 = vmul.f32 %v3462_v24, %v2639_v34 }
 0xbb8   :  { %v3475_v12 = vmax.f32 %v3443_v14, 0.0  ;;  %v3578_v4 = vrot.slane %v3577_v44, 2  ;;  %v2796_v11 = vsel %vm2180_vm15, %v2795_v27, %v2791_v17  ;;  %v3473_v59 = vmax.f32 %v3441_v61, 0.0  ;;  %v2681_v3 = vpop.permute.xlu1 %2680  ;;  %v2678_v22 = vpop.permute.xlu0 %2677 }
 0xbb9   :  { %v3611_v9 = vsel %vm7208_vm11, %v3533_v28, 0.0  ;;  %v2763_v55 = vsel %vm2187_vm10, %v2762_v13, %v6538_v7  ;;  %v3587_v49 = vsel %vm7209_vm8, %v3526_v1, 0.0  ;;  %v7210_v21 = vsub.f32 %v7177_v36, %v7180_v10  ;;  %vm7218_vm11 = vmmov %vm7167_vm1 }
 0xbba   :  { %v6598_v57 = vadd.f32 %v3611_v9, %v3610_v15  ;;  %v3579_v25 = vadd.f32 %v3578_v4, %v3577_v44  ;;  %v2842_v17 = vsel %vm2326_vm4, %v2763_v55, %v2841_v54  ;;  %v3588_v14 = vadd.f32 %v3587_v49, %v6544_v38  ;;  %vm7219_vm8 = vmmov %vm7167_vm1 }
 0xbbb   :  { %v3434_v24 = vadd.f32 %v6396_v50, %v7210_v21  ;;  %v2828_v15 = vrot.slane %v2681_v3, %v6106_v2  ;;  %v3540_v8 = vmul.f32 %v3476_v41, %v2681_v3  ;;  %v2824_v39 = vrot.slane %v2678_v22, %v6103_v47 }
 0xbbc   :  { %v3539_v7 = vmul.f32 %v3475_v12, %v2678_v22  ;;  %v7211_v23 = vsub.f32 %v7200_v60, %v7164_v16  ;;  %v3580_v35 = vrot.slane %v3579_v25, 1  ;;  %v3589_v36 = vrot.slane %v3588_v14, 4  ;;  %v2672_v41 = vpop.permute.xlu1 %2671  ;;  %v2651_v44 = vpop.permute.xlu0 %2650 }
 0xbbd   :  { %v7212_v31 = vsub.f32 %v7186_v58, %v7180_v10  ;;  %v7213_v38 = vsub.f32 %v7200_v60, %v7180_v10  ;;  %v3635_v19 = vsel %vm7214_vm13, %v3540_v8, 0.0  ;;  %v2829_v34 = vsel %vm2173_vm3, %v2828_v15, %v2824_v39  ;;  %vm7220_vm13 = vmmov %vm7167_vm1 }
 0xbbe   :  { %v3445_v61 = vadd.f32 %v6396_v50, %v7211_v23  ;;  %v3634_v16 = vsel %vm7215_vm6, %v3539_v7, 0.0  ;;  %v3466_v27 = vmax.f32 %v3434_v24, 0.0  ;;  %v3581_v28 = vadd.f32 %v3580_v35, %v3579_v25  ;;  %vm7221_vm6 = vmmov %vm7167_vm1 }
 0xbbf   :  { %v3438_v54 = vadd.f32 %v6396_v50, %v7212_v31  ;;  %v3446_v37 = vadd.f32 %v6396_v50, %v7213_v38  ;;  %v3590_v13 = vadd.f32 %v3589_v36, %v3588_v14  ;;  %v3636_v1 = vadd.f32 %v3635_v19, %v3634_v16 }
 0xbc0   :  { %v2814_v58 = vrot.slane %v2672_v41, %v6109_v43  ;;  %v3537_v12 = vmul.f32 %v3473_v59, %v2672_v41  ;;  %v2781_v4 = vrot.slane %v2651_v44, %v6118_v51  ;;  %v3530_v60 = vmul.f32 %v3466_v27, %v2651_v44  ;;  %v2684_v14 = vpop.permute.xlu1 %2683  ;;  %v2663_v15 = vpop.permute.xlu0 %2662 }
 0xbc1   :  { %v7216_v9 = vsub.f32 %v7192_v30, %v7180_v10  ;;  %vm7217_vm14 = vcmask 1042434   ;;  %v3591_v3 = vrot.slane %v3590_v13, 2  ;;  %v3477_v21 = vmax.f32 %v3445_v61, 0.0 }
 0xbc2   :  { %v3661_v49 = vsel %vm7217_vm14, %v3581_v28, %v3660_v56  ;;  %v2815_v22 = vsel %vm2180_vm15, %v2814_v58, %v2810_v53  ;;  %v3624_v24 = vsel %vm7167_vm1, %v3537_v12, 0.0  ;;  %v2782_v25 = vsel %vm2187_vm10, %v2781_v4, %v6569_v62  ;;  %vm7222_vm14 = vmmov %vm7167_vm1 }
 0xbc3   :  { %v3442_v55 = vadd.f32 %v6396_v50, %v7216_v9  ;;  %v3600_v59 = vsel %vm7218_vm11, %v3530_v60, 0.0  ;;  %v3470_v8 = vmax.f32 %v3438_v54, 0.0  ;;  %v3592_v39 = vadd.f32 %v3591_v3, %v3590_v13 }
 0xbc4   :  { %v3625_v10 = vadd.f32 %v3624_v24, %v3623_v46  ;;  %v2843_v50 = vsel %vm2328_vm0, %v2782_v25, %v2842_v17  ;;  %v3601_v30 = vadd.f32 %v3600_v59, %v6576_v32  ;;  %v2833_v56 = vrot.slane %v2684_v14, %v6109_v43  ;;  %v2687_v38 = vpop.permute.xlu1 %2686  ;;  %v2675_v32 = vpop.permute.xlu0 %2674 }
 0xbc5   :  { %v3541_v53 = vmul.f32 %v3477_v21, %v2684_v14  ;;  %v2800_v7 = vrot.slane %v2663_v15, %v6118_v51  ;;  %v3534_v23 = vmul.f32 %v3470_v8, %v2663_v15  ;;  %v3593_v61 = vrot.slane %v3592_v39, 1 }
 0xbc6   :  { %v3602_v35 = vrot.slane %v3601_v30, 4  ;;  %v3478_v62 = vmax.f32 %v3446_v37, 0.0  ;;  %v3474_v36 = vmax.f32 %v3442_v55, 0.0  ;;  %v2834_v31 = vsel %vm2180_vm15, %v2833_v56, %v2829_v34 }
 0xbc7   :  { %v3637_v54 = vsel %vm7219_vm8, %v3541_v53, 0.0  ;;  %v2801_v46 = vsel %vm2187_vm10, %v2800_v7, %v2796_v11  ;;  %v3613_v17 = vsel %vm7220_vm13, %v3534_v23, 0.0  ;;  %v3594_v19 = vadd.f32 %v3593_v61, %v3592_v39 }
 0xbc8   :  { %v3603_v16 = vadd.f32 %v3602_v35, %v3601_v30  ;;  %v3638_v41 = vadd.f32 %v3637_v54, %v3636_v1  ;;  %v3614_v44 = vadd.f32 %v3613_v17, %v6598_v57  ;;  %v2838_v27 = vrot.slane %v2687_v38, %v6118_v51  ;;  %v6654_v9 = vpop.permute.xlu1 %2862  ;;  %v6656_v57 = vpop.permute.xlu0 %2858 }
 0xbc9   :  { %v3542_v28 = vmul.f32 %v3478_v62, %v2687_v38  ;;  %v2819_v37 = vrot.slane %v2675_v32, %v6118_v51  ;;  %v3538_v13 = vmul.f32 %v3474_v36, %v2675_v32  ;;  %v3662_v12 = vsel %vm2326_vm4, %v3594_v19, %v3661_v49 }
 0xbca   :  { %v3604_v34 = vrot.slane %v3603_v16, 2  ;;  %v3615_v58 = vrot.slane %v3614_v44, 4  ;;  %v2844_v11 = vsel %vm2330_vm12, %v2801_v46, %v2843_v50  ;;  %v2839_v55 = vsel %vm2187_vm10, %v2838_v27, %v2834_v31 }
 0xbcb   :  { %v3639_v4 = vsel %vm7221_vm6, %v3542_v28, 0.0  ;;  %v2820_v60 = vsel %vm2187_vm10, %v2819_v37, %v2815_v22  ;;  %v3626_v1 = vsel %vm7222_vm14, %v3538_v13, 0.0  ;;  %v2877_v49 = vmul.f32 %v6654_v9, %v6204_v63  ;;  %v7224_v13 = vld [vmem:[#allocation38_spill] sm:$0xff] }
 0xbcc   :  { %v3605_v3 = vadd.f32 %v3604_v34, %v3603_v16  ;;  %v3616_v21 = vadd.f32 %v3615_v58, %v3614_v44  ;;  %v3640_v24 = vadd.f32 %v3639_v4, %v3638_v41  ;;  %v3627_v25 = vadd.f32 %v3626_v1, %v3625_v10  ;;  %v2871_v16 = vpop.permute.xlu1 %2870  ;;  %v7226_v58 = vld [vmem:[#allocation41_spill] sm:$0xff]  ;;  %v7230_v1 = vld [vmem:[#allocation22_spill] sm:$0xff] }
 0xbcd   :  { %v2876_v59 = vmul.f32 %v6656_v57, %v6199_v5  ;;  %2944 = vperm.xlu1 %4484, %v2877_v49   ;;  %v2881_v53 = vmul.f32 %v6654_v9, %v6214_v45  ;;  %v2880_v10 = vmul.f32 %v6656_v57, %v6209_v33  ;;  %v6667_v5 = vpop.permute.xlu0 %2866  ;;  %v2885_v32 = vmul.f32 %v6654_v9, %v6224_v20  ;;  %v7233_v49 = vld [vmem:[#allocation29_spill] sm:$0xff] }
 0xbce   :  { %v3606_v14 = vrot.slane %v3605_v3, 1  ;;  %v3617_v22 = vrot.slane %v3616_v21, 2  ;;  %v3641_v15 = vrot.slane %v3640_v24, 4  ;;  %v3628_v8 = vrot.slane %v3627_v25, 4 }
 0xbcf   :  { %2941 = vperm.xlu0 %4483, %v2876_v59   ;;  %v2882_v31 = vmul.f32 %v6667_v5, %v6234_v6  ;;  %v2878_v45 = vmul.f32 %v6667_v5, %v6229_v26  ;;  %v2884_v19 = vmul.f32 %v6656_v57, %v6219_v0  ;;  %v2845_v41 = vsel %vm2332_vm5, %v2820_v60, %v2844_v11 }
 0xbd0   :  { %v3607_v39 = vadd.f32 %v3606_v14, %v3605_v3  ;;  %v3618_v50 = vadd.f32 %v3617_v22, %v3616_v21  ;;  %v3642_v30 = vadd.f32 %v3641_v15, %v3640_v24  ;;  %v3629_v56 = vadd.f32 %v3628_v8, %v3627_v25  ;;  %v7231_v3 = vld [vmem:[#allocation31_spill] sm:$0xff]  ;;  %v7232_v24 = vld [vmem:[#allocation24_spill] sm:$0xff]  ;;  %v7234_v14 = vld [vmem:[#allocation30_spill] sm:$0xff] }
 0xbd1   :  { %2956 = vperm.xlu1 %4484, %v2881_v53   ;;  %v2846_v44 = vsel %vm2334_vm7, %v2839_v55, %v2845_v41  ;;  %v2883_v27 = vmul.f32 %v2871_v16, %v6273_v52  ;;  %v2879_v20 = vmul.f32 %v2871_v16, %v6264_v40  ;;  %vm7223_vm11 = vmmov 0   ;;  %v7225_v40 = vld [vmem:[#allocation39_spill] sm:$0xff]  ;;  %v7235_v15 = vld [vmem:[#allocation36_spill] sm:$0xff]  ;;  %v7238_v53 = vld [vmem:[#allocation33_spill] sm:$0xff] }
 0xbd2   :  { %v3619_v63 = vrot.slane %v3618_v50, 1  ;;  %v3643_v7 = vrot.slane %v3642_v30, 2  ;;  %v3630_v23 = vrot.slane %v3629_v56, 2  ;;  %v3663_v61 = vsel %vm2328_vm0, %v3607_v39, %v3662_v12  ;;  %v7236_v39 = vld [vmem:[#allocation23_spill] sm:$0xff] }
 0xbd3   :  { %2953 = vperm.xlu0 %4483, %v2880_v10   ;;  %v2888_v0 = vmul.f32 %v6656_v57, %v6243_v48  ;;  %v2886_v28 = vmul.f32 %v6667_v5, %v6249_v29  ;;  %v2887_v37 = vmul.f32 %v2871_v16, %v6293_v18  ;;  %v2889_v52 = vmul.f32 %v6654_v9, %v7224_v13  ;;  %v7227_v48 = vld [vmem:[#allocation26_spill] sm:$0xff]  ;;  %v7228_v29 = vld [vmem:[#allocation40_spill] sm:$0xff]  ;;  %v7229_v18 = vld [vmem:[#allocation27_spill] sm:$0xff] }
 0xbd4   :  { %v3620_v35 = vadd.f32 %v3619_v63, %v3618_v50  ;;  %v3644_v62 = vadd.f32 %v3643_v7, %v3642_v30  ;;  %v3631_v36 = vadd.f32 %v3630_v23, %v3629_v56  ;;  %v2892_v34 = vmul.f32 %v6656_v57, %v7225_v40  ;;  %v7237_v30 = vld [vmem:[#allocation34_spill] sm:$0xff]  ;;  %v7239_v63 = vld [vmem:[#allocation37_spill] sm:$0xff] }
 0xbd5   :  { %2959 = vperm.xlu1 %4484, %v2882_v31   ;;  %v2890_v12 = vmul.f32 %v6667_v5, %v7226_v58  ;;  %v2891_v11 = vmul.f32 %v2871_v16, %v7227_v48  ;;  %v2893_v4 = vmul.f32 %v6654_v9, %v7228_v29  ;;  %v2896_v60 = vmul.f32 %v6656_v57, %v7229_v18  ;;  %v7240_v23 = vld [vmem:[#allocation25_spill] sm:$0xff] }
 0xbd6   :  { %v3645_v54 = vrot.slane %v3644_v62, 1  ;;  %v3632_v33 = vrot.slane %v3631_v36, 1  ;;  %v3664_v46 = vsel %vm2330_vm12, %v3620_v35, %v3663_v61  ;;  %v2894_v55 = vmul.f32 %v6667_v5, %v7230_v1  ;;  %v7241_v35 = vld [vmem:[#allocation32_spill] sm:$0xff] }
 0xbd7   :  { %2947 = vperm.xlu0 %4483, %v2878_v45   ;;  %v2895_v21 = vmul.f32 %v2871_v16, %v7231_v3  ;;  %v2897_v25 = vmul.f32 %v6654_v9, %v7232_v24  ;;  %v2900_v59 = vmul.f32 %v6656_v57, %v7233_v49  ;;  %v2898_v22 = vmul.f32 %v6667_v5, %v7234_v14 }
 0xbd8   :  { %v3633_v17 = vadd.f32 %v3632_v33, %v3631_v36  ;;  %v3646_v38 = vadd.f32 %v3645_v54, %v3644_v62  ;;  %v2899_v8 = vmul.f32 %v2871_v16, %v7235_v15  ;;  %v2901_v50 = vmul.f32 %v6654_v9, %v7236_v39  ;;  %v7242_v36 = vld [vmem:[#allocation28_spill] sm:$0xff] }
 0xbd9   :  { %2968 = vperm.xlu1 %4484, %v2885_v32   ;;  %v2904_v56 = vmul.f32 %v6656_v57, %v7237_v30  ;;  %v2902_v10 = vmul.f32 %v6667_v5, %v7238_v53  ;;  %v2903_v7 = vmul.f32 %v2871_v16, %v7239_v63  ;;  %v2905_v61 = vmul.f32 %v6654_v9, %v7240_v23 }
 0xbda   :  { %v3665_v6 = vsel %vm2332_vm5, %v3633_v17, %v3664_v46  ;;  %v2907_v62 = vmul.f32 %v2871_v16, %v7241_v35  ;;  %v2906_v31 = vmul.f32 %v6667_v5, %v7242_v36  ;;  %v2848_v57 = vsel %vm201_vm2, %v2846_v44, 0.0 }
 0xbdb   :  { %2965 = vperm.xlu0 %4483, %v2884_v19   ;;  %v3666_v26 = vsel %vm2334_vm7, %v3646_v38, %v3665_v6  ;;  %vm7243_vm8 = vcmask 1042434  }
 0xbdc   :  { %4435 = vmatmul.mubr.msk.f32.vlgmr.msra.gmra.mxu1 %vm7167_vm1, %v3666_v26 }
 0xbdd   :  { %4464 = vmatprep.mubr.msk.f32.mxu1 %vm7223_vm11, %v7148_v42  ;;  %2962 = vperm.xlu1 %4484, %v2883_v27  }
 0xbdf   :  { %2950 = vperm.xlu0 %4483, %v2879_v20  }
 0xbe1   :  { %2977 = vperm.xlu1 %4484, %v2888_v0  }
 0xbe3   :  { %2971 = vperm.xlu0 %4483, %v2886_v28  }
 0xbe5   :  { %2974 = vperm.xlu1 %4484, %v2887_v37  }
 0xbe7   :  { %2980 = vperm.xlu0 %4483, %v2889_v52  }
 0xbe9   :  { %2989 = vperm.xlu1 %4484, %v2892_v34  }
 0xbeb   :  { %2983 = vperm.xlu0 %4483, %v2890_v12  }
 0xbed   :  { %2986 = vperm.xlu1 %4484, %v2891_v11  }
 0xbef   :  { %2992 = vperm.xlu0 %4483, %v2893_v4  }
 0xbf1   :  { %3001 = vperm.xlu1 %4484, %v2896_v60  }
 0xbf3   :  { %2995 = vperm.xlu0 %4483, %v2894_v55  }
 0xbf5   :  { %2998 = vperm.xlu1 %4484, %v2895_v21  }
 0xbf7   :  { %3004 = vperm.xlu0 %4483, %v2897_v25  }
 0xbf9   :  { %3013 = vperm.xlu1 %4484, %v2900_v59  }
 0xbfb   :  { %3007 = vperm.xlu0 %4483, %v2898_v22  }
 0xbfd   :  { %3010 = vperm.xlu1 %4484, %v2899_v8  }
 0xbff   :  { %3016 = vperm.xlu0 %4483, %v2901_v50  }
 0xc01   :  { %3025 = vperm.xlu1 %4484, %v2904_v56  }
 0xc03   :  { %3019 = vperm.xlu0 %4483, %v2902_v10  }
 0xc05   :  { %3022 = vperm.xlu1 %4484, %v2903_v7  }
 0xc07   :  { %3028 = vperm.xlu0 %4483, %v2905_v61  }
 0xc09   :  { %3034 = vperm.xlu1 %4484, %v2907_v62  }
 0xc0b   :  { %3031 = vperm.xlu0 %4483, %v2906_v31  }
 0xc2a   :  { %2849 = vadd.xlane.f32.xlu0 %v2848_v57 }
 0xc48   :  { %v2945_v45 = vpop.permute.xlu1 %2944 }
 0xc49   :  { %v3043_v58 = vrot.slane %v2945_v45, %v6106_v2 }
 0xc4a   :  { %v2942_v54 = vpop.permute.xlu0 %2941 }
 0xc4b   :  { %v3039_v12 = vrot.slane %v2942_v54, %v6103_v47 }
 0xc4c   :  { %v2957_v33 = vpop.permute.xlu1 %2956 }
 0xc4d   :  { %v3062_v48 = vrot.slane %v2957_v33, %v6106_v2  ;;  %v3044_v25 = vsel %vm2173_vm3, %v3043_v58, %v3039_v12 }
 0xc4e   :  { %v2954_v46 = vpop.permute.xlu0 %2953 }
 0xc4f   :  { %v3058_v11 = vrot.slane %v2954_v46, %v6103_v47 }
 0xc50   :  { %v2960_v17 = vpop.permute.xlu1 %2959 }
 0xc51   :  { %v3067_v29 = vrot.slane %v2960_v17, %v6109_v43  ;;  %v3063_v49 = vsel %vm2173_vm3, %v3062_v48, %v3058_v11 }
 0xc52   :  { %v2948_v38 = vpop.permute.xlu0 %2947 }
 0xc53   :  { %v3048_v4 = vrot.slane %v2948_v38, %v6109_v43  ;;  %v3068_v14 = vsel %vm2180_vm15, %v3067_v29, %v3063_v49 }
 0xc54   :  { %v2969_v32 = vpop.permute.xlu1 %2968 }
 0xc55   :  { %v3081_v18 = vrot.slane %v2969_v32, %v6106_v2  ;;  %v3049_v22 = vsel %vm2180_vm15, %v3048_v4, %v3044_v25  ;;  %v7244_v25 = vld [vmem:[#allocation2_spill] sm:$0xff] }
 0xc56   :  { %v2966_v9 = vpop.permute.xlu0 %2965 }
 0xc57   :  { %v3077_v60 = vrot.slane %v2966_v9, %v6103_v47 }
 0xc58   :  { %v2963_v19 = vpop.permute.xlu1 %2962 }
 0xc59   :  { %v3072_v1 = vrot.slane %v2963_v19, %v6118_v51  ;;  %v3082_v15 = vsel %vm2173_vm3, %v3081_v18, %v3077_v60 }
 0xc5a   :  { %v2951_v6 = vpop.permute.xlu0 %2950 }
 0xc5b   :  { %v3053_v55 = vrot.slane %v2951_v6, %v6118_v51  ;;  %v3073_v8 = vsel %vm2187_vm10, %v3072_v1, %v3068_v14 }
 0xc5c   :  { %v2978_v26 = vpop.permute.xlu1 %2977 }
 0xc5d   :  { %v3054_v39 = vsel %vm2187_vm10, %v3053_v55, %v3049_v22  ;;  %v3096_v53 = vrot.slane %v2978_v26, %v6103_v47 }
 0xc5e   :  { %v2972_v16 = vpop.permute.xlu0 %2971 }
 0xc5f   :  { %v3086_v24 = vrot.slane %v2972_v16, %v6109_v43 }
 0xc60   :  { %v2975_v41 = vpop.permute.xlu1 %2974 }
 0xc61   :  { %v3091_v59 = vrot.slane %v2975_v41, %v6118_v51  ;;  %v3087_v10 = vsel %vm2180_vm15, %v3086_v24, %v3082_v15  ;;  %v6794_v24 = vld [vmem:[%s6897_s3 + $0x138] sm:$0xff] }
 0xc62   :  { %v2981_v27 = vpop.permute.xlu0 %2980  ;;  %v3650_v49 = vrot.slane %v6794_v24, %v7244_v25  ;;  %v77_v25 = vld [vmem:[%s6901_s4] sm:$0xff] }
 0xc63   :  { %v3100_v50 = vrot.slane %v2981_v27, %v6106_v2  ;;  %v3092_v23 = vsel %vm2187_vm10, %v3091_v59, %v3087_v10 }
 0xc64   :  { %v2990_v5 = vpop.permute.xlu1 %2989 }
 0xc65   :  { %v3115_v36 = vrot.slane %v2990_v5, %v6103_v47  ;;  %v3101_v54 = vsel %vm2173_vm3, %v3100_v50, %v3096_v53 }
 0xc66   :  { %v2984_v20 = vpop.permute.xlu0 %2983 }
 0xc67   :  { %v3105_v63 = vrot.slane %v2984_v20, %v6109_v43  ;;  %v3188_v20 = vsel %vm2322_vm9, %v3073_v8, %v3054_v39  ;;  %v7245_v39 = vld [vmem:[#allocation3_spill] sm:$0xff] }
 0xc68   :  { %v2987_v0 = vpop.permute.xlu1 %2986  ;;  %v3745_v50 = vrot.slane %v6794_v24, %v7245_v39 }
 0xc69   :  { %v3110_v61 = vrot.slane %v2987_v0, %v6118_v51  ;;  %v3106_v9 = vsel %vm2180_vm15, %v3105_v63, %v3101_v54  ;;  %v73_v54 = vld [vmem:[%s6897_s3 + $0x120] sm:$0xff] }
 0xc6a   :  { %v2993_v28 = vpop.permute.xlu0 %2992 }
 0xc6b   :  { %v3119_v7 = vrot.slane %v2993_v28, %v6106_v2  ;;  %v3111_v16 = vsel %vm2187_vm10, %v3110_v61, %v3106_v9 }
 0xc6c   :  { %v3002_v44 = vpop.permute.xlu1 %3001 }
 0xc6d   :  { %v3134_v33 = vrot.slane %v3002_v44, %v6103_v47  ;;  %v3120_v19 = vsel %vm2173_vm3, %v3119_v7, %v3115_v36  ;;  %v34_v36 = vld [vmem:[%s6899_s2 + $0x70] sm:$0xff] }
 0xc6e   :  { %v2996_v37 = vpop.permute.xlu0 %2995 }
 0xc6f   :  { %v3124_v35 = vrot.slane %v2996_v37, %v6109_v43  ;;  %v3189_v37 = vsel %vm7243_vm8, %v3092_v23, %v3188_v20 }
 0xc70   :  { %v2999_v13 = vpop.permute.xlu1 %2998 }
 0xc71   :  { %v3129_v31 = vrot.slane %v2999_v13, %v6118_v51  ;;  %v3125_v41 = vsel %vm2180_vm15, %v3124_v35, %v3120_v19  ;;  %v7247_v19 = vld [vmem:[#allocation4_spill] sm:$0xff] }
 0xc72   :  { %v3005_v52 = vpop.permute.xlu0 %3004 }
 0xc73   :  { %v3138_v62 = vrot.slane %v3005_v52, %v6106_v2  ;;  %v3130_v0 = vsel %vm2187_vm10, %v3129_v31, %v3125_v41  ;;  %v33_v31 = vld [vmem:[%s6899_s2 + $0x68] sm:$0xff]  ;;  %v7248_v41 = vld [vmem:[#allocation5_spill] sm:$0xff] }
 0xc74   :  { %v3014_v40 = vpop.permute.xlu1 %3013 }
 0xc75   :  { %v3153_v6 = vrot.slane %v3014_v40, %v6103_v47  ;;  %v3139_v27 = vsel %vm2173_vm3, %v3138_v62, %v3134_v33  ;;  %v35_v62 = vld [vmem:[%s6899_s2 + $0x78] sm:$0xff] }
 0xc76   :  { %v3008_v34 = vpop.permute.xlu0 %3007  ;;  %4438 = vmatpush3.msra.mxu0 %v35_v62  ;;  %v72_v33 = vld [vmem:[%s6897_s3 + $0x118] sm:$0xff] }
 0xc77   :  { %v3143_v57 = vrot.slane %v3008_v34, %v6109_v43  ;;  %4439 = vmatprep.subr.mxu0 %v7148_v42 }
 0xc78   :  { %v3011_v3 = vpop.permute.xlu1 %3010  ;;  %4440 = vmatpush3.msra.mxu0 %v34_v36 }
 0xc79   :  { %v3148_v46 = vrot.slane %v3011_v3, %v6118_v51  ;;  %v3144_v28 = vsel %vm2180_vm15, %v3143_v57, %v3139_v27  ;;  %4441 = vmatprep.subr.mxu0 %v7148_v42  ;;  %v32_v57 = vld [vmem:[%s6899_s2 + $0x60] sm:$0xff]  ;;  %v3768_v27 = vrot.slane %v6794_v24, %v7248_v41 }
 0xc7a   :  { %v3017_v21 = vpop.permute.xlu0 %3016  ;;  %4442 = vmatpush3.msra.mxu0 %v33_v31 }
 0xc7b   :  { %v3157_v45 = vrot.slane %v3017_v21, %v6106_v2  ;;  %v3149_v13 = vsel %vm2187_vm10, %v3148_v46, %v3144_v28  ;;  %4443 = vmatprep.subr.mxu0 %v7148_v42  ;;  %v71_v46 = vld [vmem:[%s6897_s3 + $0x110] sm:$0xff]  ;;  %v68_v28 = vld [vmem:[%s6897_s3 + $0xf8] sm:$0xff] }
 0xc7c   :  { %v3026_v30 = vpop.permute.xlu1 %3025  ;;  %4444 = vmatpush3.msra.mxu0 %v32_v57 }
 0xc7d   :  { %v3158_v44 = vsel %vm2173_vm3, %v3157_v45, %v3153_v6  ;;  %v3172_v52 = vrot.slane %v3026_v30, %v6103_v47  ;;  %v7246_v30 = vld [vmem:[#allocation7_spill] sm:$0xff]  ;;  %4467 = vmatprep.subr.mxu0 %v7148_v42  ;;  %v3763_v6 = vrot.slane %v6794_v24, %v7247_v19 }
 0xc7e   :  { %v3020_v56 = vpop.permute.xlu0 %3019  ;;  %v74_v45 = vld [vmem:[%s6897_s3 + $0x128] sm:$0xff] }
 0xc7f   :  { %v3162_v17 = vrot.slane %v3020_v56, %v6109_v43  ;;  %4449 = vmatpush3.msra.mxu1 %v74_v45 }
 0xc80   :  { %v3023_v38 = vpop.permute.xlu1 %3022  ;;  %4450 = vmatprep.subr.mxu1 %v7148_v42 }
 0xc81   :  { %v3167_v26 = vrot.slane %v3023_v38, %v6118_v51  ;;  %v3163_v40 = vsel %vm2180_vm15, %v3162_v17, %v3158_v44  ;;  %4451 = vmatpush3.msra.mxu1 %v73_v54  ;;  %v70_v17 = vld [vmem:[%s6897_s3 + $0x108] sm:$0xff]  ;;  %v67_v44 = vld [vmem:[%s6897_s3 + $0xf0] sm:$0xff] }
 0xc82   :  { %v3029_v32 = vpop.permute.xlu0 %3028  ;;  %4452 = vmatprep.subr.mxu1 %v7148_v42 }
 0xc83   :  { %v3176_v5 = vrot.slane %v3029_v32, %v6106_v2  ;;  %v3190_v2 = vsel %vm2326_vm4, %v3111_v16, %v3189_v37  ;;  %v3168_v12 = vsel %vm2187_vm10, %v3167_v26, %v3163_v40  ;;  %4453 = vmatpush3.msra.mxu1 %v72_v33  ;;  %v4514_v37 = vld [vmem:[%s6899_s2 + $0x80] sm:$0xff] }
 0xc84   :  { %v3035_v34 = vpop.permute.xlu1 %3034  ;;  %v3191_v29 = vsel %vm2328_vm0, %v3130_v0, %v3190_v2  ;;  %4454 = vmatprep.subr.mxu1 %v7148_v42  ;;  %v69_v0 = vld [vmem:[%s6897_s3 + $0x100] sm:$0xff]  ;;  %vm7249_vm0 = vmmov %vm7167_vm1 }
 0xc85   :  { %v3186_v48 = vrot.slane %v3035_v34, %v6118_v51  ;;  %v3177_v4 = vsel %vm2173_vm3, %v3176_v5, %v3172_v52  ;;  %v3192_v47 = vsel %vm2330_vm12, %v3149_v13, %v3191_v29  ;;  %4455 = vmatpush3.msra.mxu1 %v71_v46  ;;  %v3773_v13 = vrot.slane %v4514_v37, %v7248_v41  ;;  %v7250_v2 = vld [vmem:[#allocation6_spill] sm:$0xff] }
 0xc86   :  { %v3032_v58 = vpop.permute.xlu0 %3031  ;;  %v3193_v1 = vsel %vm2332_vm5, %v3168_v12, %v3192_v47  ;;  %4456 = vmatprep.subr.mxu1 %v7148_v42  ;;  %v3925_v12 = vrot.slane %v6794_v24, %v7250_v2 }
 0xc87   :  { %v3181_v11 = vrot.slane %v3032_v58, %v6109_v43  ;;  %4457 = vmatpush3.msra.mxu1 %v70_v17 }
 0xc88   :  { %4458 = vmatprep.subr.mxu1 %v7148_v42 }
 0xc89   :  { %v3182_v18 = vsel %vm2180_vm15, %v3181_v11, %v3177_v4  ;;  %4459 = vmatpush3.msra.mxu1 %v69_v0 }
 0xc8a   :  { %v3187_v60 = vsel %vm2187_vm10, %v3186_v48, %v3182_v18  ;;  %4460 = vmatprep.subr.mxu1 %v7148_v42 }
 0xc8b   :  { %v3194_v55 = vsel %vm2334_vm7, %v3187_v60, %v3193_v1  ;;  %4461 = vmatpush3.msra.mxu1 %v68_v28 }
 0xc8c   :  { %v3196_v3 = vsel %vm201_vm2, %v3194_v55, 0.0  ;;  %4462 = vmatprep.subr.mxu1 %v7148_v42 }
 0xc8d   :  { %3197 = vadd.xlane.f32.xlu1 %v3196_v3  ;;  %4463 = vmatpush3.msra.mxu1 %v67_v44 }
 0xc9c   :  { %v3735_v51 = vpop.f32.mrf.mxu1 }
 0xc9e   :  { %v4436_v21 = vpop.f32.mrf.mxu1 }
 0xc9f   :  { %v79_v21 = vld [vmem:[%s6901_s4 + $0x10] sm:$0xff] }
 0xcb3   :  { %v2850_v43 = vpop.xlane.xlu0 %2849 }
 0xcb4   :  { %4507 = vrcp.f32 %v2850_v43  ;;  %v78_v43 = vld [vmem:[%s6901_s4 + $0x8] sm:$0xff] }
 0xcc1   :  { %v4508_v15 = vpop.eup %4507 }
 0xd16   :  { %v3198_v59 = vpop.xlane.xlu1 %3197 }
 0xd17   :  { %v3651_v14 = vmul.f32 %v3650_v49, %v3198_v59 }
 0xd19   :  { %v3739_v22 = vadd.f32 %v3735_v51, %v3651_v14  ;;  %v80_v51 = vld [vmem:[%s6901_s4 + $0x18] sm:$0xff] }
 0xd1b   :  { %v3740_v8 = vmul.f32 %v4508_v15, %v3739_v22  ;;  %v7251_v22 = vld [vmem:[#allocation8_spill] sm:$0xff] }
 0xd1c   :  { %v3943_v15 = vrot.slane %v6794_v24, %v7251_v22 }
 0xd1d   :  { %v3741_v56 = vadd.f32 %v3740_v8, %v7246_v30 }
 0xd1f   :  { %v6801_v53 = vadd.f32 %v3745_v50, %v3741_v56  ;;  %v7252_v50 = vld [vmem:[#allocation9_spill] sm:$0xff] }
 0xd20   :  { %v3948_v30 = vrot.slane %v6794_v24, %v7252_v50 }
 0xd21   :  { %v3747_v10 = vsel %vm201_vm2, %v6801_v53, 0.0 }
 0xd22   :  { %3748 = vadd.xlane.f32.xlu0 %v3747_v10 }
 0xdab   :  { %v3749_v63 = vpop.xlane.xlu0 %3748 }
 0xdac   :  { %v3750_v7 = vmul.f32 0.03125, %v3749_v63 }
 0xdae   :  { %v3751_v23 = vsub.f32 %v6801_v53, %v3750_v7 }
 0xdb0   :  { %v3752_v61 = vmul.f32 %v3751_v23, %v3751_v23 }
 0xdb2   :  { %v3753_v35 = vsel %vm201_vm2, %v3752_v61, 0.0 }
 0xdb3   :  { %3754 = vadd.xlane.f32.xlu0 %v3753_v35 }
 0xe3c   :  { %v3755_v38 = vpop.xlane.xlu0 %3754 }
 0xe3d   :  { %v3756_v32 = vmul.f32 0.03125, %v3755_v38 }
 0xe3f   :  { %v3757_v9 = vadd.f32 1e-05, %v3756_v32 }
 0xe41   :  { %4509 = vrsqrt.f32 %v3757_v9 }
 0xe4e   :  { %v4510_v26 = vpop.eup %4509 }
 0xe4f   :  { %v3759_v16 = vmul.f32 %v4510_v26, %v3751_v23 }
 0xe51   :  { %v3764_v5 = vmul.f32 %v3763_v6, %v3759_v16 }
 0xe53   :  { %v3769_v20 = vadd.f32 %v3768_v27, %v3764_v5 }
 0xe55   :  { %4446 = vmatmul.mubr.msk.f32.vlgmr.msra.gmra.mxu0 %vm201_vm2, %v3769_v20 }
 0xe56   :  { %4475 = vmatprep.mubr.msk.f32.mxu0 %vm7223_vm11, %v7148_v42  ;;  %4468 = vmatpush3.msra.mxu0 %v80_v51 }
 0xe57   :  { %4469 = vmatprep.subr.mxu0 %v7148_v42 }
 0xe58   :  { %4470 = vmatpush3.msra.mxu0 %v79_v21 }
 0xe59   :  { %4471 = vmatprep.subr.mxu0 %v7148_v42 }
 0xe5a   :  { %4472 = vmatpush3.msra.mxu0 %v78_v43 }
 0xe5b   :  { %4473 = vmatprep.subr.mxu0 %v7148_v42  ;;  %v4114_v42 = vld [vmem:[%s6901_s4 + $0x20] ss:$0 sm:$0xff] }
 0xe5c   :  { %4474 = vmatpush3.msra.mxu0 %v77_v25 }
 0xf15   :  { %v3843_v52 = vpop.f32.mrf.mxu0 }
 0xf16   :  { %v3844_v40 = vadd.f32 %v3843_v52, %v3773_v13 }
 0xf17   :  { %v4447_v34 = vpop.f32.mrf.mxu0 }
 0xf18   :  { %v3847_v58 = vmax.f32 %v3844_v40, 0.0 }
 0xf1a   :  { %4465 = vmatmul.mubr.msk.f32.vlgmr.msra.gmra.mxu1 %vm7249_vm0, %v3847_v58 }
 0xfda   :  { %v3917_v48 = vpop.f32.mrf.mxu1 }
 0xfdb   :  { %v3921_v11 = vadd.f32 %v3917_v48, %v6801_v53 }
 0xfdc   :  { %v4466_v29 = vpop.f32.mrf.mxu1 }
 0xfdd   :  { %v3926_v4 = vadd.f32 %v3925_v12, %v3921_v11 }
 0xfdf   :  { %v3927_v18 = vsel %vm201_vm2, %v3926_v4, 0.0 }
 0xfe0   :  { %3928 = vadd.xlane.f32.xlu1 %v3927_v18 }
0x1069   :  { %v3929_v47 = vpop.xlane.xlu1 %3928 }
0x106a   :  { %v3930_v60 = vmul.f32 0.03125, %v3929_v47 }
0x106c   :  { %v3931_v1 = vsub.f32 %v3926_v4, %v3930_v60 }
0x106e   :  { %v3932_v55 = vmul.f32 %v3931_v1, %v3931_v1 }
0x1070   :  { %v3933_v3 = vsel %vm201_vm2, %v3932_v55, 0.0 }
0x1071   :  { %3934 = vadd.xlane.f32.xlu0 %v3933_v3 }
0x10fa   :  { %v3935_v49 = vpop.xlane.xlu0 %3934 }
0x10fb   :  { %v3936_v59 = vmul.f32 0.03125, %v3935_v49 }
0x10fd   :  { %v3937_v14 = vadd.f32 1e-05, %v3936_v59 }
0x10ff   :  { %4511 = vrsqrt.f32 %v3937_v14 }
0x110c   :  { %v4512_v8 = vpop.eup %4511 }
0x110d   :  { %v3939_v39 = vmul.f32 %v4512_v8, %v3931_v1 }
0x110f   :  { %v3944_v56 = vmul.f32 %v3943_v15, %v3939_v39 }
0x1111   :  { %v3949_v53 = vadd.f32 %v3948_v30, %v3944_v56 }
0x1113   :  { %v3950_v10 = vmax.f32 %v3949_v53, 0.0 }
0x1115   :  { %4476 = vmatmul.mubr.msk.f32.vlgmr.msra.gmra.mxu0 %vm201_vm2, %v3950_v10 }
0x11d5   :  { %v4024_v63 = vpop.f32.mrf.mxu0 }
0x11d6   :  { %v4025_v7 = vadd.f32 %v4114_v42, %v4024_v63 }
0x11d7   :  { %v4477_v23 = vpop.f32.mrf.mxu0 }
0x11d8   :  { %4028 = vst [vmem:[%s6902_s5] sm:$0xff] %v4025_v7 }

</bundles_post_ra>
